<compile_context>
chip_gen: v6e
topology: v6e:2x2x1
jax: 0.10.0
libtpu: 0.0.40
codegen_flags: <defaults>
</compile_context>

<pallas_src>
import functools

import numpy as np
import jax
import jax.numpy as jnp
from jax.experimental import pallas as pl
from jax.experimental.pallas import tpu as pltpu

NPAD = 128                      # lane-dense padding for aux-K and head-N
COMPUTE_DTYPE = jnp.bfloat16    # MXU operand dtype (accumulation stays f32)

_WEIGHT_ORDER = ("g2", "w1", "b1", "w2", "b2", "w3", "b3",
                 "l1w", "l1b", "l2w", "l2b",
                 "f1wa", "f1wb", "f1b", "f2w", "f2b")


# ---------------------------------------------------------------------------
# Fused kernel: one batch element per grid step, everything resident in VMEM.
# ---------------------------------------------------------------------------
def _nature_cnn_kernel(p1_ref, aux_ref, g2_ref,
                       w1_ref, b1_ref, w2_ref, b2_ref, w3_ref, b3_ref,
                       l1w_ref, l1b_ref, l2w_ref, l2b_ref,
                       f1wa_ref, f1wb_ref, f1b_ref, f2w_ref, f2b_ref,
                       o_ref):
    f32 = jnp.float32
    cdt = w1_ref.dtype                       # bf16 compute dtype

    # ---- conv1 (8x8, stride 4) as a single matmul over prebuilt patches ----
    p1 = p1_ref[0]                                              # (64, 192)
    a1 = jnp.dot(p1, w1_ref[...], preferred_element_type=f32) + b1_ref[...]
    h1 = jnp.maximum(a1, 0.0).astype(cdt)                       # (64, 32) rows=(i1,j1)

    # ---- conv2 (4x4, stride 2): in-kernel spatial im2col via 0/1 gather ----
    # p2[(ki,kj)*9 + (i2,j2), ci] == h1[(2*i2+ki)*8 + 2*j2+kj, ci]
    p2 = jnp.dot(g2_ref[...], h1, preferred_element_type=f32)   # (144, 32) f32
    w2 = w2_ref[...]                                            # (512, 64) rows=(ki,kj,ci)
    s2 = jnp.zeros((9, 64), f32)
    for p in range(16):                                         # unrolled kernel positions
        s2 = s2 + jnp.dot(p2[p * 9:(p + 1) * 9, :],
                          w2[p * 32:(p + 1) * 32, :],
                          preferred_element_type=f32)
    h2 = jnp.maximum(s2 + b2_ref[...], 0.0)                     # (9, 64) rows=(i2,j2)

    # ---- conv3 (3x3, stride 1, full coverage -> 1x1 spatial) ---------------
    w3 = w3_ref[...]                                            # (576, 64) rows=(ki,kj,ci)
    s3 = jnp.zeros((1, 64), f32)
    for p in range(9):
        s3 = s3 + jnp.dot(h2[p:p + 1, :],
                          w3[p * 64:(p + 1) * 64, :],
                          preferred_element_type=f32)
    x1 = jnp.maximum(s3 + b3_ref[...], 0.0).astype(cdt)         # (1, 64) == CNN flatten

    # ---- aux MLP: Linear(22->512) -> ReLU -> Linear(512->512), K padded ----
    d = aux_ref[0]                                              # (1, 128)
    a = jnp.dot(d, l1w_ref[...], preferred_element_type=f32) + l1b_ref[...]
    a = jnp.maximum(a, 0.0).astype(cdt)
    x2 = (jnp.dot(a, l2w_ref[...], preferred_element_type=f32)
          + l2b_ref[...]).astype(cdt)                           # (1, 512)

    # ---- head: concat(x1, x2) @ W == x1 @ W[:64] + x2 @ W[64:] -------------
    h = (jnp.dot(x1, f1wa_ref[...], preferred_element_type=f32)
         + jnp.dot(x2, f1wb_ref[...], preferred_element_type=f32)
         + f1b_ref[...])
    h = jnp.maximum(h, 0.0).astype(cdt)                         # (1, 512)
    y = jnp.dot(h, f2w_ref[...], preferred_element_type=f32) + f2b_ref[...]
    o_ref[0] = y.astype(o_ref.dtype)                            # (1, 128) lane-dense store


# ---------------------------------------------------------------------------
# Constant 0/1 gather matrix for conv2's spatial im2col (built once at init).
# Row index = (ki*4+kj)*9 + i2*3 + j2, column = conv1 spatial index.
# ---------------------------------------------------------------------------
def _build_conv2_gather():
    g = np.zeros((16 * 9, 64), np.float32)
    for ki in range(4):
        for kj in range(4):
            p = ki * 4 + kj
            for i2 in range(3):
                for j2 in range(3):
                    r = p * 9 + i2 * 3 + j2
                    s = (2 * i2 + ki) * 8 + (2 * j2 + kj)
                    g[r, s] = 1.0
    return g


# ---------------------------------------------------------------------------
# conv1 patch extraction (depends only on the network input -> wrapper glue).
# ---------------------------------------------------------------------------
def _conv1_patches(x_nhwc):
    B, H, W, C = x_nhwc.shape
    assert H == 36 and W == 36, "fused kernel is specialized to 36x36 inputs"
    # TODO(synk): generalize the fused conv geometry beyond the minimal 36x36 input.
    xr = x_nhwc.reshape(B, 9, 4, 9, 4, C)
    row_blocks = []
    for a in range(2):                        # kernel row block: ki = 4*a + r
        col_blocks = []
        for c in range(2):                    # kernel col block: kj = 4*c + s
            slab = xr[:, a:a + 8, :, c:c + 8, :, :]                      # (B,8,4,8,4,C)
            col_blocks.append(jnp.transpose(slab, (0, 1, 3, 2, 4, 5)))   # (B,8,8,4,4,C)
        row_blocks.append(jnp.concatenate(col_blocks, axis=4))           # (B,8,8,4,8,C)
    patches = jnp.concatenate(row_blocks, axis=3)                        # (B,8,8,8,8,C)
    return patches.reshape(B, 64, 64 * C)        # rows=(i1,j1), cols=(ki,kj,ch)


# ---------------------------------------------------------------------------
# Parameters (PyTorch-equivalent shapes) + kernel-ready layouts.
# ---------------------------------------------------------------------------
def init_params(key, input_shape, output_dim):
    c, h, w = input_shape

    def conv_out(s, k, st):
        return (s - k) // st + 1

    h1, w1 = conv_out(h, 8, 4), conv_out(w, 8, 4)
    h2, w2 = conv_out(h1, 4, 2), conv_out(w1, 4, 2)
    h3, w3 = conv_out(h2, 3, 1), conv_out(w2, 3, 1)
    n_flatten = 64 * h3 * w3

    ks = jax.random.split(key, 14)

    def dense(kw_, kb_, fan_in, shape_w, shape_b):
        scale = 1.0 / jnp.sqrt(fan_in)
        return (jax.random.uniform(kw_, shape_w, jnp.float32, -scale, scale),
                jax.random.uniform(kb_, shape_b, jnp.float32, -scale, scale))

    p = {}
    p["c1_w"], p["c1_b"] = dense(ks[0], ks[1], c * 8 * 8, (8, 8, c, 32), (32,))
    p["c2_w"], p["c2_b"] = dense(ks[2], ks[3], 32 * 4 * 4, (4, 4, 32, 64), (64,))
    p["c3_w"], p["c3_b"] = dense(ks[4], ks[5], 64 * 3 * 3, (3, 3, 64, 64), (64,))
    p["l1_w"], p["l1_b"] = dense(ks[6], ks[7], 22, (22, 512), (512,))
    p["l2_w"], p["l2_b"] = dense(ks[8], ks[9], 512, (512, 512), (512,))
    p["f1_w"], p["f1_b"] = dense(ks[10], ks[11], n_flatten + 512,
                                 (n_flatten + 512, 512), (512,))
    p["f2_w"], p["f2_b"] = dense(ks[12], ks[13], 512, (512, output_dim), (output_dim,))
    return p, n_flatten


def prepare_params(p, n_flatten, output_dim, compute_dtype=COMPUTE_DTYPE):
    """Pre-cast / pre-reshape / pre-pad all weights into the kernel layout once."""
    f32 = jnp.float32
    aux_in = p["l1_w"].shape[0]
    assert n_flatten == 64, "fused kernel is specialized to a 1x1x64 CNN feature map"
    kp = {
        "w1": p["c1_w"].reshape(-1, 32).astype(compute_dtype),        # (192, 32)
        "b1": p["c1_b"].reshape(1, -1).astype(f32),
        "w2": p["c2_w"].reshape(-1, 64).astype(f32),                  # (512, 64)
        "b2": p["c2_b"].reshape(1, -1).astype(f32),
        "w3": p["c3_w"].reshape(-1, 64).astype(f32),                  # (576, 64)
        "b3": p["c3_b"].reshape(1, -1).astype(f32),
        "l1w": jnp.zeros((NPAD, 512), f32).at[:aux_in].set(p["l1_w"]).astype(compute_dtype),
        "l1b": p["l1_b"].reshape(1, -1).astype(f32),
        "l2w": p["l2_w"].astype(compute_dtype),
        "l2b": p["l2_b"].reshape(1, -1).astype(f32),
        "f1wa": p["f1_w"][:n_flatten].astype(compute_dtype),          # (64, 512)
        "f1wb": p["f1_w"][n_flatten:].astype(compute_dtype),          # (512, 512)
        "f1b": p["f1_b"].reshape(1, -1).astype(f32),
        "f2w": jnp.zeros((512, NPAD), f32).at[:, :output_dim].set(p["f2_w"]).astype(compute_dtype),
        "f2b": jnp.zeros((1, NPAD), f32).at[0, :output_dim].set(p["f2_b"]),
        "g2": jnp.asarray(_build_conv2_gather(), compute_dtype),      # (144, 64)
    }
    return kp


# ---------------------------------------------------------------------------
# Forward pass: one fused pallas_call.
# ---------------------------------------------------------------------------
@functools.partial(jax.jit, static_argnums=(3,))
def nature_cnn_forward(kp, observations_nchw, aux_data, output_dim):
    x = jnp.transpose(observations_nchw.astype(jnp.float32), (0, 2, 3, 1))   # NHWC
    B = x.shape[0]
    cdt = kp["w1"].dtype

    patches1 = _conv1_patches(x).astype(cdt)                                 # (B, 64, 192)
    aux = jnp.zeros((B, 1, NPAD), jnp.float32)
    aux = aux.at[:, 0, :aux_data.shape[1]].set(aux_data).astype(cdt)         # (B, 1, 128)

    weights = [kp[name] for name in _WEIGHT_ORDER]
    in_specs = [
        pl.BlockSpec((1, 64, patches1.shape[-1]), lambda i: (i, 0, 0)),
        pl.BlockSpec((1, 1, NPAD), lambda i: (i, 0, 0)),
    ] + [pl.BlockSpec(w.shape, lambda i: (0, 0)) for w in weights]

    out = pl.pallas_call(
        _nature_cnn_kernel,
        grid=(B,),
        out_shape=jax.ShapeDtypeStruct((B, 1, NPAD), jnp.float32),
        in_specs=in_specs,
        out_specs=pl.BlockSpec((1, 1, NPAD), lambda i: (i, 0, 0)),
        compiler_params=pltpu.CompilerParams(
            dimension_semantics=("parallel",),        # batch across TCs on v7x
            vmem_limit_bytes=32 * 1024 * 1024),
    )(patches1, aux, *weights)

    return out.reshape(B, NPAD)[:, :output_dim]


# ---------------------------------------------------------------------------
# Pure-JAX reference (independent formulation) for a numerical sanity check.
# ---------------------------------------------------------------------------
def reference_forward(params, observations_nchw, aux_data):
    x = jnp.transpose(observations_nchw.astype(jnp.float32), (0, 2, 3, 1))

    def conv(v, w, b, s):
        y = jax.lax.conv_general_dilated(
            v, w, (s, s), "VALID", dimension_numbers=("NHWC", "HWIO", "NHWC"))
        return jax.nn.relu(y + b)

    x = conv(x, params["c1_w"], params["c1_b"], 4)
    x = conv(x, params["c2_w"], params["c2_b"], 2)
    x = conv(x, params["c3_w"], params["c3_b"], 1)
    x1 = jnp.transpose(x, (0, 3, 1, 2)).reshape(x.shape[0], -1)
    x2 = jax.nn.relu(aux_data @ params["l1_w"] + params["l1_b"])
    x2 = x2 @ params["l2_w"] + params["l2_b"]
    xc = jnp.concatenate([x1, x2], axis=1)
    h = jax.nn.relu(xc @ params["f1_w"] + params["f1_b"])
    return h @ params["f2_w"] + params["f2_b"]


if __name__ == "__main__":
    # Smallest spatial size compatible with the conv stack:
    # conv(8,s4): 36 -> 8 ; conv(4,s2): 8 -> 3 ; conv(3,s1): 3 -> 1
    B = 2
    input_shape = (3, 36, 36)     # (C, H, W), PyTorch convention
    output_dim = 8

    key = jax.random.PRNGKey(0)
    kparam, kobs, kaux = jax.random.split(key, 3)

    params, n_flatten = init_params(kparam, input_shape, output_dim)
    kernel_params = prepare_params(params, n_flatten, output_dim)

    observations = jax.random.uniform(kobs, (B,) + input_shape, jnp.float32)
    aux_data = jax.random.normal(kaux, (B, 22), jnp.float32)

    out = nature_cnn_forward(kernel_params, observations, aux_data, output_dim)
    out = jax.block_until_ready(out)
    assert out.shape == (B, output_dim), out.shape

    ref = jax.block_until_ready(reference_forward(params, observations, aux_data))
    err = float(jnp.max(jnp.abs(out - ref)) / (jnp.max(jnp.abs(ref)) + 1e-6))
    assert err < 0.1, f"numerical mismatch vs reference: {err}"

    print("KERNEL_OK")
</pallas_src>

<mosaic_0001>
module attributes {stable_mosaic.version = 11 : i64} {
  func.func @_nature_cnn_kernel(%arg0: i32, %arg1: memref<1x64x192xbf16, #tpu.memory_space<vmem>>, %arg2: memref<1x1x128xbf16, #tpu.memory_space<vmem>>, %arg3: memref<144x64xbf16, #tpu.memory_space<vmem>>, %arg4: memref<192x32xbf16, #tpu.memory_space<vmem>>, %arg5: memref<1x32xf32, #tpu.memory_space<vmem>>, %arg6: memref<512x64xf32, #tpu.memory_space<vmem>>, %arg7: memref<1x64xf32, #tpu.memory_space<vmem>>, %arg8: memref<576x64xf32, #tpu.memory_space<vmem>>, %arg9: memref<1x64xf32, #tpu.memory_space<vmem>>, %arg10: memref<128x512xbf16, #tpu.memory_space<vmem>>, %arg11: memref<1x512xf32, #tpu.memory_space<vmem>>, %arg12: memref<512x512xbf16, #tpu.memory_space<vmem>>, %arg13: memref<1x512xf32, #tpu.memory_space<vmem>>, %arg14: memref<64x512xbf16, #tpu.memory_space<vmem>>, %arg15: memref<512x512xbf16, #tpu.memory_space<vmem>>, %arg16: memref<1x512xf32, #tpu.memory_space<vmem>>, %arg17: memref<512x128xbf16, #tpu.memory_space<vmem>>, %arg18: memref<1x128xf32, #tpu.memory_space<vmem>>, %arg19: memref<1x1x128xf32, #tpu.memory_space<vmem>>) attributes {dimension_semantics = [#tpu.dimension_semantics<parallel>], iteration_bounds = array<i64: 2>, scalar_prefetch = 0 : i64, scratch_operands = 0 : i64, tpu.core_type = #tpu.core_type<tc>, window_params = [{transform_indices = @transform_0, window_bounds = array<i64: 1, 64, 192>}, {transform_indices = @transform_1, window_bounds = array<i64: 1, 1, 128>}, {pipeline_mode = #tpu.pipeline_mode<synchronous>, transform_indices = @transform_2, window_bounds = array<i64: 144, 64>}, {pipeline_mode = #tpu.pipeline_mode<synchronous>, transform_indices = @transform_3, window_bounds = array<i64: 192, 32>}, {pipeline_mode = #tpu.pipeline_mode<synchronous>, transform_indices = @transform_4, window_bounds = array<i64: 1, 32>}, {pipeline_mode = #tpu.pipeline_mode<synchronous>, transform_indices = @transform_5, window_bounds = array<i64: 512, 64>}, {pipeline_mode = #tpu.pipeline_mode<synchronous>, transform_indices = @transform_6, window_bounds = array<i64: 1, 64>}, {pipeline_mode = #tpu.pipeline_mode<synchronous>, transform_indices = @transform_7, window_bounds = array<i64: 576, 64>}, {pipeline_mode = #tpu.pipeline_mode<synchronous>, transform_indices = @transform_8, window_bounds = array<i64: 1, 64>}, {pipeline_mode = #tpu.pipeline_mode<synchronous>, transform_indices = @transform_9, window_bounds = array<i64: 128, 512>}, {pipeline_mode = #tpu.pipeline_mode<synchronous>, transform_indices = @transform_10, window_bounds = array<i64: 1, 512>}, {pipeline_mode = #tpu.pipeline_mode<synchronous>, transform_indices = @transform_11, window_bounds = array<i64: 512, 512>}, {pipeline_mode = #tpu.pipeline_mode<synchronous>, transform_indices = @transform_12, window_bounds = array<i64: 1, 512>}, {pipeline_mode = #tpu.pipeline_mode<synchronous>, transform_indices = @transform_13, window_bounds = array<i64: 64, 512>}, {pipeline_mode = #tpu.pipeline_mode<synchronous>, transform_indices = @transform_14, window_bounds = array<i64: 512, 512>}, {pipeline_mode = #tpu.pipeline_mode<synchronous>, transform_indices = @transform_15, window_bounds = array<i64: 1, 512>}, {pipeline_mode = #tpu.pipeline_mode<synchronous>, transform_indices = @transform_16, window_bounds = array<i64: 512, 128>}, {pipeline_mode = #tpu.pipeline_mode<synchronous>, transform_indices = @transform_17, window_bounds = array<i64: 1, 128>}, {transform_indices = @transform_18, window_bounds = array<i64: 1, 1, 128>}]} {
    %c0 = arith.constant 0 : index
    %c0_0 = arith.constant 0 : index
    %c0_1 = arith.constant 0 : index
    %0 = vector.load %arg1[%c0, %c0_0, %c0_1] : memref<1x64x192xbf16, #tpu.memory_space<vmem>>, vector<1x64x192xbf16>
    %1 = vector.shape_cast %0 : vector<1x64x192xbf16> to vector<64x192xbf16>
    %c0_2 = arith.constant 0 : index
    %c0_3 = arith.constant 0 : index
    %2 = vector.load %arg4[%c0_2, %c0_3] : memref<192x32xbf16, #tpu.memory_space<vmem>>, vector<192x32xbf16>
    %cst = arith.constant dense<0.000000e+00> : vector<64x32xf32>
    %3 = tpu.matmul %1, %2, %cst {dimension_numbers = #tpu.dot_dimension_numbers<[1], [0], [0], [1], [0, 0, 1, 1], [], []>} : vector<64x192xbf16>, vector<192x32xbf16>, vector<64x32xf32> -> vector<64x32xf32>
    %c0_4 = arith.constant 0 : index
    %c0_5 = arith.constant 0 : index
    %4 = vector.load %arg5[%c0_4, %c0_5] : memref<1x32xf32, #tpu.memory_space<vmem>>, vector<1x32xf32>
    %5 = vector.broadcast %4 : vector<1x32xf32> to vector<64x32xf32>
    %6 = arith.addf %3, %5 : vector<64x32xf32>
    %cst_6 = arith.constant 0.000000e+00 : f32
    %7 = vector.broadcast %cst_6 : f32 to vector<64x32xf32>
    %8 = arith.maximumf %6, %7 : vector<64x32xf32>
    %9 = arith.truncf %8 : vector<64x32xf32> to vector<64x32xbf16>
    %c0_7 = arith.constant 0 : index
    %c0_8 = arith.constant 0 : index
    %10 = vector.load %arg3[%c0_7, %c0_8] : memref<144x64xbf16, #tpu.memory_space<vmem>>, vector<144x64xbf16>
    %cst_9 = arith.constant dense<0.000000e+00> : vector<144x32xf32>
    %11 = tpu.matmul %10, %9, %cst_9 {dimension_numbers = #tpu.dot_dimension_numbers<[1], [0], [0], [1], [0, 0, 1, 1], [], []>} : vector<144x64xbf16>, vector<64x32xbf16>, vector<144x32xf32> -> vector<144x32xf32>
    %c0_10 = arith.constant 0 : index
    %c0_11 = arith.constant 0 : index
    %12 = vector.load %arg6[%c0_10, %c0_11] : memref<512x64xf32, #tpu.memory_space<vmem>>, vector<512x64xf32>
    %cst_12 = arith.constant 0.000000e+00 : f32
    %13 = vector.broadcast %cst_12 : f32 to vector<9x64xf32>
    %14 = vector.extract_strided_slice %11 {offsets = [0, 0], sizes = [9, 32], strides = [1, 1]} : vector<144x32xf32> to vector<9x32xf32>
    %15 = vector.extract_strided_slice %12 {offsets = [0, 0], sizes = [32, 64], strides = [1, 1]} : vector<512x64xf32> to vector<32x64xf32>
    %cst_13 = arith.constant dense<0.000000e+00> : vector<9x64xf32>
    %16 = tpu.matmul %14, %15, %cst_13 {dimension_numbers = #tpu.dot_dimension_numbers<[1], [0], [0], [1], [0, 0, 1, 1], [], []>} : vector<9x32xf32>, vector<32x64xf32>, vector<9x64xf32> -> vector<9x64xf32>
    %17 = arith.addf %13, %16 : vector<9x64xf32>
    %18 = vector.extract_strided_slice %11 {offsets = [9, 0], sizes = [9, 32], strides = [1, 1]} : vector<144x32xf32> to vector<9x32xf32>
    %19 = vector.extract_strided_slice %12 {offsets = [32, 0], sizes = [32, 64], strides = [1, 1]} : vector<512x64xf32> to vector<32x64xf32>
    %cst_14 = arith.constant dense<0.000000e+00> : vector<9x64xf32>
    %20 = tpu.matmul %18, %19, %cst_14 {dimension_numbers = #tpu.dot_dimension_numbers<[1], [0], [0], [1], [0, 0, 1, 1], [], []>} : vector<9x32xf32>, vector<32x64xf32>, vector<9x64xf32> -> vector<9x64xf32>
    %21 = arith.addf %17, %20 : vector<9x64xf32>
    %22 = vector.extract_strided_slice %11 {offsets = [18, 0], sizes = [9, 32], strides = [1, 1]} : vector<144x32xf32> to vector<9x32xf32>
    %23 = vector.extract_strided_slice %12 {offsets = [64, 0], sizes = [32, 64], strides = [1, 1]} : vector<512x64xf32> to vector<32x64xf32>
    %cst_15 = arith.constant dense<0.000000e+00> : vector<9x64xf32>
    %24 = tpu.matmul %22, %23, %cst_15 {dimension_numbers = #tpu.dot_dimension_numbers<[1], [0], [0], [1], [0, 0, 1, 1], [], []>} : vector<9x32xf32>, vector<32x64xf32>, vector<9x64xf32> -> vector<9x64xf32>
    %25 = arith.addf %21, %24 : vector<9x64xf32>
    %26 = vector.extract_strided_slice %11 {offsets = [27, 0], sizes = [9, 32], strides = [1, 1]} : vector<144x32xf32> to vector<9x32xf32>
    %27 = vector.extract_strided_slice %12 {offsets = [96, 0], sizes = [32, 64], strides = [1, 1]} : vector<512x64xf32> to vector<32x64xf32>
    %cst_16 = arith.constant dense<0.000000e+00> : vector<9x64xf32>
    %28 = tpu.matmul %26, %27, %cst_16 {dimension_numbers = #tpu.dot_dimension_numbers<[1], [0], [0], [1], [0, 0, 1, 1], [], []>} : vector<9x32xf32>, vector<32x64xf32>, vector<9x64xf32> -> vector<9x64xf32>
    %29 = arith.addf %25, %28 : vector<9x64xf32>
    %30 = vector.extract_strided_slice %11 {offsets = [36, 0], sizes = [9, 32], strides = [1, 1]} : vector<144x32xf32> to vector<9x32xf32>
    %31 = vector.extract_strided_slice %12 {offsets = [128, 0], sizes = [32, 64], strides = [1, 1]} : vector<512x64xf32> to vector<32x64xf32>
    %cst_17 = arith.constant dense<0.000000e+00> : vector<9x64xf32>
    %32 = tpu.matmul %30, %31, %cst_17 {dimension_numbers = #tpu.dot_dimension_numbers<[1], [0], [0], [1], [0, 0, 1, 1], [], []>} : vector<9x32xf32>, vector<32x64xf32>, vector<9x64xf32> -> vector<9x64xf32>
    %33 = arith.addf %29, %32 : vector<9x64xf32>
    %34 = vector.extract_strided_slice %11 {offsets = [45, 0], sizes = [9, 32], strides = [1, 1]} : vector<144x32xf32> to vector<9x32xf32>
    %35 = vector.extract_strided_slice %12 {offsets = [160, 0], sizes = [32, 64], strides = [1, 1]} : vector<512x64xf32> to vector<32x64xf32>
    %cst_18 = arith.constant dense<0.000000e+00> : vector<9x64xf32>
    %36 = tpu.matmul %34, %35, %cst_18 {dimension_numbers = #tpu.dot_dimension_numbers<[1], [0], [0], [1], [0, 0, 1, 1], [], []>} : vector<9x32xf32>, vector<32x64xf32>, vector<9x64xf32> -> vector<9x64xf32>
    %37 = arith.addf %33, %36 : vector<9x64xf32>
    %38 = vector.extract_strided_slice %11 {offsets = [54, 0], sizes = [9, 32], strides = [1, 1]} : vector<144x32xf32> to vector<9x32xf32>
    %39 = vector.extract_strided_slice %12 {offsets = [192, 0], sizes = [32, 64], strides = [1, 1]} : vector<512x64xf32> to vector<32x64xf32>
    %cst_19 = arith.constant dense<0.000000e+00> : vector<9x64xf32>
    %40 = tpu.matmul %38, %39, %cst_19 {dimension_numbers = #tpu.dot_dimension_numbers<[1], [0], [0], [1], [0, 0, 1, 1], [], []>} : vector<9x32xf32>, vector<32x64xf32>, vector<9x64xf32> -> vector<9x64xf32>
    %41 = arith.addf %37, %40 : vector<9x64xf32>
    %42 = vector.extract_strided_slice %11 {offsets = [63, 0], sizes = [9, 32], strides = [1, 1]} : vector<144x32xf32> to vector<9x32xf32>
    %43 = vector.extract_strided_slice %12 {offsets = [224, 0], sizes = [32, 64], strides = [1, 1]} : vector<512x64xf32> to vector<32x64xf32>
    %cst_20 = arith.constant dense<0.000000e+00> : vector<9x64xf32>
    %44 = tpu.matmul %42, %43, %cst_20 {dimension_numbers = #tpu.dot_dimension_numbers<[1], [0], [0], [1], [0, 0, 1, 1], [], []>} : vector<9x32xf32>, vector<32x64xf32>, vector<9x64xf32> -> vector<9x64xf32>
    %45 = arith.addf %41, %44 : vector<9x64xf32>
    %46 = vector.extract_strided_slice %11 {offsets = [72, 0], sizes = [9, 32], strides = [1, 1]} : vector<144x32xf32> to vector<9x32xf32>
    %47 = vector.extract_strided_slice %12 {offsets = [256, 0], sizes = [32, 64], strides = [1, 1]} : vector<512x64xf32> to vector<32x64xf32>
    %cst_21 = arith.constant dense<0.000000e+00> : vector<9x64xf32>
    %48 = tpu.matmul %46, %47, %cst_21 {dimension_numbers = #tpu.dot_dimension_numbers<[1], [0], [0], [1], [0, 0, 1, 1], [], []>} : vector<9x32xf32>, vector<32x64xf32>, vector<9x64xf32> -> vector<9x64xf32>
    %49 = arith.addf %45, %48 : vector<9x64xf32>
    %50 = vector.extract_strided_slice %11 {offsets = [81, 0], sizes = [9, 32], strides = [1, 1]} : vector<144x32xf32> to vector<9x32xf32>
    %51 = vector.extract_strided_slice %12 {offsets = [288, 0], sizes = [32, 64], strides = [1, 1]} : vector<512x64xf32> to vector<32x64xf32>
    %cst_22 = arith.constant dense<0.000000e+00> : vector<9x64xf32>
    %52 = tpu.matmul %50, %51, %cst_22 {dimension_numbers = #tpu.dot_dimension_numbers<[1], [0], [0], [1], [0, 0, 1, 1], [], []>} : vector<9x32xf32>, vector<32x64xf32>, vector<9x64xf32> -> vector<9x64xf32>
    %53 = arith.addf %49, %52 : vector<9x64xf32>
    %54 = vector.extract_strided_slice %11 {offsets = [90, 0], sizes = [9, 32], strides = [1, 1]} : vector<144x32xf32> to vector<9x32xf32>
    %55 = vector.extract_strided_slice %12 {offsets = [320, 0], sizes = [32, 64], strides = [1, 1]} : vector<512x64xf32> to vector<32x64xf32>
    %cst_23 = arith.constant dense<0.000000e+00> : vector<9x64xf32>
    %56 = tpu.matmul %54, %55, %cst_23 {dimension_numbers = #tpu.dot_dimension_numbers<[1], [0], [0], [1], [0, 0, 1, 1], [], []>} : vector<9x32xf32>, vector<32x64xf32>, vector<9x64xf32> -> vector<9x64xf32>
    %57 = arith.addf %53, %56 : vector<9x64xf32>
    %58 = vector.extract_strided_slice %11 {offsets = [99, 0], sizes = [9, 32], strides = [1, 1]} : vector<144x32xf32> to vector<9x32xf32>
    %59 = vector.extract_strided_slice %12 {offsets = [352, 0], sizes = [32, 64], strides = [1, 1]} : vector<512x64xf32> to vector<32x64xf32>
    %cst_24 = arith.constant dense<0.000000e+00> : vector<9x64xf32>
    %60 = tpu.matmul %58, %59, %cst_24 {dimension_numbers = #tpu.dot_dimension_numbers<[1], [0], [0], [1], [0, 0, 1, 1], [], []>} : vector<9x32xf32>, vector<32x64xf32>, vector<9x64xf32> -> vector<9x64xf32>
    %61 = arith.addf %57, %60 : vector<9x64xf32>
    %62 = vector.extract_strided_slice %11 {offsets = [108, 0], sizes = [9, 32], strides = [1, 1]} : vector<144x32xf32> to vector<9x32xf32>
    %63 = vector.extract_strided_slice %12 {offsets = [384, 0], sizes = [32, 64], strides = [1, 1]} : vector<512x64xf32> to vector<32x64xf32>
    %cst_25 = arith.constant dense<0.000000e+00> : vector<9x64xf32>
    %64 = tpu.matmul %62, %63, %cst_25 {dimension_numbers = #tpu.dot_dimension_numbers<[1], [0], [0], [1], [0, 0, 1, 1], [], []>} : vector<9x32xf32>, vector<32x64xf32>, vector<9x64xf32> -> vector<9x64xf32>
    %65 = arith.addf %61, %64 : vector<9x64xf32>
    %66 = vector.extract_strided_slice %11 {offsets = [117, 0], sizes = [9, 32], strides = [1, 1]} : vector<144x32xf32> to vector<9x32xf32>
    %67 = vector.extract_strided_slice %12 {offsets = [416, 0], sizes = [32, 64], strides = [1, 1]} : vector<512x64xf32> to vector<32x64xf32>
    %cst_26 = arith.constant dense<0.000000e+00> : vector<9x64xf32>
    %68 = tpu.matmul %66, %67, %cst_26 {dimension_numbers = #tpu.dot_dimension_numbers<[1], [0], [0], [1], [0, 0, 1, 1], [], []>} : vector<9x32xf32>, vector<32x64xf32>, vector<9x64xf32> -> vector<9x64xf32>
    %69 = arith.addf %65, %68 : vector<9x64xf32>
    %70 = vector.extract_strided_slice %11 {offsets = [126, 0], sizes = [9, 32], strides = [1, 1]} : vector<144x32xf32> to vector<9x32xf32>
    %71 = vector.extract_strided_slice %12 {offsets = [448, 0], sizes = [32, 64], strides = [1, 1]} : vector<512x64xf32> to vector<32x64xf32>
    %cst_27 = arith.constant dense<0.000000e+00> : vector<9x64xf32>
    %72 = tpu.matmul %70, %71, %cst_27 {dimension_numbers = #tpu.dot_dimension_numbers<[1], [0], [0], [1], [0, 0, 1, 1], [], []>} : vector<9x32xf32>, vector<32x64xf32>, vector<9x64xf32> -> vector<9x64xf32>
    %73 = arith.addf %69, %72 : vector<9x64xf32>
    %74 = vector.extract_strided_slice %11 {offsets = [135, 0], sizes = [9, 32], strides = [1, 1]} : vector<144x32xf32> to vector<9x32xf32>
    %75 = vector.extract_strided_slice %12 {offsets = [480, 0], sizes = [32, 64], strides = [1, 1]} : vector<512x64xf32> to vector<32x64xf32>
    %cst_28 = arith.constant dense<0.000000e+00> : vector<9x64xf32>
    %76 = tpu.matmul %74, %75, %cst_28 {dimension_numbers = #tpu.dot_dimension_numbers<[1], [0], [0], [1], [0, 0, 1, 1], [], []>} : vector<9x32xf32>, vector<32x64xf32>, vector<9x64xf32> -> vector<9x64xf32>
    %77 = arith.addf %73, %76 : vector<9x64xf32>
    %c0_29 = arith.constant 0 : index
    %c0_30 = arith.constant 0 : index
    %78 = vector.load %arg7[%c0_29, %c0_30] : memref<1x64xf32, #tpu.memory_space<vmem>>, vector<1x64xf32>
    %79 = vector.broadcast %78 : vector<1x64xf32> to vector<9x64xf32>
    %80 = arith.addf %77, %79 : vector<9x64xf32>
    %cst_31 = arith.constant 0.000000e+00 : f32
    %81 = vector.broadcast %cst_31 : f32 to vector<9x64xf32>
    %82 = arith.maximumf %80, %81 : vector<9x64xf32>
    %c0_32 = arith.constant 0 : index
    %c0_33 = arith.constant 0 : index
    %83 = vector.load %arg8[%c0_32, %c0_33] : memref<576x64xf32, #tpu.memory_space<vmem>>, vector<576x64xf32>
    %cst_34 = arith.constant 0.000000e+00 : f32
    %84 = vector.broadcast %cst_34 : f32 to vector<1x64xf32>
    %85 = vector.extract_strided_slice %82 {offsets = [0, 0], sizes = [1, 64], strides = [1, 1]} : vector<9x64xf32> to vector<1x64xf32>
    %86 = vector.extract_strided_slice %83 {offsets = [0, 0], sizes = [64, 64], strides = [1, 1]} : vector<576x64xf32> to vector<64x64xf32>
    %cst_35 = arith.constant dense<0.000000e+00> : vector<1x64xf32>
    %87 = tpu.matmul %85, %86, %cst_35 {dimension_numbers = #tpu.dot_dimension_numbers<[1], [0], [0], [1], [0, 0, 1, 1], [], []>} : vector<1x64xf32>, vector<64x64xf32>, vector<1x64xf32> -> vector<1x64xf32>
    %88 = arith.addf %84, %87 : vector<1x64xf32>
    %89 = vector.extract_strided_slice %82 {offsets = [1, 0], sizes = [1, 64], strides = [1, 1]} : vector<9x64xf32> to vector<1x64xf32>
    %90 = vector.extract_strided_slice %83 {offsets = [64, 0], sizes = [64, 64], strides = [1, 1]} : vector<576x64xf32> to vector<64x64xf32>
    %cst_36 = arith.constant dense<0.000000e+00> : vector<1x64xf32>
    %91 = tpu.matmul %89, %90, %cst_36 {dimension_numbers = #tpu.dot_dimension_numbers<[1], [0], [0], [1], [0, 0, 1, 1], [], []>} : vector<1x64xf32>, vector<64x64xf32>, vector<1x64xf32> -> vector<1x64xf32>
    %92 = arith.addf %88, %91 : vector<1x64xf32>
    %93 = vector.extract_strided_slice %82 {offsets = [2, 0], sizes = [1, 64], strides = [1, 1]} : vector<9x64xf32> to vector<1x64xf32>
    %94 = vector.extract_strided_slice %83 {offsets = [128, 0], sizes = [64, 64], strides = [1, 1]} : vector<576x64xf32> to vector<64x64xf32>
    %cst_37 = arith.constant dense<0.000000e+00> : vector<1x64xf32>
    %95 = tpu.matmul %93, %94, %cst_37 {dimension_numbers = #tpu.dot_dimension_numbers<[1], [0], [0], [1], [0, 0, 1, 1], [], []>} : vector<1x64xf32>, vector<64x64xf32>, vector<1x64xf32> -> vector<1x64xf32>
    %96 = arith.addf %92, %95 : vector<1x64xf32>
    %97 = vector.extract_strided_slice %82 {offsets = [3, 0], sizes = [1, 64], strides = [1, 1]} : vector<9x64xf32> to vector<1x64xf32>
    %98 = vector.extract_strided_slice %83 {offsets = [192, 0], sizes = [64, 64], strides = [1, 1]} : vector<576x64xf32> to vector<64x64xf32>
    %cst_38 = arith.constant dense<0.000000e+00> : vector<1x64xf32>
    %99 = tpu.matmul %97, %98, %cst_38 {dimension_numbers = #tpu.dot_dimension_numbers<[1], [0], [0], [1], [0, 0, 1, 1], [], []>} : vector<1x64xf32>, vector<64x64xf32>, vector<1x64xf32> -> vector<1x64xf32>
    %100 = arith.addf %96, %99 : vector<1x64xf32>
    %101 = vector.extract_strided_slice %82 {offsets = [4, 0], sizes = [1, 64], strides = [1, 1]} : vector<9x64xf32> to vector<1x64xf32>
    %102 = vector.extract_strided_slice %83 {offsets = [256, 0], sizes = [64, 64], strides = [1, 1]} : vector<576x64xf32> to vector<64x64xf32>
    %cst_39 = arith.constant dense<0.000000e+00> : vector<1x64xf32>
    %103 = tpu.matmul %101, %102, %cst_39 {dimension_numbers = #tpu.dot_dimension_numbers<[1], [0], [0], [1], [0, 0, 1, 1], [], []>} : vector<1x64xf32>, vector<64x64xf32>, vector<1x64xf32> -> vector<1x64xf32>
    %104 = arith.addf %100, %103 : vector<1x64xf32>
    %105 = vector.extract_strided_slice %82 {offsets = [5, 0], sizes = [1, 64], strides = [1, 1]} : vector<9x64xf32> to vector<1x64xf32>
    %106 = vector.extract_strided_slice %83 {offsets = [320, 0], sizes = [64, 64], strides = [1, 1]} : vector<576x64xf32> to vector<64x64xf32>
    %cst_40 = arith.constant dense<0.000000e+00> : vector<1x64xf32>
    %107 = tpu.matmul %105, %106, %cst_40 {dimension_numbers = #tpu.dot_dimension_numbers<[1], [0], [0], [1], [0, 0, 1, 1], [], []>} : vector<1x64xf32>, vector<64x64xf32>, vector<1x64xf32> -> vector<1x64xf32>
    %108 = arith.addf %104, %107 : vector<1x64xf32>
    %109 = vector.extract_strided_slice %82 {offsets = [6, 0], sizes = [1, 64], strides = [1, 1]} : vector<9x64xf32> to vector<1x64xf32>
    %110 = vector.extract_strided_slice %83 {offsets = [384, 0], sizes = [64, 64], strides = [1, 1]} : vector<576x64xf32> to vector<64x64xf32>
    %cst_41 = arith.constant dense<0.000000e+00> : vector<1x64xf32>
    %111 = tpu.matmul %109, %110, %cst_41 {dimension_numbers = #tpu.dot_dimension_numbers<[1], [0], [0], [1], [0, 0, 1, 1], [], []>} : vector<1x64xf32>, vector<64x64xf32>, vector<1x64xf32> -> vector<1x64xf32>
    %112 = arith.addf %108, %111 : vector<1x64xf32>
    %113 = vector.extract_strided_slice %82 {offsets = [7, 0], sizes = [1, 64], strides = [1, 1]} : vector<9x64xf32> to vector<1x64xf32>
    %114 = vector.extract_strided_slice %83 {offsets = [448, 0], sizes = [64, 64], strides = [1, 1]} : vector<576x64xf32> to vector<64x64xf32>
    %cst_42 = arith.constant dense<0.000000e+00> : vector<1x64xf32>
    %115 = tpu.matmul %113, %114, %cst_42 {dimension_numbers = #tpu.dot_dimension_numbers<[1], [0], [0], [1], [0, 0, 1, 1], [], []>} : vector<1x64xf32>, vector<64x64xf32>, vector<1x64xf32> -> vector<1x64xf32>
    %116 = arith.addf %112, %115 : vector<1x64xf32>
    %117 = vector.extract_strided_slice %82 {offsets = [8, 0], sizes = [1, 64], strides = [1, 1]} : vector<9x64xf32> to vector<1x64xf32>
    %118 = vector.extract_strided_slice %83 {offsets = [512, 0], sizes = [64, 64], strides = [1, 1]} : vector<576x64xf32> to vector<64x64xf32>
    %cst_43 = arith.constant dense<0.000000e+00> : vector<1x64xf32>
    %119 = tpu.matmul %117, %118, %cst_43 {dimension_numbers = #tpu.dot_dimension_numbers<[1], [0], [0], [1], [0, 0, 1, 1], [], []>} : vector<1x64xf32>, vector<64x64xf32>, vector<1x64xf32> -> vector<1x64xf32>
    %120 = arith.addf %116, %119 : vector<1x64xf32>
    %c0_44 = arith.constant 0 : index
    %c0_45 = arith.constant 0 : index
    %121 = vector.load %arg9[%c0_44, %c0_45] : memref<1x64xf32, #tpu.memory_space<vmem>>, vector<1x64xf32>
    %122 = arith.addf %120, %121 : vector<1x64xf32>
    %cst_46 = arith.constant 0.000000e+00 : f32
    %123 = vector.broadcast %cst_46 : f32 to vector<1x64xf32>
    %124 = arith.maximumf %122, %123 : vector<1x64xf32>
    %125 = arith.truncf %124 : vector<1x64xf32> to vector<1x64xbf16>
    %c0_47 = arith.constant 0 : index
    %c0_48 = arith.constant 0 : index
    %c0_49 = arith.constant 0 : index
    %126 = vector.load %arg2[%c0_47, %c0_48, %c0_49] : memref<1x1x128xbf16, #tpu.memory_space<vmem>>, vector<1x1x128xbf16>
    %127 = vector.shape_cast %126 : vector<1x1x128xbf16> to vector<1x128xbf16>
    %c0_50 = arith.constant 0 : index
    %c0_51 = arith.constant 0 : index
    %128 = vector.load %arg10[%c0_50, %c0_51] : memref<128x512xbf16, #tpu.memory_space<vmem>>, vector<128x512xbf16>
    %cst_52 = arith.constant dense<0.000000e+00> : vector<1x512xf32>
    %129 = tpu.matmul %127, %128, %cst_52 {dimension_numbers = #tpu.dot_dimension_numbers<[1], [0], [0], [1], [0, 0, 1, 1], [], []>} : vector<1x128xbf16>, vector<128x512xbf16>, vector<1x512xf32> -> vector<1x512xf32>
    %c0_53 = arith.constant 0 : index
    %c0_54 = arith.constant 0 : index
    %130 = vector.load %arg11[%c0_53, %c0_54] : memref<1x512xf32, #tpu.memory_space<vmem>>, vector<1x512xf32>
    %131 = arith.addf %129, %130 : vector<1x512xf32>
    %cst_55 = arith.constant 0.000000e+00 : f32
    %132 = vector.broadcast %cst_55 : f32 to vector<1x512xf32>
    %133 = arith.maximumf %131, %132 : vector<1x512xf32>
    %134 = arith.truncf %133 : vector<1x512xf32> to vector<1x512xbf16>
    %c0_56 = arith.constant 0 : index
    %c0_57 = arith.constant 0 : index
    %135 = vector.load %arg12[%c0_56, %c0_57] : memref<512x512xbf16, #tpu.memory_space<vmem>>, vector<512x512xbf16>
    %cst_58 = arith.constant dense<0.000000e+00> : vector<1x512xf32>
    %136 = tpu.matmul %134, %135, %cst_58 {dimension_numbers = #tpu.dot_dimension_numbers<[1], [0], [0], [1], [0, 0, 1, 1], [], []>} : vector<1x512xbf16>, vector<512x512xbf16>, vector<1x512xf32> -> vector<1x512xf32>
    %c0_59 = arith.constant 0 : index
    %c0_60 = arith.constant 0 : index
    %137 = vector.load %arg13[%c0_59, %c0_60] : memref<1x512xf32, #tpu.memory_space<vmem>>, vector<1x512xf32>
    %138 = arith.addf %136, %137 : vector<1x512xf32>
    %139 = arith.truncf %138 : vector<1x512xf32> to vector<1x512xbf16>
    %c0_61 = arith.constant 0 : index
    %c0_62 = arith.constant 0 : index
    %140 = vector.load %arg14[%c0_61, %c0_62] : memref<64x512xbf16, #tpu.memory_space<vmem>>, vector<64x512xbf16>
    %cst_63 = arith.constant dense<0.000000e+00> : vector<1x512xf32>
    %141 = tpu.matmul %125, %140, %cst_63 {dimension_numbers = #tpu.dot_dimension_numbers<[1], [0], [0], [1], [0, 0, 1, 1], [], []>} : vector<1x64xbf16>, vector<64x512xbf16>, vector<1x512xf32> -> vector<1x512xf32>
    %c0_64 = arith.constant 0 : index
    %c0_65 = arith.constant 0 : index
    %142 = vector.load %arg15[%c0_64, %c0_65] : memref<512x512xbf16, #tpu.memory_space<vmem>>, vector<512x512xbf16>
    %cst_66 = arith.constant dense<0.000000e+00> : vector<1x512xf32>
    %143 = tpu.matmul %139, %142, %cst_66 {dimension_numbers = #tpu.dot_dimension_numbers<[1], [0], [0], [1], [0, 0, 1, 1], [], []>} : vector<1x512xbf16>, vector<512x512xbf16>, vector<1x512xf32> -> vector<1x512xf32>
    %144 = arith.addf %141, %143 : vector<1x512xf32>
    %c0_67 = arith.constant 0 : index
    %c0_68 = arith.constant 0 : index
    %145 = vector.load %arg16[%c0_67, %c0_68] : memref<1x512xf32, #tpu.memory_space<vmem>>, vector<1x512xf32>
    %146 = arith.addf %144, %145 : vector<1x512xf32>
    %cst_69 = arith.constant 0.000000e+00 : f32
    %147 = vector.broadcast %cst_69 : f32 to vector<1x512xf32>
    %148 = arith.maximumf %146, %147 : vector<1x512xf32>
    %149 = arith.truncf %148 : vector<1x512xf32> to vector<1x512xbf16>
    %c0_70 = arith.constant 0 : index
    %c0_71 = arith.constant 0 : index
    %150 = vector.load %arg17[%c0_70, %c0_71] : memref<512x128xbf16, #tpu.memory_space<vmem>>, vector<512x128xbf16>
    %cst_72 = arith.constant dense<0.000000e+00> : vector<1x128xf32>
    %151 = tpu.matmul %149, %150, %cst_72 {dimension_numbers = #tpu.dot_dimension_numbers<[1], [0], [0], [1], [0, 0, 1, 1], [], []>} : vector<1x512xbf16>, vector<512x128xbf16>, vector<1x128xf32> -> vector<1x128xf32>
    %c0_73 = arith.constant 0 : index
    %c0_74 = arith.constant 0 : index
    %152 = vector.load %arg18[%c0_73, %c0_74] : memref<1x128xf32, #tpu.memory_space<vmem>>, vector<1x128xf32>
    %153 = arith.addf %151, %152 : vector<1x128xf32>
    %c0_75 = arith.constant 0 : index
    %c0_76 = arith.constant 0 : index
    %c0_77 = arith.constant 0 : index
    %154 = vector.load %arg19[%c0_75, %c0_76, %c0_77] : memref<1x1x128xf32, #tpu.memory_space<vmem>>, vector<1x1x128xf32>
    %155 = vector.shape_cast %154 : vector<1x1x128xf32> to vector<1x128xf32>
    %156 = vector.shape_cast %153 : vector<1x128xf32> to vector<1x1x128xf32>
    tpu.vector_store %arg19[%c0_75, %c0_76, %c0_77], %156 {strides = array<i32>} : memref<1x1x128xf32, #tpu.memory_space<vmem>>, vector<1x1x128xf32>,
    return
  }
  func.func @transform_0(%arg0: i32) -> (i32, i32, i32) {
    %c0_i32 = arith.constant 0 : i32
    %c0_i32_0 = arith.constant 0 : i32
    %c0_i32_1 = arith.constant 0 : i32
    return %arg0, %c0_i32, %c0_i32_0 : i32, i32, i32
  }
  func.func @transform_1(%arg0: i32) -> (i32, i32, i32) {
    %c0_i32 = arith.constant 0 : i32
    %c0_i32_0 = arith.constant 0 : i32
    %c0_i32_1 = arith.constant 0 : i32
    return %arg0, %c0_i32, %c0_i32_0 : i32, i32, i32
  }
  func.func @transform_2(%arg0: i32) -> (i32, i32) {
    %c0_i32 = arith.constant 0 : i32
    %c0_i32_0 = arith.constant 0 : i32
    %c0_i32_1 = arith.constant 0 : i32
    return %c0_i32, %c0_i32_0 : i32, i32
  }
  func.func @transform_3(%arg0: i32) -> (i32, i32) {
    %c0_i32 = arith.constant 0 : i32
    %c0_i32_0 = arith.constant 0 : i32
    %c0_i32_1 = arith.constant 0 : i32
    return %c0_i32, %c0_i32_0 : i32, i32
  }
  func.func @transform_4(%arg0: i32) -> (i32, i32) {
    %c0_i32 = arith.constant 0 : i32
    %c0_i32_0 = arith.constant 0 : i32
    %c0_i32_1 = arith.constant 0 : i32
    return %c0_i32, %c0_i32_0 : i32, i32
  }
  func.func @transform_5(%arg0: i32) -> (i32, i32) {
    %c0_i32 = arith.constant 0 : i32
    %c0_i32_0 = arith.constant 0 : i32
    %c0_i32_1 = arith.constant 0 : i32
    return %c0_i32, %c0_i32_0 : i32, i32
  }
  func.func @transform_6(%arg0: i32) -> (i32, i32) {
    %c0_i32 = arith.constant 0 : i32
    %c0_i32_0 = arith.constant 0 : i32
    %c0_i32_1 = arith.constant 0 : i32
    return %c0_i32, %c0_i32_0 : i32, i32
  }
  func.func @transform_7(%arg0: i32) -> (i32, i32) {
    %c0_i32 = arith.constant 0 : i32
    %c0_i32_0 = arith.constant 0 : i32
    %c0_i32_1 = arith.constant 0 : i32
    return %c0_i32, %c0_i32_0 : i32, i32
  }
  func.func @transform_8(%arg0: i32) -> (i32, i32) {
    %c0_i32 = arith.constant 0 : i32
    %c0_i32_0 = arith.constant 0 : i32
    %c0_i32_1 = arith.constant 0 : i32
    return %c0_i32, %c0_i32_0 : i32, i32
  }
  func.func @transform_9(%arg0: i32) -> (i32, i32) {
    %c0_i32 = arith.constant 0 : i32
    %c0_i32_0 = arith.constant 0 : i32
    %c0_i32_1 = arith.constant 0 : i32
    return %c0_i32, %c0_i32_0 : i32, i32
  }
  func.func @transform_10(%arg0: i32) -> (i32, i32) {
    %c0_i32 = arith.constant 0 : i32
    %c0_i32_0 = arith.constant 0 : i32
    %c0_i32_1 = arith.constant 0 : i32
    return %c0_i32, %c0_i32_0 : i32, i32
  }
  func.func @transform_11(%arg0: i32) -> (i32, i32) {
    %c0_i32 = arith.constant 0 : i32
    %c0_i32_0 = arith.constant 0 : i32
    %c0_i32_1 = arith.constant 0 : i32
    return %c0_i32, %c0_i32_0 : i32, i32
  }
  func.func @transform_12(%arg0: i32) -> (i32, i32) {
    %c0_i32 = arith.constant 0 : i32
    %c0_i32_0 = arith.constant 0 : i32
    %c0_i32_1 = arith.constant 0 : i32
    return %c0_i32, %c0_i32_0 : i32, i32
  }
  func.func @transform_13(%arg0: i32) -> (i32, i32) {
    %c0_i32 = arith.constant 0 : i32
    %c0_i32_0 = arith.constant 0 : i32
    %c0_i32_1 = arith.constant 0 : i32
    return %c0_i32, %c0_i32_0 : i32, i32
  }
  func.func @transform_14(%arg0: i32) -> (i32, i32) {
    %c0_i32 = arith.constant 0 : i32
    %c0_i32_0 = arith.constant 0 : i32
    %c0_i32_1 = arith.constant 0 : i32
    return %c0_i32, %c0_i32_0 : i32, i32
  }
  func.func @transform_15(%arg0: i32) -> (i32, i32) {
    %c0_i32 = arith.constant 0 : i32
    %c0_i32_0 = arith.constant 0 : i32
    %c0_i32_1 = arith.constant 0 : i32
    return %c0_i32, %c0_i32_0 : i32, i32
  }
  func.func @transform_16(%arg0: i32) -> (i32, i32) {
    %c0_i32 = arith.constant 0 : i32
    %c0_i32_0 = arith.constant 0 : i32
    %c0_i32_1 = arith.constant 0 : i32
    return %c0_i32, %c0_i32_0 : i32, i32
  }
  func.func @transform_17(%arg0: i32) -> (i32, i32) {
    %c0_i32 = arith.constant 0 : i32
    %c0_i32_0 = arith.constant 0 : i32
    %c0_i32_1 = arith.constant 0 : i32
    return %c0_i32, %c0_i32_0 : i32, i32
  }
  func.func @transform_18(%arg0: i32) -> (i32, i32, i32) {
    %c0_i32 = arith.constant 0 : i32
    %c0_i32_0 = arith.constant 0 : i32
    %c0_i32_1 = arith.constant 0 : i32
    return %arg0, %c0_i32, %c0_i32_0 : i32, i32, i32
  }
}

</mosaic_0001>

<bundles_post_ra>
// kernel: nature_cnn_forward.1
= control target key start
LH: loop header
LB: loop body
LE: loop exit
PB: predicated region body
PF: predicated region fallthrough
CT: control target
= control target key end

     0   :  { %s9680_s0 = inlined_call_operand.vmem [shape: bf16[2,64,192], index: 0, kind: input, shape index: {}]   ;;  %s9681_s1 = inlined_call_operand.vmem [shape: bf16[2,1,128], index: 1, kind: input, shape index: {}]   ;;  %s9682_s2 = inlined_call_operand.vmem [shape: bf16[144,64], index: 2, kind: input, shape index: {}]   ;;  %s9683_s3 = inlined_call_operand.vmem [shape: bf16[192,32], index: 3, kind: input, shape index: {}]   ;;  %s9684_s4 = inlined_call_operand.vmem [shape: f32[1,32], index: 4, kind: input, shape index: {}]   ;;  %s9685_s5 = inlined_call_operand.vmem [shape: f32[512,64], index: 5, kind: input, shape index: {}]   ;;  %s9686_s6 = inlined_call_operand.vmem [shape: f32[1,64], index: 6, kind: input, shape index: {}]   ;;  %s9687_s7 = inlined_call_operand.vmem [shape: f32[576,64], index: 7, kind: input, shape index: {}]   ;;  %s9688_s8 = inlined_call_operand.vmem [shape: f32[1,64], index: 8, kind: input, shape index: {}]   ;;  %s9689_s9 = inlined_call_operand.vmem [shape: bf16[128,512], index: 9, kind: input, shape index: {}]   ;;  %s9690_s10 = inlined_call_operand.vmem [shape: f32[1,512], index: 10, kind: input, shape index: {}]   ;;  %s9691_s11 = inlined_call_operand.vmem [shape: bf16[512,512], index: 11, kind: input, shape index: {}]   ;;  %s9692_s12 = inlined_call_operand.vmem [shape: f32[1,512], index: 12, kind: input, shape index: {}]   ;;  %s9693_s13 = inlined_call_operand.vmem [shape: bf16[64,512], index: 13, kind: input, shape index: {}]   ;;  %s9694_s14 = inlined_call_operand.vmem [shape: bf16[512,512], index: 14, kind: input, shape index: {}]   ;;  %s9695_s15 = inlined_call_operand.vmem [shape: f32[1,512], index: 15, kind: input, shape index: {}]   ;;  %s9696_s16 = inlined_call_operand.vmem [shape: bf16[512,128], index: 16, kind: input, shape index: {}]   ;;  %s9697_s17 = inlined_call_operand.vmem [shape: f32[1,128], index: 17, kind: input, shape index: {}]   ;;  %s9698_s18 = inlined_call_operand.hbm [shape: f32[2,1,128], index: 18, kind: output, shape index: {}]  }
   0x1   :  { %9704 = sst [smem:[#allocation9_spill]] %s9680_s0 }
   0x2   :  { %9705 = sst [smem:[#allocation10_spill]] %s9681_s1 }
   0x3   :  { %9706 = sst [smem:[#allocation11_spill]] %s9682_s2 }
   0x4   :  { %9707 = sst [smem:[#allocation12_spill]] %s9683_s3 }
   0x5   :  { %9708 = sst [smem:[#allocation13_spill]] %s9684_s4 }
   0x6   :  { %9709 = sst [smem:[#allocation14_spill]] %s9685_s5 }
   0x7   :  { %9710 = sst [smem:[#allocation15_spill]] %s9686_s6 }
   0x8   :  { %23 = vsyncpa [#allocation3], 0 }
   0x9   :  { %25 = vsyncpa [#allocation3 + $0x1], 0  ;;  %s7802_s27 = smov 0   ;;  %s7804_s28 = smov 0  }
   0xa   :  { %s7806_s29 = smov 0   ;;  %s7808_s30 = smov 0  }
   0xb LB: > { %9711 = sst [smem:[#allocation5_spill]] %s7697_s29  ;;  %s7823_s0 = sadd.s32 4294967295, %s7701_s30   ;;  %s7701_s30 = sphi %s7808_s30, %s9725_s30   ;;  %s7697_s29 = sphi %s7806_s29, %s9727_s29   ;;  %s7693_s28 = sphi %s7804_s28, %s9729_s28   ;;  %s7689_s27 = sphi %s7802_s27, %s9728_s27  }
   0xc   : > { %s6020_s19 = sadd.s32 4294967294, %s7701_s30   ;;  %s7827_s1 = sadd.s32 1, %s7701_s30  }
   0xd   : > { %9712 = sst [smem:[#allocation6_spill]] %s7827_s1  ;;  %s426_s20 = sadd.s32 1, %s7697_s29 }
   0xe   : > { %s423_s21 = ssub.s32 %s7701_s30, %s7827_s1  ;;  %p436_p0 = scmp.ne.s32.totalorder %s7697_s29, %s7693_s28 }
   0xf   : > { %p424_p1 = scmp.eq.s32.totalorder %s423_s21, 0  ;;  %p437_p2 = scmp.eq.s32.totalorder %s7823_s0, 1 }
  0x10   : > { %p442_p3 = scmp.ne.s32.totalorder %s7693_s28, %s7689_s27  ;;  %p443_p4 = scmp.eq.s32.totalorder %s6020_s19, 1 }
  0x11   : > { %s7838_s22 = scalar_select %p424_p1, %s7697_s29, %s426_s20  }
  0x12   : > { %p7840_p5 = por %p437_p2, %p436_p0  ;;  %p7844_p6 = por %p443_p4, %p442_p3 }
  0x13   : > { %9713 = sst [smem:[#allocation7_spill]] %s7838_s22  ;;  %p6023_p7 = scmp.ge.s32.totalorder %s7701_s30, 1 }
  0x14   : > { %s9715_s23 = scalar_select %p7844_p6, 1, 0 }
  0x15   : > { %p523_p8 = scmp.lt.s32.totalorder %s7701_s30, 3 }
  0x16   : > { %9716 = sst [smem:[#allocation8_spill]] %s9715_s23 }
  0x17   : > { %p524_p9 = pnand %p6023_p7, %p523_p8 }
  0x18   : > { %s9717_s3 = sld [smem:[#allocation12_spill]] (!%p524_p9)  ;;  %p579_p10 = scmp.lt.s32.totalorder (!%p524_p9), %s7823_s0, 1 }
  0x19   : > { %527 = sbr.rel (%p524_p9) target bundleno = 1866 (0x74a), region = 92  ;;  %s9718_s1 = sld [smem:[#allocation9_spill]] (!%p524_p9) }
  0x1a   : > { %s9719_s5 = sld [smem:[#allocation14_spill]] (!%p524_p9)  ;;  %s577_s29 = sand.u32 (!%p524_p9), 1, %s7693_s28  }
  0x1b   : > { %s9720_s4 = sld [smem:[#allocation13_spill]] (!%p524_p9) }
  0x1c   : > { %s9721_s22 = sld [smem:[#allocation11_spill]] (!%p524_p9) }
  0x1d   : > { %s9722_s6 = sld [smem:[#allocation15_spill]] (!%p524_p9) }
  0x1e   : > { %v7120_v0 = vld [vmem:[%s9717_s3 + $0x38] sm:$0xff]   ;;  %v7703_v1 = vmov 0   ;;  %v7121_v2 = vld [vmem:[%s9717_s3 + $0x30] sm:$0xff]   ;;  %s7860_s20 = scalar_select %p579_p10, %s7823_s0, 1  ;;  %v7122_v3 = vld [vmem:[%s9717_s3 + $0x28] sm:$0xff]   ;;  %vm735_vm0 = vcmask 523264  }
  0x1f   : > { %748 = vmatprep.subr.bf16.mxu0 %v7703_v1  ;;  %v7123_v4 = vld [vmem:[%s9717_s3 + $0x20] sm:$0xff]   ;;  %v7124_v6 = vld [vmem:[%s9717_s3 + $0x18] sm:$0xff]   ;;  %v7125_v7 = vld [vmem:[%s9717_s3 + $0x10] sm:$0xff]   ;;  %v7704_v21 = vmov 0.0   ;;  %vm7705_vm1 = vmmov 0   ;;  %vm1086_vm2 = vcmask 1046528  }
  0x20   : > { %749 = vmatpush1.bf16.msra.mxu0 %v7120_v0  ;;  %s6452_s25 = sshll.u32 %s7860_s20, 6  ;;  %v7126_v8 = vld [vmem:[%s9717_s3 + $0x8] sm:$0xff]   ;;  %v7127_v9 = vld [vmem:[%s9717_s3] sm:$0xff]   ;;  %v7128_v10 = vld [vmem:[%s9717_s3 + $0x58] sm:$0xff]   ;;  %6687 = vmatprep.subr.bf16.mxu1 %v7704_v21  ;;  %vm1090_vm3 = vcmask 261120   ;;  %vm1251_vm4 = vcmask 1045504  }
  0x21   : > { %750 = vmatprep.subr.bf16.mxu0 %v7703_v1  ;;  %s7873_s23 = scalar_lea.vmem %s9718_s1, %s6452_s25  ;;  %v7129_v11 = vld [vmem:[%s9717_s3 + $0x50] sm:$0xff]   ;;  %v7130_v12 = vld [vmem:[%s9717_s3 + $0x48] sm:$0xff]   ;;  %v7131_v13 = vld [vmem:[%s9717_s3 + $0x40] sm:$0xff]   ;;  %6695 = vmatprep.mubr.msk.bf16.mxu1 %vm7705_vm1, %v7704_v21  ;;  %vm1337_vm5 = vcmask 1044480   ;;  %vm1423_vm6 = vcmask 1043456   ;;  %vm1509_vm7 = vcmask 1042432  }
  0x22   : > { %v7134_v5 = vld [vmem:[%s7873_s23 + $0x4] ss:$8 sps:$4 sm:$0xff]   ;;  %v7132_v14 = vld [vmem:[%s7873_s23] ss:$8 sps:$4 sm:$0xff]   ;;  %v7135_v15 = vld [vmem:[%s7873_s23 + $0x14] ss:$8 sps:$4 sm:$0xff]  }
  0x23   : > { %6047 = vmatprep.mubr.msk.bf16.mxu0 %vm735_vm0, %v7134_v5  ;;  %v7137_v16 = vld [vmem:[%s7873_s23 + $0x10] ss:$8 sps:$4 sm:$0xff]   ;;  %v7138_v17 = vld [vmem:[%s7873_s23 + $0x24] ss:$8 sps:$4 sm:$0xff]   ;;  %v7140_v18 = vld [vmem:[%s7873_s23 + $0x20] ss:$8 sps:$4 sm:$0xff]  }
  0x24   : > { %751 = vmatpush1.bf16.msra.mxu0 %v7121_v2  ;;  %v7141_v19 = vld [vmem:[%s7873_s23 + $0x34] ss:$8 sps:$4 sm:$0xff]   ;;  %v7143_v20 = vld [vmem:[%s7873_s23 + $0x30] ss:$8 sps:$4 sm:$0xff]   ;;  %v1025_v24 = vld [vmem:[%s9719_s5 + $0x28] sm:$0xff]  ;;  %vm1595_vm8 = vcmask 1041408  }
  0x25   : > { %752 = vmatprep.subr.bf16.mxu0 %v7703_v1  ;;  %v1027_v22 = vld [vmem:[%s9719_s5 + $0x38] sm:$0xff]  ;;  %v1026_v23 = vld [vmem:[%s9719_s5 + $0x30] sm:$0xff]  ;;  %v6026_v38 = vld [vmem:[%s9720_s4] ss:$0 sm:$0xff]  ;;  %vm1681_vm9 = vcmask 1040384   ;;  %s9723_s25 = sld [smem:[#allocation10_spill]] }
  0x26   : > { %v1031_v62 = vld [vmem:[%s9719_s5 + $0x58] sm:$0xff]  ;;  %v7144_v63 = vld [vmem:[%s9721_s22] sm:$0xff]   ;;  %v1030_v0 = vld [vmem:[%s9719_s5 + $0x50] sm:$0xff] }
  0x27   : > { %v1029_v2 = vld [vmem:[%s9719_s5 + $0x48] sm:$0xff]  ;;  %v7147_v5 = vld [vmem:[%s9721_s22 + $0x18] sm:$0xff]  }
  0x28   : > { %753 = vmatpush1.bf16.msra.mxu0 %v7122_v3  ;;  %v7145_v3 = vld [vmem:[%s9721_s22 + $0x8] sm:$0xff]  }
  0x29   : > { %754 = vmatprep.subr.bf16.mxu0 %v7703_v1 }
  0x2b   : > { %s586_s26 = scalar_lea.vmem %s9723_s25, %s7860_s20  ;;  %s6449_s25 = sshll.u32 %s7823_s0, 4 }
  0x2c   : > { %755 = vmatpush1.bf16.msra.mxu0 %v7123_v4  ;;  %v7146_v4 = vld [vmem:[%s9721_s22 + $0x10] sm:$0xff]   ;;  %s9645_s21 = scalar_lea.hbm %s9698_s18, %s6449_s25  ;;  %s5944_s20 = scalar_lea.sflag [#allocation3], %s577_s29 }
  0x2d   : > { %756 = vmatprep.subr.bf16.mxu0 %v7703_v1  ;;  %s7706_s0 = smov [#allocation2]  }
  0x30   : > { %757 = vmatpush1.bf16.msra.mxu0 %v7124_v6  ;;  %v7148_v6 = vld [vmem:[%s9721_s22 + $0x20] sm:$0xff]  }
  0x31   : > { %758 = vmatprep.subr.bf16.mxu0 %v7703_v1 }
  0x34   : > { %759 = vmatpush1.bf16.msra.mxu0 %v7125_v7  ;;  %v7149_v7 = vld [vmem:[%s9721_s22 + $0x28] sm:$0xff]  }
  0x35   : > { %760 = vmatprep.subr.bf16.mxu0 %v7703_v1 }
  0x38   : > { %761 = vmatpush1.bf16.msra.mxu0 %v7126_v8  ;;  %v7150_v8 = vld [vmem:[%s9721_s22 + $0x30] sm:$0xff]  }
  0x39   : > { %762 = vmatprep.subr.bf16.mxu0 %v7703_v1 }
  0x3c   : > { %763 = vmatpush1.bf16.msra.mxu0 %v7127_v9  ;;  %v7151_v9 = vld [vmem:[%s9721_s22 + $0x38] sm:$0xff]  }
  0x3d   : > { %772 = vmatprep.subr.bf16.mxu0 %v7703_v1 }
  0x40   : > { %773 = vmatpush2.bf16.msra.mxu0 %v7128_v10  ;;  %v7152_v10 = vld [vmem:[%s9721_s22 + $0x40] sm:$0xff]  }
  0x41   : > { %774 = vmatprep.subr.bf16.mxu0 %v7703_v1 }
  0x44   : > { %775 = vmatpush2.bf16.msra.mxu0 %v7129_v11  ;;  %v1024_v11 = vld [vmem:[%s9719_s5 + $0x20] sm:$0xff] }
  0x45   : > { %776 = vmatprep.subr.bf16.mxu0 %v7703_v1 }
  0x48   : > { %777 = vmatpush2.bf16.msra.mxu0 %v7130_v12  ;;  %v1028_v12 = vld [vmem:[%s9719_s5 + $0x40] sm:$0xff] }
  0x49   : > { %778 = vmatprep.subr.bf16.mxu0 %v7703_v1 }
  0x4c   : > { %779 = vmatpush2.bf16.msra.mxu0 %v7131_v13  ;;  %v1023_v13 = vld [vmem:[%s9719_s5 + $0x18] sm:$0xff] }
  0x4d   : > { %6731 = vmatprep.subr.mxu0 %v1027_v22 }
  0x4f   : > { %781 = vmatmul.mubr.bf16.vlgmr.msra.gmra.mxu0 %v7132_v14  ;;  %v1039_v14 = vld [vmem:[%s9719_s5 + $0x98] sm:$0xff] }
  0x50   : > { %6048 = vmatprep.mubr.msk.bf16.mxu0 %vm735_vm0, %v7135_v15  ;;  %6732 = vmatpush3.msra.mxu0 %v1027_v22 }
  0x51   : > { %6733 = vmatprep.subr.mxu0 %v1026_v23 }
  0x52   : > { %6734 = vmatpush3.msra.mxu0 %v1026_v23 }
  0x53   : > { %6735 = vmatprep.subr.mxu0 %v1025_v24 }
  0x54   : > { %6736 = vmatpush3.msra.mxu0 %v1025_v24 }
  0x55   : > { %6737 = vmatprep.subr.mxu0 %v1024_v11 }
  0x56   : > { %6738 = vmatpush3.msra.mxu0 %v1024_v11  ;;  %v1051_v11 = vld [vmem:[%s9719_s5 + $0xf8] sm:$0xff] }
  0x57   : > { %789 = vmatmul.mubr.bf16.gmra.mxu0 %v7137_v16  ;;  %6742 = vmatprep.subr.mxu0 %v1023_v13 }
  0x58   : > { %6049 = vmatprep.mubr.msk.bf16.mxu0 %vm735_vm0, %v7138_v17 }
  0x5f   : > { %797 = vmatmul.mubr.bf16.gmra.mxu0 %v7140_v18 }
  0x60   : > { %6050 = vmatprep.mubr.msk.bf16.mxu0 %vm735_vm0, %v7141_v19 }
  0x67   : > { %805 = vmatmul.mubr.bf16.gmra.mxu0 %v7143_v20 }
 0x10f   : > { %v782_v25 = vpop.f32.mrf.mxu0 }
 0x110   : > { %v783_v56 = vadd.f32 %v6026_v38, %v782_v25 }
 0x111   : > { %v784_v26 = vpop.f32.mrf.mxu0 }
 0x112   : > { %v813_v60 = vmax.f32 %v783_v56, 0.0  ;;  %v1022_v26 = vld [vmem:[%s9719_s5 + $0x10] sm:$0xff] }
 0x113   : > { %v785_v27 = vpop.f32.mrf.mxu0 }
 0x114   : > { %v786_v53 = vadd.f32 %v6026_v38, %v785_v27 }
 0x115   : > { %v787_v28 = vpop.f32.mrf.mxu0 }
 0x116   : > { %v814_v58 = vmax.f32 %v786_v53, 0.0 }
 0x117   : > { %v790_v29 = vpop.f32.mrf.mxu0 }
 0x118   : > { %v791_v51 = vadd.f32 %v6026_v38, %v790_v29  ;;  %v821_v61 = vpack.c.bf16 %v814_v58, %v813_v60 }
 0x119   : > { %v792_v30 = vpop.f32.mrf.mxu0 }
 0x11a   : > { %v815_v57 = vmax.f32 %v791_v51, 0.0  ;;  %v1021_v30 = vld [vmem:[%s9719_s5 + $0x8] sm:$0xff]  ;;  %v1047_v51 = vld [vmem:[%s9719_s5 + $0xd8] sm:$0xff] }
 0x11b   : > { %v793_v31 = vpop.f32.mrf.mxu0 }
 0x11c   : > { %v794_v48 = vadd.f32 %v6026_v38, %v793_v31 }
 0x11d   : > { %v795_v32 = vpop.f32.mrf.mxu0 }
 0x11e   : > { %v816_v54 = vmax.f32 %v794_v48, 0.0 }
 0x11f   : > { %v798_v33 = vpop.f32.mrf.mxu0 }
 0x120   : > { %v799_v45 = vadd.f32 %v6026_v38, %v798_v33  ;;  %v822_v59 = vpack.c.bf16 %v816_v54, %v815_v57  ;;  %v1020_v33 = vld [vmem:[%s9719_s5] sm:$0xff]  ;;  %v1043_v57 = vld [vmem:[%s9719_s5 + $0xb8] sm:$0xff] }
 0x121   : > { %v800_v34 = vpop.f32.mrf.mxu0 }
 0x122   : > { %v817_v52 = vmax.f32 %v799_v45, 0.0  ;;  %v1038_v34 = vld [vmem:[%s9719_s5 + $0x90] sm:$0xff] }
 0x123   : > { %v801_v35 = vpop.f32.mrf.mxu0 }
 0x124   : > { %v802_v42 = vadd.f32 %v6026_v38, %v801_v35 }
 0x125   : > { %v803_v36 = vpop.f32.mrf.mxu0 }
 0x126   : > { %v818_v49 = vmax.f32 %v802_v42, 0.0  ;;  %v1037_v42 = vld [vmem:[%s9719_s5 + $0x88] sm:$0xff] }
 0x127   : > { %v806_v37 = vpop.f32.mrf.mxu0 }
 0x128   : > { %v807_v40 = vadd.f32 %v6026_v38, %v806_v37  ;;  %v823_v55 = vpack.c.bf16 %v818_v49, %v817_v52  ;;  %v1032_v52 = vld [vmem:[%s9719_s5 + $0x60] sm:$0xff] }
 0x129   : > { %v808_v39 = vpop.f32.mrf.mxu0 }
 0x12a   : > { %v819_v46 = vmax.f32 %v807_v40, 0.0 }
 0x12b   : > { %v809_v41 = vpop.f32.mrf.mxu0 }
 0x12c   : > { %v810_v43 = vadd.f32 %v6026_v38, %v809_v41  ;;  %v1035_v38 = vld [vmem:[%s9719_s5 + $0x78] sm:$0xff] }
 0x12d   : > { %v811_v44 = vpop.f32.mrf.mxu0 }
 0x12e   : > { %v820_v47 = vmax.f32 %v810_v43, 0.0  ;;  %v1034_v43 = vld [vmem:[%s9719_s5 + $0x70] sm:$0xff] }
 0x130   : > { %v824_v50 = vpack.c.bf16 %v820_v47, %v819_v46  ;;  %v1036_v46 = vld [vmem:[%s9719_s5 + $0x80] sm:$0xff]  ;;  %v1033_v47 = vld [vmem:[%s9719_s5 + $0x68] sm:$0xff] }
 0x132   : > { %6688 = vmatpush3.bf16.msra.mxu1 %v824_v50 }
 0x133   : > { %6689 = vmatprep.subr.bf16.mxu1 %v7704_v21 }
 0x136   : > { %6690 = vmatpush3.bf16.msra.mxu1 %v823_v55  ;;  %v1046_v55 = vld [vmem:[%s9719_s5 + $0xd0] sm:$0xff] }
 0x137   : > { %6691 = vmatprep.subr.bf16.mxu1 %v7704_v21 }
 0x13a   : > { %6692 = vmatpush3.bf16.msra.mxu1 %v822_v59 }
 0x13b   : > { %6693 = vmatprep.subr.bf16.mxu1 %v7704_v21 }
 0x13e   : > { %6694 = vmatpush3.bf16.msra.mxu1 %v821_v61  ;;  %v1045_v61 = vld [vmem:[%s9719_s5 + $0xc8] sm:$0xff] }
 0x13f   : > { %6753 = vmatprep.subr.mxu1 %v1031_v62 }
 0x141   : > { %6696 = vmatmul.mubr.msk.bf16.vlgmr.msra.gmra.mxu1 %vm735_vm0, %v7144_v63  ;;  %v1042_v63 = vld [vmem:[%s9719_s5 + $0xb0] sm:$0xff] }
 0x142   : > { %6699 = vmatprep.mubr.msk.bf16.mxu1 %vm7705_vm1, %v7704_v21  ;;  %6754 = vmatpush3.msra.mxu1 %v1031_v62 }
 0x143   : > { %6755 = vmatprep.subr.mxu1 %v1030_v0 }
 0x144   : > { %6756 = vmatpush3.msra.mxu1 %v1030_v0  ;;  %v1044_v0 = vld [vmem:[%s9719_s5 + $0xc0] sm:$0xff] }
 0x145   : > { %6757 = vmatprep.subr.mxu1 %v1029_v2 }
 0x146   : > { %6758 = vmatpush3.msra.mxu1 %v1029_v2 }
 0x147   : > { %6759 = vmatprep.subr.mxu1 %v1028_v12 }
 0x148   : > { %6760 = vmatpush3.msra.mxu1 %v1028_v12  ;;  %v1054_v12 = vld [vmem:[%s9719_s5 + $0x110] sm:$0xff] }
 0x149   : > { %6700 = vmatmul.mubr.msk.bf16.gmra.mxu1 %vm735_vm0, %v7145_v3  ;;  %6775 = vmatprep.subr.mxu1 %v1039_v14  ;;  %v1041_v3 = vld [vmem:[%s9719_s5 + $0xa8] sm:$0xff] }
 0x14a   : > { %6703 = vmatprep.mubr.msk.bf16.mxu1 %vm7705_vm1, %v7704_v21 }
 0x151   : > { %6704 = vmatmul.mubr.msk.bf16.gmra.mxu1 %vm735_vm0, %v7146_v4 }
 0x152   : > { %6707 = vmatprep.mubr.msk.bf16.mxu1 %vm7705_vm1, %v7704_v21 }
 0x159   : > { %6708 = vmatmul.mubr.msk.bf16.gmra.mxu1 %vm735_vm0, %v7147_v5 }
 0x15a   : > { %6711 = vmatprep.mubr.msk.bf16.mxu1 %vm7705_vm1, %v7704_v21 }
 0x161   : > { %6712 = vmatmul.mubr.msk.bf16.gmra.mxu1 %vm735_vm0, %v7148_v6 }
 0x162   : > { %6715 = vmatprep.mubr.msk.bf16.mxu1 %vm7705_vm1, %v7704_v21 }
 0x169   : > { %6716 = vmatmul.mubr.msk.bf16.gmra.mxu1 %vm735_vm0, %v7149_v7  ;;  %v1040_v7 = vld [vmem:[%s9719_s5 + $0xa0] sm:$0xff] }
 0x16a   : > { %6719 = vmatprep.mubr.msk.bf16.mxu1 %vm7705_vm1, %v7704_v21 }
 0x171   : > { %6720 = vmatmul.mubr.msk.bf16.gmra.mxu1 %vm735_vm0, %v7150_v8  ;;  %v1055_v8 = vld [vmem:[%s9719_s5 + $0x118] sm:$0xff] }
 0x172   : > { %6723 = vmatprep.mubr.msk.bf16.mxu1 %vm7705_vm1, %v7704_v21 }
 0x179   : > { %6724 = vmatmul.mubr.msk.bf16.gmra.mxu1 %vm735_vm0, %v7151_v9 }
 0x17a   : > { %6727 = vmatprep.mubr.msk.bf16.mxu1 %vm7705_vm1, %v7704_v21 }
 0x181   : > { %6728 = vmatmul.mubr.msk.bf16.gmra.mxu1 %vm735_vm0, %v7152_v10 }
 0x201   : > { %v949_v15 = vpop.f32.mrf.mxu1 }
 0x203   : > { %v6697_v16 = vpop.f32.mrf.mxu1 }
 0x205   : > { %v952_v17 = vpop.f32.mrf.mxu1 }
 0x206   : > { %v1087_v20 = vrot.slane %v952_v17, 1 }
 0x207   : > { %v6698_v18 = vpop.f32.mrf.mxu1 }
 0x208   : > { %v1049_v18 = vld [vmem:[%s9719_s5 + $0xe8] sm:$0xff] }
 0x209   : > { %v957_v19 = vpop.f32.mrf.mxu1 }
 0x20a   : > { %v1088_v22 = vrot.slane %v957_v19, 1  ;;  %v1252_v27 = vrot.slane %v957_v19, 2 }
 0x20b   : > { %v6701_v23 = vpop.f32.mrf.mxu1 }
 0x20c   : > { %v1089_v24 = vsel %vm1086_vm2, %v1087_v20, %v1088_v22  ;;  %v1052_v20 = vld [vmem:[%s9719_s5 + $0x100] sm:$0xff] }
 0x20d   : > { %v960_v25 = vpop.f32.mrf.mxu1  ;;  %6739 = vmatprep.mubr.msk.f32.mxu0 %vm1090_vm3, %v1089_v24 }
 0x20e   : > { %v1253_v28 = vrot.slane %v960_v25, 2  ;;  %6740 = vmatmul.mubr.msk.f32.vlgmr.msra.gmra.mxu0 %vm1090_vm3, %v1088_v22  ;;  %v1338_v35 = vrot.slane %v960_v25, 3  ;;  %v1048_v22 = vld [vmem:[%s9719_s5 + $0xe0] sm:$0xff] }
 0x20f   : > { %6743 = vmatpush3.msra.mxu0 %v1023_v13  ;;  %v6702_v29 = vpop.f32.mrf.mxu1  ;;  %6750 = vmatprep.mubr.msk.f32.mxu0 %vm1090_vm3, %v949_v15  ;;  %v1050_v15 = vld [vmem:[%s9719_s5 + $0xf0] sm:$0xff] }
 0x210   : > { %6744 = vmatprep.subr.mxu0 %v1022_v26  ;;  %v1254_v31 = vsel %vm1251_vm4, %v1252_v27, %v1253_v28  ;;  %v1058_v29 = vld [vmem:[%s9719_s5 + $0x130] sm:$0xff] }
 0x211   : > { %6745 = vmatpush3.msra.mxu0 %v1022_v26  ;;  %v965_v32 = vpop.f32.mrf.mxu1  ;;  %6761 = vmatprep.mubr.msk.f32.mxu1 %vm1090_vm3, %v1254_v31  ;;  %v1059_v26 = vld [vmem:[%s9719_s5 + $0x138] sm:$0xff]  ;;  %v1062_v31 = vld [vmem:[%s9719_s5 + $0x150] sm:$0xff] }
 0x212   : > { %v1339_v36 = vrot.slane %v965_v32, 3  ;;  %6746 = vmatprep.subr.mxu0 %v1021_v30  ;;  %6762 = vmatmul.mubr.msk.f32.vlgmr.msra.gmra.mxu1 %vm1090_vm3, %v1253_v28  ;;  %v1424_v39 = vrot.slane %v965_v32, 4  ;;  %v1063_v28 = vld [vmem:[%s9719_s5 + $0x158] sm:$0xff]  ;;  %v1057_v32 = vld [vmem:[%s9719_s5 + $0x128] sm:$0xff] }
 0x213   : > { %6747 = vmatpush3.msra.mxu0 %v1021_v30  ;;  %v6705_v37 = vpop.f32.mrf.mxu1  ;;  %6776 = vmatpush3.msra.mxu1 %v1039_v14 }
 0x214   : > { %6748 = vmatprep.subr.mxu0 %v1020_v33  ;;  %6777 = vmatprep.subr.mxu1 %v1038_v34  ;;  %v1340_v40 = vsel %vm1337_vm5, %v1338_v35, %v1339_v36  ;;  %v1056_v37 = vld [vmem:[%s9719_s5 + $0x120] sm:$0xff] }
 0x215   : > { %6749 = vmatpush3.msra.mxu0 %v1020_v33  ;;  %v968_v41 = vpop.f32.mrf.mxu1  ;;  %6778 = vmatpush3.msra.mxu1 %v1038_v34 }
 0x216   : > { %v1425_v44 = vrot.slane %v968_v41, 4  ;;  %6751 = vmatmul.mubr.msk.f32.vlgmr.msra.gmra.mxu0 %vm1090_vm3, %v952_v17  ;;  %6764 = vmatprep.subr.mxu0 %v1035_v38  ;;  %v1510_v54 = vrot.slane %v968_v41, 5  ;;  %v1053_v17 = vld [vmem:[%s9719_s5 + $0x108] sm:$0xff] }
 0x217   : > { %6765 = vmatpush3.msra.mxu0 %v1035_v38  ;;  %6772 = vmatprep.mubr.msk.f32.mxu0 %vm1090_vm3, %v1340_v40  ;;  %v6706_v45 = vpop.f32.mrf.mxu1  ;;  %v1060_v40 = vld [vmem:[%s9719_s5 + $0x140] sm:$0xff] }
 0x218   : > { %6779 = vmatprep.subr.mxu1 %v1037_v42  ;;  %6766 = vmatprep.subr.mxu0 %v1034_v43  ;;  %v1426_v48 = vsel %vm1423_vm6, %v1424_v39, %v1425_v44  ;;  %v1067_v45 = vld [vmem:[%s9719_s5 + $0x178] sm:$0xff] }
 0x219   : > { %6780 = vmatpush3.msra.mxu1 %v1037_v42  ;;  %6767 = vmatpush3.msra.mxu0 %v1034_v43  ;;  %v8049_v49 = vpop.f32.mrf.mxu1 }
 0x21a   : > { %6781 = vmatprep.subr.mxu1 %v1036_v46  ;;  %v1511_v50 = vrot.slane %v8049_v49, 5  ;;  %6768 = vmatprep.subr.mxu0 %v1033_v47  ;;  %v1596_v58 = vrot.slane %v8049_v49, 6 }
 0x21b   : > { %6782 = vmatpush3.msra.mxu1 %v1036_v46  ;;  %6783 = vmatprep.mubr.msk.f32.mxu1 %vm1090_vm3, %v1426_v48  ;;  %v6709_v53 = vpop.f32.mrf.mxu1  ;;  %v1066_v48 = vld [vmem:[%s9719_s5 + $0x170] sm:$0xff] }
 0x21c   : > { %6769 = vmatpush3.msra.mxu0 %v1033_v47  ;;  %6784 = vmatmul.mubr.msk.f32.vlgmr.msra.gmra.mxu1 %vm1090_vm3, %v1425_v44  ;;  %v1512_v60 = vsel %vm1509_vm7, %v1510_v54, %v1511_v50  ;;  %v1071_v47 = vld [vmem:[%s9719_s5 + $0x198] sm:$0xff] }
 0x21d   : > { %6797 = vmatprep.subr.mxu1 %v1047_v51  ;;  %6770 = vmatprep.subr.mxu0 %v1032_v52  ;;  %v976_v56 = vpop.f32.mrf.mxu1 }
 0x21e   : > { %6798 = vmatpush3.msra.mxu1 %v1047_v51  ;;  %6771 = vmatpush3.msra.mxu0 %v1032_v52  ;;  %v1597_v59 = vrot.slane %v976_v56, 6  ;;  %v1682_v10 = vrot.slane %v976_v56, 7  ;;  %v1065_v51 = vld [vmem:[%s9719_s5 + $0x168] sm:$0xff]  ;;  %v1064_v56 = vld [vmem:[%s9719_s5 + $0x160] sm:$0xff] }
 0x21f   : > { %6799 = vmatprep.subr.mxu1 %v1046_v55  ;;  %6773 = vmatmul.mubr.msk.f32.vlgmr.msra.gmra.mxu0 %vm1090_vm3, %v1339_v36  ;;  %v6710_v62 = vpop.f32.mrf.mxu1  ;;  %v1061_v36 = vld [vmem:[%s9719_s5 + $0x148] sm:$0xff] }
 0x220   : > { %6786 = vmatprep.subr.mxu0 %v1043_v57  ;;  %6800 = vmatpush3.msra.mxu1 %v1046_v55  ;;  %v1598_v4 = vsel %vm1595_vm8, %v1596_v58, %v1597_v59  ;;  %v1069_v55 = vld [vmem:[%s9719_s5 + $0x188] sm:$0xff] }
 0x221   : > { %6787 = vmatpush3.msra.mxu0 %v1043_v57  ;;  %6794 = vmatprep.mubr.msk.f32.mxu0 %vm1090_vm3, %v1512_v60  ;;  %v981_v2 = vpop.f32.mrf.mxu1 }
 0x222   : > { %6801 = vmatprep.subr.mxu1 %v1045_v61  ;;  %6788 = vmatprep.subr.mxu0 %v1042_v63  ;;  %v1683_v6 = vrot.slane %v981_v2, 7 }
 0x223   : > { %6802 = vmatpush3.msra.mxu1 %v1045_v61  ;;  %6789 = vmatpush3.msra.mxu0 %v1042_v63  ;;  %v6713_v5 = vpop.f32.mrf.mxu1 }
 0x224   : > { %6803 = vmatprep.subr.mxu1 %v1044_v0  ;;  %6790 = vmatprep.subr.mxu0 %v1041_v3  ;;  %v1684_v14 = vsel %vm1681_vm9, %v1682_v10, %v1683_v6 }
 0x225   : > { %6804 = vmatpush3.msra.mxu1 %v1044_v0  ;;  %6805 = vmatprep.mubr.msk.f32.mxu1 %vm1090_vm3, %v1598_v4  ;;  %v984_v9 = vpop.f32.mrf.mxu1  ;;  %v1075_v0 = vld [vmem:[%s9719_s5 + $0x1b8] sm:$0xff]  ;;  %v1074_v4 = vld [vmem:[%s9719_s5 + $0x1b0] sm:$0xff] }
 0x226   : > { %6791 = vmatpush3.msra.mxu0 %v1041_v3  ;;  %6806 = vmatmul.mubr.msk.f32.vlgmr.msra.gmra.mxu1 %vm1090_vm3, %v1597_v59  ;;  %v1068_v59 = vld [vmem:[%s9719_s5 + $0x180] sm:$0xff]  ;;  %v1079_v3 = vld [vmem:[%s9719_s5 + $0x1d8] sm:$0xff] }
 0x227   : > { %6792 = vmatprep.subr.mxu0 %v1040_v7  ;;  %6819 = vmatprep.subr.mxu1 %v1055_v8  ;;  %v6714_v13 = vpop.f32.mrf.mxu1 }
 0x228   : > { %6793 = vmatpush3.msra.mxu0 %v1040_v7  ;;  %6820 = vmatpush3.msra.mxu1 %v1055_v8  ;;  %v1073_v7 = vld [vmem:[%s9719_s5 + $0x1a8] sm:$0xff] }
 0x229   : > { %6795 = vmatmul.mubr.msk.f32.vlgmr.msra.gmra.mxu0 %vm1090_vm3, %v1511_v50  ;;  %6808 = vmatprep.subr.mxu0 %v1051_v11  ;;  %v989_v16 = vpop.f32.mrf.mxu1  ;;  %v1070_v50 = vld [vmem:[%s9719_s5 + $0x190] sm:$0xff] }
 0x22a   : > { %6821 = vmatprep.subr.mxu1 %v1054_v12  ;;  %6809 = vmatpush3.msra.mxu0 %v1051_v11  ;;  %v1850_v24 = vrot.slane %v989_v16, 1  ;;  %v1077_v11 = vld [vmem:[%s9719_s5 + $0x1c8] sm:$0xff] }
 0x22b   : > { %6816 = vmatprep.mubr.msk.f32.mxu0 %vm1090_vm3, %v1684_v14  ;;  %6822 = vmatpush3.msra.mxu1 %v1054_v12  ;;  %v6717_v19 = vpop.f32.mrf.mxu1  ;;  %v1072_v12 = vld [vmem:[%s9719_s5 + $0x1a0] sm:$0xff] }
 0x22c   : > { %6827 = vmatprep.mubr.msk.f32.mxu1 %vm1090_vm3, %v984_v9  ;;  %6810 = vmatprep.subr.mxu0 %v1050_v15 }
 0x22d   : > { %6823 = vmatprep.subr.mxu1 %v1053_v17  ;;  %6811 = vmatpush3.msra.mxu0 %v1050_v15  ;;  %v992_v23 = vpop.f32.mrf.mxu1 }
 0x22e   : > { %6824 = vmatpush3.msra.mxu1 %v1053_v17  ;;  %6812 = vmatprep.subr.mxu0 %v1049_v18  ;;  %v1851_v25 = vrot.slane %v992_v23, 1  ;;  %v1935_v39 = vrot.slane %v992_v23, 2  ;;  %v1080_v23 = vld [vmem:[%s9719_s5 + $0x1e0] sm:$0xff] }
 0x22f   : > { %6825 = vmatprep.subr.mxu1 %v1052_v20  ;;  %6813 = vmatpush3.msra.mxu0 %v1049_v18  ;;  %v6718_v27 = vpop.f32.mrf.mxu1  ;;  %v1083_v18 = vld [vmem:[%s9719_s5 + $0x1f8] sm:$0xff] }
 0x230   : > { %6826 = vmatpush3.msra.mxu1 %v1052_v20  ;;  %6814 = vmatprep.subr.mxu0 %v1048_v22  ;;  %v1852_v33 = vsel %vm1086_vm2, %v1850_v24, %v1851_v25  ;;  %v1082_v20 = vld [vmem:[%s9719_s5 + $0x1f0] sm:$0xff]  ;;  %v2462_v24 = vld [vmem:[%s9687_s7 + $0x38] sm:$0xff] }
 0x231   : > { %6828 = vmatmul.mubr.msk.f32.vlgmr.msra.gmra.mxu1 %vm1090_vm3, %v989_v16  ;;  %6815 = vmatpush3.msra.mxu0 %v1048_v22  ;;  %v997_v30 = vpop.f32.mrf.mxu1  ;;  %v1076_v16 = vld [vmem:[%s9719_s5 + $0x1c0] sm:$0xff]  ;;  %v1081_v22 = vld [vmem:[%s9719_s5 + $0x1e8] sm:$0xff]  ;;  %v2469_v27 = vld [vmem:[%s9687_s7 + $0x70] sm:$0xff] }
 0x232   : > { %6817 = vmatmul.mubr.msk.f32.vlgmr.msra.gmra.mxu0 %vm1090_vm3, %v1683_v6  ;;  %6830 = vmatprep.subr.mxu0 %v1059_v26  ;;  %v1936_v35 = vrot.slane %v997_v30, 2  ;;  %v2020_v43 = vrot.slane %v997_v30, 3  ;;  %v1078_v6 = vld [vmem:[%s9719_s5 + $0x1d0] sm:$0xff]  ;;  %v2459_v30 = vld [vmem:[%s9687_s7 + $0x20] sm:$0xff]  ;;  %s7645_s5 = sshll.u32 %s7706_s0, 4  ;;  %s7646_s5 = int_to_ptr.vmem [resolvable:$false] %s7645_s5 }
 0x233   : > { %6831 = vmatpush3.msra.mxu0 %v1059_v26  ;;  %6841 = vmatprep.subr.mxu1 %v1063_v28  ;;  %v6721_v34 = vpop.f32.mrf.mxu1  ;;  %v2461_v26 = vld [vmem:[%s9687_s7 + $0x30] sm:$0xff] }
 0x234   : > { %6832 = vmatprep.subr.mxu0 %v1058_v29  ;;  %6842 = vmatpush3.msra.mxu1 %v1063_v28  ;;  %v1937_v42 = vsel %vm1251_vm4, %v1935_v39, %v1936_v35  ;;  %v2460_v28 = vld [vmem:[%s9687_s7 + $0x28] sm:$0xff]  ;;  %v2457_v34 = vld [vmem:[%s9687_s7 + $0x10] sm:$0xff]  ;;  %v2463_v39 = vld [vmem:[%s9687_s7 + $0x40] sm:$0xff] }
 0x235   : > { %6833 = vmatpush3.msra.mxu0 %v1058_v29  ;;  %6843 = vmatprep.subr.mxu1 %v1062_v31  ;;  %v1000_v38 = vpop.f32.mrf.mxu1  ;;  %v2468_v29 = vld [vmem:[%s9687_s7 + $0x68] sm:$0xff] }
 0x236   : > { %6834 = vmatprep.subr.mxu0 %v1057_v32  ;;  %6838 = vmatprep.mubr.msk.f32.mxu0 %vm1090_vm3, %v1852_v33  ;;  %v2021_v44 = vrot.slane %v1000_v38, 3  ;;  %v2105_v58 = vrot.slane %v1000_v38, 4  ;;  %v2466_v33 = vld [vmem:[%s9687_s7 + $0x58] sm:$0xff]  ;;  %v2455_v38 = vld [vmem:[%s9687_s7] sm:$0xff] }
 0x237   : > { %6844 = vmatpush3.msra.mxu1 %v1062_v31  ;;  %6835 = vmatpush3.msra.mxu0 %v1057_v32  ;;  %v6722_v41 = vpop.f32.mrf.mxu1  ;;  %v2467_v31 = vld [vmem:[%s9687_s7 + $0x60] sm:$0xff]  ;;  %v2458_v32 = vld [vmem:[%s9687_s7 + $0x18] sm:$0xff] }
 0x238   : > { %6845 = vmatprep.subr.mxu1 %v1061_v36  ;;  %6836 = vmatprep.subr.mxu0 %v1056_v37  ;;  %v2022_v52 = vsel %vm1337_vm5, %v2020_v43, %v2021_v44 }
 0x239   : > { %6846 = vmatpush3.msra.mxu1 %v1061_v36  ;;  %6837 = vmatpush3.msra.mxu0 %v1056_v37  ;;  %v1005_v46 = vpop.f32.mrf.mxu1  ;;  %v2456_v36 = vld [vmem:[%s9687_s7 + $0x8] sm:$0xff] }
 0x23a   : > { %6847 = vmatprep.subr.mxu1 %v1060_v40  ;;  %6839 = vmatmul.mubr.msk.f32.vlgmr.msra.gmra.mxu0 %vm1090_vm3, %v1851_v25  ;;  %v2106_v54 = vrot.slane %v1005_v46, 4  ;;  %v2190_v62 = vrot.slane %v1005_v46, 5  ;;  %v2470_v25 = vld [vmem:[%s9687_s7 + $0x78] sm:$0xff]  ;;  %v2464_v37 = vld [vmem:[%s9687_s7 + $0x48] sm:$0xff] }
 0x23b   : > { %6848 = vmatpush3.msra.mxu1 %v1060_v40  ;;  %6849 = vmatprep.mubr.msk.f32.mxu1 %vm1090_vm3, %v1937_v42  ;;  %v6725_v49 = vpop.f32.mrf.mxu1 }
 0x23c   : > { %6852 = vmatprep.subr.mxu0 %v1067_v45  ;;  %6850 = vmatmul.mubr.msk.f32.vlgmr.msra.gmra.mxu1 %vm1090_vm3, %v1936_v35  ;;  %v2107_v61 = vsel %vm1423_vm6, %v2105_v58, %v2106_v54  ;;  %v2465_v35 = vld [vmem:[%s9687_s7 + $0x50] sm:$0xff] }
 0x23d   : > { %6853 = vmatpush3.msra.mxu0 %v1067_v45  ;;  %6863 = vmatprep.subr.mxu1 %v1071_v47  ;;  %v8164_v53 = vpop.f32.mrf.mxu1 }
 0x23e   : > { %6854 = vmatprep.subr.mxu0 %v1066_v48  ;;  %6864 = vmatpush3.msra.mxu1 %v1071_v47  ;;  %v2191_v63 = vrot.slane %v8164_v53, 5  ;;  %v2275_v13 = vrot.slane %v8164_v53, 6 }
 0x23f   : > { %6855 = vmatpush3.msra.mxu0 %v1066_v48  ;;  %6865 = vmatprep.subr.mxu1 %v1070_v50  ;;  %v6726_v57 = vpop.f32.mrf.mxu1 }
 0x240   : > { %6856 = vmatprep.subr.mxu0 %v1065_v51  ;;  %6860 = vmatprep.mubr.msk.f32.mxu0 %vm1090_vm3, %v2022_v52  ;;  %v2192_v8 = vsel %vm1509_vm7, %v2190_v62, %v2191_v63 }
 0x241   : > { %6866 = vmatpush3.msra.mxu1 %v1070_v50  ;;  %6857 = vmatpush3.msra.mxu0 %v1065_v51  ;;  %v1013_v60 = vpop.f32.mrf.mxu1 }
 0x242   : > { %6867 = vmatprep.subr.mxu1 %v1069_v55  ;;  %6858 = vmatprep.subr.mxu0 %v1064_v56  ;;  %v2276_v10 = vrot.slane %v1013_v60, 6  ;;  %v2360_v14 = vrot.slane %v1013_v60, 7 }
 0x243   : > { %6868 = vmatpush3.msra.mxu1 %v1069_v55  ;;  %6859 = vmatpush3.msra.mxu0 %v1064_v56  ;;  %v6729_v2 = vpop.f32.mrf.mxu1 }
 0x244   : > { %6869 = vmatprep.subr.mxu1 %v1068_v59  ;;  %6861 = vmatmul.mubr.msk.f32.vlgmr.msra.gmra.mxu0 %vm1090_vm3, %v2021_v44  ;;  %v2277_v17 = vsel %vm1595_vm8, %v2275_v13, %v2276_v10 }
 0x245   : > { %6870 = vmatpush3.msra.mxu1 %v1068_v59  ;;  %6871 = vmatprep.mubr.msk.f32.mxu1 %vm1090_vm3, %v2107_v61  ;;  %v1016_v5 = vpop.f32.mrf.mxu1 }
 0x246   : > { %6874 = vmatprep.subr.mxu0 %v1075_v0  ;;  %6872 = vmatmul.mubr.msk.f32.vlgmr.msra.gmra.mxu1 %vm1090_vm3, %v2106_v54  ;;  %v2361_v15 = vrot.slane %v1016_v5, 7 }
 0x247   : > { %6875 = vmatpush3.msra.mxu0 %v1075_v0  ;;  %6885 = vmatprep.subr.mxu1 %v1079_v3  ;;  %v6730_v9 = vpop.f32.mrf.mxu1 }
 0x248   : > { %6876 = vmatprep.subr.mxu0 %v1074_v4  ;;  %6886 = vmatpush3.msra.mxu1 %v1079_v3  ;;  %v2362_v19 = vsel %vm1681_vm9, %v2360_v14, %v2361_v15 }
 0x249   : > { %6877 = vmatpush3.msra.mxu0 %v1074_v4  ;;  %6887 = vmatprep.subr.mxu1 %v1078_v6 }
 0x24a   : > { %6878 = vmatprep.subr.mxu0 %v1073_v7  ;;  %6882 = vmatprep.mubr.msk.f32.mxu0 %vm1090_vm3, %v2192_v8 }
 0x24b   : > { %6888 = vmatpush3.msra.mxu1 %v1078_v6  ;;  %6879 = vmatpush3.msra.mxu0 %v1073_v7 }
 0x24c   : > { %6889 = vmatprep.subr.mxu1 %v1077_v11  ;;  %6880 = vmatprep.subr.mxu0 %v1072_v12 }
 0x24d   : > { %6890 = vmatpush3.msra.mxu1 %v1077_v11  ;;  %6881 = vmatpush3.msra.mxu0 %v1072_v12 }
 0x24e   : > { %6891 = vmatprep.subr.mxu1 %v1076_v16  ;;  %6883 = vmatmul.mubr.msk.f32.vlgmr.msra.gmra.mxu0 %vm1090_vm3, %v2191_v63 }
 0x24f   : > { %6892 = vmatpush3.msra.mxu1 %v1076_v16  ;;  %6893 = vmatprep.mubr.msk.f32.mxu1 %vm1090_vm3, %v2277_v17 }
 0x250   : > { %6896 = vmatprep.subr.mxu0 %v1083_v18  ;;  %6894 = vmatmul.mubr.msk.f32.vlgmr.msra.gmra.mxu1 %vm1090_vm3, %v2276_v10 }
 0x251   : > { %6897 = vmatpush3.msra.mxu0 %v1083_v18  ;;  %6904 = vmatprep.mubr.msk.f32.mxu0 %vm1090_vm3, %v2362_v19 }
 0x252   : > { %6898 = vmatprep.subr.mxu0 %v1082_v20  ;;  %6907 = vmatprep.subr.mxu1 %v7704_v21 }
 0x253   : > { %6899 = vmatpush3.msra.mxu0 %v1082_v20  ;;  %6923 = vmatprep.mubr.msk.f32.mxu1 %vm7705_vm1, %v7704_v21 }
 0x254   : > { %6900 = vmatprep.subr.mxu0 %v1081_v22  ;;  %6908 = vmatpush3.msra.mxu1 %v2470_v25 }
 0x255   : > { %6901 = vmatpush3.msra.mxu0 %v1081_v22  ;;  %6909 = vmatprep.subr.mxu1 %v7704_v21 }
 0x256   : > { %6902 = vmatprep.subr.mxu0 %v1080_v23  ;;  %6910 = vmatpush3.msra.mxu1 %v2469_v27 }
 0x257   : > { %6903 = vmatpush3.msra.mxu0 %v1080_v23  ;;  %6911 = vmatprep.subr.mxu1 %v7704_v21 }
 0x258   : > { %6905 = vmatmul.mubr.msk.f32.vlgmr.msra.gmra.mxu0 %vm1090_vm3, %v2361_v15  ;;  %6926 = vmatprep.subr.mxu0 %v7704_v21 }
 0x259   : > { %6942 = vmatprep.mubr.msk.f32.mxu0 %vm7705_vm1, %v7704_v21  ;;  %6927 = vmatpush3.msra.mxu0 %v2462_v24 }
 0x25a   : > { %6928 = vmatprep.subr.mxu0 %v7704_v21  ;;  %6912 = vmatpush3.msra.mxu1 %v2468_v29 }
 0x25b   : > { %6929 = vmatpush3.msra.mxu0 %v2461_v26  ;;  %6913 = vmatprep.subr.mxu1 %v7704_v21 }
 0x25c   : > { %6930 = vmatprep.subr.mxu0 %v7704_v21  ;;  %6914 = vmatpush3.msra.mxu1 %v2467_v31 }
 0x25d   : > { %6931 = vmatpush3.msra.mxu0 %v2460_v28  ;;  %6915 = vmatprep.subr.mxu1 %v7704_v21 }
 0x25e   : > { %6932 = vmatprep.subr.mxu0 %v7704_v21  ;;  %6916 = vmatpush3.msra.mxu1 %v2466_v33 }
 0x25f   : > { %6933 = vmatpush3.msra.mxu0 %v2459_v30  ;;  %6917 = vmatprep.subr.mxu1 %v7704_v21 }
 0x260   : > { %6934 = vmatprep.subr.mxu0 %v7704_v21  ;;  %6918 = vmatpush3.msra.mxu1 %v2465_v35 }
 0x261   : > { %6935 = vmatpush3.msra.mxu0 %v2458_v32  ;;  %6919 = vmatprep.subr.mxu1 %v7704_v21 }
 0x262   : > { %6936 = vmatprep.subr.mxu0 %v7704_v21  ;;  %6920 = vmatpush3.msra.mxu1 %v2464_v37 }
 0x263   : > { %6937 = vmatpush3.msra.mxu0 %v2457_v34  ;;  %6921 = vmatprep.subr.mxu1 %v7704_v21 }
 0x264   : > { %6938 = vmatprep.subr.mxu0 %v7704_v21  ;;  %6922 = vmatpush3.msra.mxu1 %v2463_v39 }
 0x265   : > { %6939 = vmatpush3.msra.mxu0 %v2456_v36  ;;  %6945 = vmatprep.subr.mxu1 %v7704_v21  ;;  %v6101_v36 = vld [vmem:[%s9722_s6] ss:$0 sm:$0xff]  ;;  %s7647_s6 = scalar_lea.vmem %s7646_s5, 32 }
 0x266   : > { %6940 = vmatprep.subr.mxu0 %v7704_v21 }
 0x267   : > { %6941 = vmatpush3.msra.mxu0 %v2455_v38 }
 0x268   : > { %6964 = vmatprep.subr.mxu0 %v7704_v21 }
 0x2ce   : > { %v6741_v40 = vpop.f32.mrf.mxu0 }
 0x2d0   : > { %v1161_v41 = vpop.f32.mrf.mxu0 }
 0x2d2   : > { %v6763_v44 = vpop.f32.mrf.mxu1 }
 0x2d4   : > { %v1325_v47 = vpop.f32.mrf.mxu1 }
 0x2d6   : > { %v6752_v42 = vpop.f32.mrf.mxu0 }
 0x2d7   : > { %v1247_v43 = vadd.f32 %v6752_v42, %v6741_v40 }
 0x2d8   : > { %v1241_v46 = vpop.f32.mrf.mxu0 }
 0x2d9   : > { %v1335_v45 = vadd.f32 %v6763_v44, %v1247_v43  ;;  %v1242_v59 = vadd.f32 %v1241_v46, %v1161_v41  ;;  %v2486_v44 = vld [vmem:[%s9687_s7 + $0xf8] sm:$0xff] }
 0x2da   : > { %v2478_v46 = vld [vmem:[%s9687_s7 + $0xb8] sm:$0xff] }
 0x2db   : > { %v1334_v0 = vadd.f32 %v1325_v47, %v1242_v59  ;;  %v2485_v47 = vld [vmem:[%s9687_s7 + $0xf0] sm:$0xff]  ;;  %v2479_v59 = vld [vmem:[%s9687_s7 + $0xc0] sm:$0xff] }
 0x2dc   : > { %v6785_v50 = vpop.f32.mrf.mxu1 }
 0x2de   : > { %v1497_v53 = vpop.f32.mrf.mxu1 }
 0x2df   : > { %v6774_v48 = vpop.f32.mrf.mxu0 }
 0x2e0   : > { %v1421_v49 = vadd.f32 %v6774_v48, %v1335_v45  ;;  %v2477_v48 = vld [vmem:[%s9687_s7 + $0xb0] sm:$0xff] }
 0x2e1   : > { %v1411_v52 = vpop.f32.mrf.mxu0 }
 0x2e2   : > { %v1507_v51 = vadd.f32 %v6785_v50, %v1421_v49  ;;  %v1420_v3 = vadd.f32 %v1411_v52, %v1334_v0  ;;  %v2484_v49 = vld [vmem:[%s9687_s7 + $0xe8] sm:$0xff]  ;;  %v2475_v52 = vld [vmem:[%s9687_s7 + $0xa0] sm:$0xff]  ;;  %v2494_v0 = vld [vmem:[%s9687_s7 + $0x138] sm:$0xff] }
 0x2e3   : > { %v2476_v50 = vld [vmem:[%s9687_s7 + $0xa8] sm:$0xff] }
 0x2e4   : > { %v1506_v7 = vadd.f32 %v1497_v53, %v1420_v3  ;;  %v2482_v53 = vld [vmem:[%s9687_s7 + $0xd8] sm:$0xff]  ;;  %v2493_v3 = vld [vmem:[%s9687_s7 + $0x130] sm:$0xff] }
 0x2e6   : > { %v6807_v56 = vpop.f32.mrf.mxu1 }
 0x2e8   : > { %v1669_v60 = vpop.f32.mrf.mxu1 }
 0x2e9   : > { %v6796_v54 = vpop.f32.mrf.mxu0 }
 0x2ea   : > { %v1593_v55 = vadd.f32 %v6796_v54, %v1507_v51  ;;  %v2483_v51 = vld [vmem:[%s9687_s7 + $0xe0] sm:$0xff]  ;;  %v2474_v54 = vld [vmem:[%s9687_s7 + $0x98] sm:$0xff] }
 0x2eb   : > { %v1583_v58 = vpop.f32.mrf.mxu0 }
 0x2ec   : > { %v1679_v57 = vadd.f32 %v6807_v56, %v1593_v55  ;;  %v1592_v10 = vadd.f32 %v1583_v58, %v1506_v7  ;;  %v2481_v55 = vld [vmem:[%s9687_s7 + $0xd0] sm:$0xff]  ;;  %v2472_v58 = vld [vmem:[%s9687_s7 + $0x88] sm:$0xff]  ;;  %v2491_v7 = vld [vmem:[%s9687_s7 + $0x120] sm:$0xff] }
 0x2ed   : > { %v2473_v56 = vld [vmem:[%s9687_s7 + $0x90] sm:$0xff] }
 0x2ee   : > { %v1678_v12 = vadd.f32 %v1669_v60, %v1592_v10  ;;  %v2497_v10 = vld [vmem:[%s9687_s7 + $0x150] sm:$0xff] }
 0x2f1   : > { %v6829_v63 = vpop.f32.mrf.mxu1 }
 0x2f2   : > { %v6818_v61 = vpop.f32.mrf.mxu0 }
 0x2f3   : > { %v1765_v62 = vadd.f32 %v6818_v61, %v1679_v57  ;;  %v1838_v5 = vpop.f32.mrf.mxu1  ;;  %v2480_v57 = vld [vmem:[%s9687_s7 + $0xc8] sm:$0xff]  ;;  %v2471_v61 = vld [vmem:[%s9687_s7 + $0x80] sm:$0xff] }
 0x2f4   : > { %v1755_v4 = vpop.f32.mrf.mxu0 }
 0x2f5   : > { %v1848_v2 = vadd.f32 %v6829_v63, %v1765_v62  ;;  %v1764_v14 = vadd.f32 %v1755_v4, %v1678_v12  ;;  %v2502_v62 = vld [vmem:[%s9687_s7 + $0x178] sm:$0xff]  ;;  %v2500_v4 = vld [vmem:[%s9687_s7 + $0x168] sm:$0xff] }
 0x2f6   : > { %v2496_v12 = vld [vmem:[%s9687_s7 + $0x148] sm:$0xff] }
 0x2f7   : > { %v1847_v19 = vadd.f32 %v1838_v5, %v1764_v14  ;;  %v2492_v5 = vld [vmem:[%s9687_s7 + $0x128] sm:$0xff]  ;;  %v2495_v14 = vld [vmem:[%s9687_s7 + $0x140] sm:$0xff] }
 0x2fa   : > { %v6840_v6 = vpop.f32.mrf.mxu0 }
 0x2fb   : > { %v1933_v8 = vadd.f32 %v6840_v6, %v1848_v2  ;;  %v2501_v2 = vld [vmem:[%s9687_s7 + $0x170] sm:$0xff]  ;;  %v2499_v6 = vld [vmem:[%s9687_s7 + $0x160] sm:$0xff] }
 0x2fc   : > { %v6851_v9 = vpop.f32.mrf.mxu1  ;;  %v1923_v13 = vpop.f32.mrf.mxu0 }
 0x2fd   : > { %v2018_v11 = vadd.f32 %v6851_v9, %v1933_v8  ;;  %v1932_v22 = vadd.f32 %v1923_v13, %v1847_v19  ;;  %v2498_v8 = vld [vmem:[%s9687_s7 + $0x158] sm:$0xff]  ;;  %v2488_v13 = vld [vmem:[%s9687_s7 + $0x108] sm:$0xff] }
 0x2fe   : > { %v2008_v15 = vpop.f32.mrf.mxu1  ;;  %v2490_v9 = vld [vmem:[%s9687_s7 + $0x118] sm:$0xff] }
 0x2ff   : > { %v2017_v24 = vadd.f32 %v2008_v15, %v1932_v22  ;;  %v2510_v19 = vld [vmem:[%s9687_s7 + $0x1b8] sm:$0xff]  ;;  %v2509_v22 = vld [vmem:[%s9687_s7 + $0x1b0] sm:$0xff] }
 0x304   : > { %v6862_v16 = vpop.f32.mrf.mxu0 }
 0x305   : > { %v2103_v17 = vadd.f32 %v6862_v16, %v2018_v11  ;;  %v2489_v11 = vld [vmem:[%s9687_s7 + $0x110] sm:$0xff]  ;;  %v2487_v16 = vld [vmem:[%s9687_s7 + $0x100] sm:$0xff] }
 0x306   : > { %v6873_v18 = vpop.f32.mrf.mxu1  ;;  %v2093_v23 = vpop.f32.mrf.mxu0 }
 0x307   : > { %v2188_v20 = vadd.f32 %v6873_v18, %v2103_v17  ;;  %v2102_v27 = vadd.f32 %v2093_v23, %v2017_v24  ;;  %v2518_v17 = vld [vmem:[%s9687_s7 + $0x1f8] sm:$0xff]  ;;  %v2516_v23 = vld [vmem:[%s9687_s7 + $0x1e8] sm:$0xff] }
 0x308   : > { %v2178_v25 = vpop.f32.mrf.mxu1  ;;  %v2508_v24 = vld [vmem:[%s9687_s7 + $0x1a8] sm:$0xff] }
 0x309   : > { %v2187_v32 = vadd.f32 %v2178_v25, %v2102_v27  ;;  %v2515_v25 = vld [vmem:[%s9687_s7 + $0x1e0] sm:$0xff]  ;;  %v2514_v27 = vld [vmem:[%s9687_s7 + $0x1d8] sm:$0xff] }
 0x30e   : > { %v6884_v26 = vpop.f32.mrf.mxu0 }
 0x30f   : > { %v2273_v28 = vadd.f32 %v6884_v26, %v2188_v20  ;;  %v2517_v20 = vld [vmem:[%s9687_s7 + $0x1f0] sm:$0xff]  ;;  %v2507_v26 = vld [vmem:[%s9687_s7 + $0x1a0] sm:$0xff] }
 0x310   : > { %v6895_v29 = vpop.f32.mrf.mxu1  ;;  %v2263_v31 = vpop.f32.mrf.mxu0 }
 0x311   : > { %v2358_v30 = vadd.f32 %v6895_v29, %v2273_v28  ;;  %v2272_v33 = vadd.f32 %v2263_v31, %v2187_v32  ;;  %v2506_v28 = vld [vmem:[%s9687_s7 + $0x198] sm:$0xff]  ;;  %v2513_v29 = vld [vmem:[%s9687_s7 + $0x1d0] sm:$0xff]  ;;  %v2512_v31 = vld [vmem:[%s9687_s7 + $0x1c8] sm:$0xff] }
 0x312   : > { %v2348_v34 = vpop.f32.mrf.mxu1  ;;  %v2504_v32 = vld [vmem:[%s9687_s7 + $0x188] sm:$0xff] }
 0x313   : > { %v2357_v37 = vadd.f32 %v2348_v34, %v2272_v33  ;;  %v2511_v33 = vld [vmem:[%s9687_s7 + $0x1c0] sm:$0xff] }
 0x314   : > { %v7155_v34 = vld [vmem:[%s9689_s9 + $0xe4] ss:$16 sps:$4 sm:$0xff]  }
 0x318   : > { %v6906_v35 = vpop.f32.mrf.mxu0 }
 0x319   : > { %v2443_v38 = vadd.f32 %v6906_v35, %v2358_v30  ;;  %v2505_v30 = vld [vmem:[%s9687_s7 + $0x190] sm:$0xff] }
 0x31a   : > { %v2433_v39 = vpop.f32.mrf.mxu0 }
 0x31b   : > { %v8300_v40 = vadd.f32 %v6101_v36, %v2443_v38  ;;  %v2442_v41 = vadd.f32 %v2433_v39, %v2357_v37  ;;  %v2503_v37 = vld [vmem:[%s9687_s7 + $0x180] sm:$0xff] }
 0x31c   : > { %v7158_v38 = vld [vmem:[%s9689_s9 + $0xc4] ss:$16 sps:$4 sm:$0xff]  }
 0x31d   : > { %v2451_v42 = vadd.f32 %v6101_v36, %v2442_v41  ;;  %v7153_v36 = vld [vmem:[%s9689_s9 + $0xe0] ss:$16 sps:$4 sm:$0xff]   ;;  %v2526_v41 = vld [vmem:[%s9687_s7 + $0x238] sm:$0xff] }
 0x31f   : > { %v8302_v43 = vmax.f32 %v2451_v42, 0.0  ;;  %v7156_v42 = vld [vmem:[%s9689_s9 + $0xc0] ss:$16 sps:$4 sm:$0xff]  }
 0x321   : > { %6943 = vmatmul.mubr.msk.f32.vlgmr.msra.gmra.mxu0 %vm735_vm0, %v8302_v43  ;;  %v2528_v45 = vrot.slane %v8302_v43, 1  ;;  %v2747_v60 = vrot.slane %v8302_v43, 3  ;;  %v2673_v63 = vrot.slane %v8302_v43, 2  ;;  %v2895_v15 = vrot.slane %v8302_v43, 5 }
 0x322   : > { %6965 = vmatpush3.msra.mxu0 %v2486_v44  ;;  %6980 = vmatprep.mubr.msk.f32.mxu0 %vm7705_vm1, %v7704_v21  ;;  %v2821_v18 = vrot.slane %v8302_v43, 4  ;;  %v3043_v35 = vrot.slane %v8302_v43, 7  ;;  %v2969_v39 = vrot.slane %v8302_v43, 6  ;;  %v2525_v43 = vld [vmem:[%s9687_s7 + $0x230] sm:$0xff] }
 0x323   : > { %6966 = vmatprep.subr.mxu0 %v7704_v21  ;;  %6924 = vmatmul.mubr.msk.f32.vlgmr.msra.gmra.mxu1 %vm735_vm0, %v2528_v45  ;;  %v7161_v44 = vld [vmem:[%s9689_s9 + $0xa4] ss:$16 sps:$4 sm:$0xff]   ;;  %v2524_v45 = vld [vmem:[%s9687_s7 + $0x228] sm:$0xff] }
 0x324   : > { %6946 = vmatpush3.msra.mxu1 %v2478_v46  ;;  %6967 = vmatpush3.msra.mxu0 %v2485_v47  ;;  %v7159_v46 = vld [vmem:[%s9689_s9 + $0xa0] ss:$16 sps:$4 sm:$0xff]  }
 0x325   : > { %6947 = vmatprep.subr.mxu1 %v7704_v21  ;;  %6968 = vmatprep.subr.mxu0 %v7704_v21  ;;  %v2523_v47 = vld [vmem:[%s9687_s7 + $0x220] sm:$0xff] }
 0x326   : > { %6948 = vmatpush3.msra.mxu1 %v2477_v48  ;;  %6969 = vmatpush3.msra.mxu0 %v2484_v49  ;;  %v7164_v48 = vld [vmem:[%s9689_s9 + $0x84] ss:$16 sps:$4 sm:$0xff]   ;;  %v2522_v49 = vld [vmem:[%s9687_s7 + $0x218] sm:$0xff] }
 0x327   : > { %6949 = vmatprep.subr.mxu1 %v7704_v21  ;;  %6970 = vmatprep.subr.mxu0 %v7704_v21 }
 0x328   : > { %6950 = vmatpush3.msra.mxu1 %v2476_v50  ;;  %6971 = vmatpush3.msra.mxu0 %v2483_v51  ;;  %v7162_v50 = vld [vmem:[%s9689_s9 + $0x80] ss:$16 sps:$4 sm:$0xff]  }
 0x329   : > { %6951 = vmatprep.subr.mxu1 %v7704_v21  ;;  %6972 = vmatprep.subr.mxu0 %v7704_v21  ;;  %v2521_v51 = vld [vmem:[%s9687_s7 + $0x210] sm:$0xff] }
 0x32a   : > { %6952 = vmatpush3.msra.mxu1 %v2475_v52  ;;  %6973 = vmatpush3.msra.mxu0 %v2482_v53  ;;  %v7167_v52 = vld [vmem:[%s9689_s9 + $0x64] ss:$16 sps:$4 sm:$0xff]   ;;  %v2520_v53 = vld [vmem:[%s9687_s7 + $0x208] sm:$0xff] }
 0x32b   : > { %6953 = vmatprep.subr.mxu1 %v7704_v21  ;;  %6974 = vmatprep.subr.mxu0 %v7704_v21 }
 0x32c   : > { %6954 = vmatpush3.msra.mxu1 %v2474_v54  ;;  %6975 = vmatpush3.msra.mxu0 %v2481_v55  ;;  %v7165_v54 = vld [vmem:[%s9689_s9 + $0x60] ss:$16 sps:$4 sm:$0xff]  }
 0x32d   : > { %6955 = vmatprep.subr.mxu1 %v7704_v21  ;;  %6976 = vmatprep.subr.mxu0 %v7704_v21  ;;  %v2519_v55 = vld [vmem:[%s9687_s7 + $0x200] sm:$0xff] }
 0x32e   : > { %6956 = vmatpush3.msra.mxu1 %v2473_v56  ;;  %6977 = vmatpush3.msra.mxu0 %v2480_v57  ;;  %v7170_v56 = vld [vmem:[%s9689_s9 + $0xec] ss:$16 sps:$4 sm:$0xff]   ;;  %v7168_v57 = vld [vmem:[%s9689_s9 + $0xe8] ss:$16 sps:$4 sm:$0xff]  }
 0x32f   : > { %6957 = vmatprep.subr.mxu1 %v7704_v21  ;;  %6978 = vmatprep.subr.mxu0 %v7704_v21 }
 0x330   : > { %6958 = vmatpush3.msra.mxu1 %v2472_v58  ;;  %6979 = vmatpush3.msra.mxu0 %v2479_v59  ;;  %v7173_v58 = vld [vmem:[%s9689_s9 + $0x44] ss:$16 sps:$4 sm:$0xff]   ;;  %v2454_v59 = vmax.f32 %v8300_v40, 0.0  ;;  %v7182_v40 = vld [vmem:[%s9689_s9 + $0xac] ss:$16 sps:$4 sm:$0xff]  }
 0x331   : > { %6959 = vmatprep.subr.mxu1 %v7704_v21  ;;  %6981 = vmatmul.mubr.msk.f32.vlgmr.msra.gmra.mxu0 %vm735_vm0, %v2747_v60  ;;  %v7176_v60 = vld [vmem:[%s9689_s9 + $0xcc] ss:$16 sps:$4 sm:$0xff]  }
 0x332   : > { %7002 = vmatprep.subr.mxu0 %v7704_v21  ;;  %6960 = vmatpush3.msra.mxu1 %v2471_v61  ;;  %v7171_v61 = vld [vmem:[%s9689_s9 + $0x40] ss:$16 sps:$4 sm:$0xff]  }
 0x333   : > { %6961 = vmatprep.mubr.msk.f32.mxu1 %vm7705_vm1, %v7704_v21  ;;  %7003 = vmatpush3.msra.mxu0 %v2502_v62  ;;  %v7179_v62 = vld [vmem:[%s9689_s9 + $0x24] ss:$16 sps:$4 sm:$0xff]  }
 0x334   : > { %6962 = vmatmul.mubr.msk.f32.vlgmr.msra.gmra.mxu1 %vm735_vm0, %v2673_v63  ;;  %6983 = vmatprep.subr.mxu1 %v7704_v21  ;;  %v7177_v63 = vld [vmem:[%s9689_s9 + $0x20] ss:$16 sps:$4 sm:$0xff]  }
 0x335   : > { %7004 = vmatprep.subr.mxu0 %v7704_v21  ;;  %6984 = vmatpush3.msra.mxu1 %v2494_v0  ;;  %v7185_v0 = vld [vmem:[%s9689_s9 + $0x4] ss:$16 sps:$4 sm:$0xff]  }
 0x336   : > { %7005 = vmatpush3.msra.mxu0 %v2501_v2  ;;  %6985 = vmatprep.subr.mxu1 %v7704_v21  ;;  %v7180_v2 = vld [vmem:[%s9689_s9 + $0xa8] ss:$16 sps:$4 sm:$0xff]  }
 0x337   : > { %7006 = vmatprep.subr.mxu0 %v7704_v21  ;;  %6986 = vmatpush3.msra.mxu1 %v2493_v3  ;;  %v7188_v3 = vld [vmem:[%s9689_s9 + $0x8c] ss:$16 sps:$4 sm:$0xff]  }
 0x338   : > { %7007 = vmatpush3.msra.mxu0 %v2500_v4  ;;  %6987 = vmatprep.subr.mxu1 %v7704_v21  ;;  %v7183_v4 = vld [vmem:[%s9689_s9] ss:$16 sps:$4 sm:$0xff]  }
 0x339   : > { %7008 = vmatprep.subr.mxu0 %v7704_v21  ;;  %6988 = vmatpush3.msra.mxu1 %v2492_v5  ;;  %v7186_v5 = vld [vmem:[%s9689_s9 + $0x88] ss:$16 sps:$4 sm:$0xff]  }
 0x33a   : > { %7009 = vmatpush3.msra.mxu0 %v2499_v6  ;;  %6989 = vmatprep.subr.mxu1 %v7704_v21  ;;  %v7191_v6 = vld [vmem:[%s9689_s9 + $0x6c] ss:$16 sps:$4 sm:$0xff]  }
 0x33b   : > { %7010 = vmatprep.subr.mxu0 %v7704_v21  ;;  %6990 = vmatpush3.msra.mxu1 %v2491_v7  ;;  %v3195_v7 = vld [vmem:[%s586_s26] sm:$0x1]  ;;  %s578_s26 = scalar_lea.vmem [#allocation2], %s577_s29 }
 0x33c   : > { %7011 = vmatpush3.msra.mxu0 %v2498_v8  ;;  %6991 = vmatprep.subr.mxu1 %v7704_v21  ;;  %v7189_v8 = vld [vmem:[%s9689_s9 + $0x68] ss:$16 sps:$4 sm:$0xff]   ;;  %s5956_s19 = sshll.u32 %s578_s26, 4  ;;  %s5957_s19 = int_to_ptr.vmem [resolvable:$true] %s5956_s19 }
 0x33d   : > { %7012 = vmatprep.subr.mxu0 %v7704_v21  ;;  %6992 = vmatpush3.msra.mxu1 %v2490_v9  ;;  %v7194_v9 = vld [vmem:[%s9689_s9 + $0x4c] ss:$16 sps:$4 sm:$0xff]   ;;  %s7641_s24 = scalar_lea.vmem %s5957_s19, 16  ;;  %p7648_p0 = scmp.lt.s32.totalorder %s5957_s19, %s7646_s5 }
 0x33e   : > { %7013 = vmatpush3.msra.mxu0 %v2497_v10  ;;  %6993 = vmatprep.subr.mxu1 %v7704_v21  ;;  %v7201_v10 = vld [vmem:[%s9691_s11 + $0xe0] ss:$16 sps:$4 sm:$0xff]   ;;  %p7642_p11 = scmp.ne.s32.totalorder %s5957_s19, %s7641_s24  ;;  %p7649_p1 = scmp.lt.s32.totalorder %s7647_s6, %s7641_s24 }
 0x33f   : > { %7014 = vmatprep.subr.mxu0 %v7704_v21  ;;  %6994 = vmatpush3.msra.mxu1 %v2489_v11  ;;  %v7203_v11 = vld [vmem:[%s9691_s11 + $0xe4] ss:$16 sps:$4 sm:$0xff]  }
 0x340   : > { %7015 = vmatpush3.msra.mxu0 %v2496_v12  ;;  %6995 = vmatprep.subr.mxu1 %v7704_v21  ;;  %v7206_v12 = vld [vmem:[%s9691_s11 + $0xc4] ss:$16 sps:$4 sm:$0xff]   ;;  %p7643_p12 = pnand %p7642_p11, %p7840_p5  ;;  %p7650_p2 = por %p7649_p1, %p7648_p0 }
 0x341   : > { %7016 = vmatprep.subr.mxu0 %v7704_v21  ;;  %6996 = vmatpush3.msra.mxu1 %v2488_v13  ;;  %v7192_v13 = vld [vmem:[%s9689_s9 + $0x48] ss:$16 sps:$4 sm:$0xff]  }
 0x342   : > { %7017 = vmatpush3.msra.mxu0 %v2495_v14  ;;  %7018 = vmatprep.mubr.msk.f32.mxu0 %vm7705_vm1, %v7704_v21  ;;  %v7204_v14 = vld [vmem:[%s9691_s11 + $0xc0] ss:$16 sps:$4 sm:$0xff]   ;;  %p7644_p13 = pneg %p7643_p12 }
 0x343   : > { %6997 = vmatprep.subr.mxu1 %v7704_v21  ;;  %7019 = vmatmul.mubr.msk.f32.vlgmr.msra.gmra.mxu0 %vm735_vm0, %v2895_v15  ;;  %v7197_v15 = vld [vmem:[%s9689_s9 + $0x2c] ss:$16 sps:$4 sm:$0xff]  }
 0x344   : > { %7040 = vmatprep.subr.mxu0 %v7704_v21  ;;  %6998 = vmatpush3.msra.mxu1 %v2487_v16  ;;  %v7195_v16 = vld [vmem:[%s9689_s9 + $0x28] ss:$16 sps:$4 sm:$0xff]   ;;  %p7651_p3 = pnand %p7650_p2, %p7644_p13 }
 0x345   : > { %6999 = vmatprep.mubr.msk.f32.mxu1 %vm7705_vm1, %v7704_v21  ;;  %7041 = vmatpush3.msra.mxu0 %v2518_v17  ;;  %v7200_v17 = vld [vmem:[%s9689_s9 + $0xc] ss:$16 sps:$4 sm:$0xff]  }
 0x346   : > { %7000 = vmatmul.mubr.msk.f32.vlgmr.msra.gmra.mxu1 %vm735_vm0, %v2821_v18  ;;  %7021 = vmatprep.subr.mxu1 %v7704_v21  ;;  %v7198_v18 = vld [vmem:[%s9689_s9 + $0x8] ss:$16 sps:$4 sm:$0xff]  }
 0x347   : > { %7042 = vmatprep.subr.mxu0 %v7704_v21  ;;  %7022 = vmatpush3.msra.mxu1 %v2510_v19  ;;  %v7207_v19 = vld [vmem:[%s9691_s11 + $0xa0] ss:$16 sps:$4 sm:$0xff]  }
 0x348   : > { %7043 = vmatpush3.msra.mxu0 %v2517_v20  ;;  %7023 = vmatprep.subr.mxu1 %v7704_v21  ;;  %v7209_v20 = vld [vmem:[%s9691_s11 + $0xa4] ss:$16 sps:$4 sm:$0xff]  }
 0x349   : > { %7044 = vmatprep.subr.mxu0 %v7704_v21  ;;  %7024 = vmatpush3.msra.mxu1 %v2509_v22  ;;  %v7210_v22 = vld [vmem:[%s9691_s11 + $0x80] ss:$16 sps:$4 sm:$0xff]  }
 0x34a   : > { %7045 = vmatpush3.msra.mxu0 %v2516_v23  ;;  %7025 = vmatprep.subr.mxu1 %v7704_v21  ;;  %v7212_v23 = vld [vmem:[%s9691_s11 + $0x84] ss:$16 sps:$4 sm:$0xff]  }
 0x34b   : > { %7046 = vmatprep.subr.mxu0 %v7704_v21  ;;  %7026 = vmatpush3.msra.mxu1 %v2508_v24  ;;  %v7215_v24 = vld [vmem:[%s9691_s11 + $0x64] ss:$16 sps:$4 sm:$0xff]  }
 0x34c   : > { %7047 = vmatpush3.msra.mxu0 %v2515_v25  ;;  %7027 = vmatprep.subr.mxu1 %v7704_v21  ;;  %v7216_v25 = vld [vmem:[%s9691_s11 + $0x2e0] ss:$16 sps:$4 sm:$0xff]  }
 0x34d   : > { %7048 = vmatprep.subr.mxu0 %v7704_v21  ;;  %7028 = vmatpush3.msra.mxu1 %v2507_v26  ;;  %v7218_v26 = vld [vmem:[%s9691_s11 + $0x2e4] ss:$16 sps:$4 sm:$0xff]  }
 0x34e   : > { %7049 = vmatpush3.msra.mxu0 %v2514_v27  ;;  %7029 = vmatprep.subr.mxu1 %v7704_v21  ;;  %v7213_v27 = vld [vmem:[%s9691_s11 + $0x60] ss:$16 sps:$4 sm:$0xff]  }
 0x34f   : > { %7050 = vmatprep.subr.mxu0 %v7704_v21  ;;  %7030 = vmatpush3.msra.mxu1 %v2506_v28  ;;  %v7224_v28 = vld [vmem:[%s9691_s11 + $0x2c4] ss:$16 sps:$4 sm:$0xff]  }
 0x350   : > { %7051 = vmatpush3.msra.mxu0 %v2513_v29  ;;  %7031 = vmatprep.subr.mxu1 %v7704_v21  ;;  %v7221_v29 = vld [vmem:[%s9691_s11 + $0x44] ss:$16 sps:$4 sm:$0xff]  }
 0x351   : > { %7052 = vmatprep.subr.mxu0 %v7704_v21  ;;  %7032 = vmatpush3.msra.mxu1 %v2505_v30  ;;  %v7222_v30 = vld [vmem:[%s9691_s11 + $0x2c0] ss:$16 sps:$4 sm:$0xff]  }
 0x352   : > { %7053 = vmatpush3.msra.mxu0 %v2512_v31  ;;  %7033 = vmatprep.subr.mxu1 %v7704_v21  ;;  %v7219_v31 = vld [vmem:[%s9691_s11 + $0x40] ss:$16 sps:$4 sm:$0xff]  }
 0x353   : > { %7054 = vmatprep.subr.mxu0 %v7704_v21  ;;  %7034 = vmatpush3.msra.mxu1 %v2504_v32  ;;  %v7225_v32 = vld [vmem:[%s9691_s11 + $0x20] ss:$16 sps:$4 sm:$0xff]  }
 0x354   : > { %7055 = vmatpush3.msra.mxu0 %v2511_v33  ;;  %7056 = vmatprep.mubr.msk.f32.mxu0 %vm7705_vm1, %v7704_v21  ;;  %v7227_v33 = vld [vmem:[%s9691_s11 + $0x24] ss:$16 sps:$4 sm:$0xff]  }
 0x355   : > { %7035 = vmatprep.subr.mxu1 %v7704_v21  ;;  %7057 = vmatmul.mubr.msk.f32.vlgmr.msra.gmra.mxu0 %vm735_vm0, %v3043_v35  ;;  %v7228_v35 = vld [vmem:[%s9691_s11 + $0x2a0] ss:$16 sps:$4 sm:$0xff]  }
 0x356   : > { %3410 = vmatprep.subr.bf16.mxu0 %v7155_v34  ;;  %7036 = vmatpush3.msra.mxu1 %v2503_v37  ;;  %v7230_v34 = vld [vmem:[%s9691_s11 + $0x2a4] ss:$16 sps:$4 sm:$0xff]   ;;  %v7231_v37 = vld [vmem:[%s9691_s11] ss:$16 sps:$4 sm:$0xff]  }
 0x357   : > { %7037 = vmatprep.mubr.msk.f32.mxu1 %vm7705_vm1, %v7704_v21  ;;  %3411 = vmatpush1.bf16.msra.mxu0 %v7153_v36  ;;  %v7233_v36 = vld [vmem:[%s9691_s11 + $0x4] ss:$16 sps:$4 sm:$0xff]  }
 0x358   : > { %7038 = vmatmul.mubr.msk.f32.vlgmr.msra.gmra.mxu1 %vm735_vm0, %v2969_v39  ;;  %7059 = vmatprep.subr.mxu1 %v7704_v21  ;;  %v7236_v39 = vld [vmem:[%s9691_s11 + $0x284] ss:$16 sps:$4 sm:$0xff]  }
 0x359   : > { %7060 = vmatpush3.msra.mxu1 %v2526_v41  ;;  %3412 = vmatprep.subr.bf16.mxu0 %v7158_v38  ;;  %v7234_v38 = vld [vmem:[%s9691_s11 + $0x280] ss:$16 sps:$4 sm:$0xff]   ;;  %v7239_v41 = vld [vmem:[%s9691_s11 + $0x1e4] ss:$16 sps:$4 sm:$0xff]  }
 0x35a   : > { %7061 = vmatprep.subr.mxu1 %v7704_v21  ;;  %7075 = vmatprep.mubr.msk.f32.mxu1 %vm7705_vm1, %v7704_v21 }
 0x35b   : > { %7062 = vmatpush3.msra.mxu1 %v2525_v43  ;;  %3413 = vmatpush1.bf16.msra.mxu0 %v7156_v42  ;;  %v7237_v42 = vld [vmem:[%s9691_s11 + $0x1e0] ss:$16 sps:$4 sm:$0xff]   ;;  %v7242_v43 = vld [vmem:[%s9691_s11 + $0x264] ss:$16 sps:$4 sm:$0xff]  }
 0x35c   : > { %7063 = vmatprep.subr.mxu1 %v7704_v21  ;;  %3414 = vmatprep.subr.bf16.mxu0 %v7161_v44  ;;  %v7245_v44 = vld [vmem:[%s9691_s11 + $0x1c4] ss:$16 sps:$4 sm:$0xff]  }
 0x35d   : > { %7064 = vmatpush3.msra.mxu1 %v2524_v45  ;;  %3442 = vmatprep.mubr.bf16.mxu0 %v7703_v1  ;;  %v7240_v45 = vld [vmem:[%s9691_s11 + $0x260] ss:$16 sps:$4 sm:$0xff]  }
 0x35e   : > { %7065 = vmatprep.subr.mxu1 %v7704_v21 }
 0x35f   : > { %7066 = vmatpush3.msra.mxu1 %v2523_v47  ;;  %3415 = vmatpush1.bf16.msra.mxu0 %v7159_v46  ;;  %v7248_v46 = vld [vmem:[%s9691_s11 + $0x244] ss:$16 sps:$4 sm:$0xff]   ;;  %v7243_v47 = vld [vmem:[%s9691_s11 + $0x1c0] ss:$16 sps:$4 sm:$0xff]  }
 0x360   : > { %7067 = vmatprep.subr.mxu1 %v7704_v21  ;;  %3416 = vmatprep.subr.bf16.mxu0 %v7164_v48  ;;  %v7251_v48 = vld [vmem:[%s9691_s11 + $0x1a4] ss:$16 sps:$4 sm:$0xff]  }
 0x361   : > { %7068 = vmatpush3.msra.mxu1 %v2522_v49  ;;  %v7246_v49 = vld [vmem:[%s9691_s11 + $0x240] ss:$16 sps:$4 sm:$0xff]  }
 0x362   : > { %7069 = vmatprep.subr.mxu1 %v7704_v21 }
 0x363   : > { %7070 = vmatpush3.msra.mxu1 %v2521_v51  ;;  %3417 = vmatpush1.bf16.msra.mxu0 %v7162_v50  ;;  %v7249_v50 = vld [vmem:[%s9691_s11 + $0x1a0] ss:$16 sps:$4 sm:$0xff]   ;;  %v7254_v51 = vld [vmem:[%s9691_s11 + $0x224] ss:$16 sps:$4 sm:$0xff]  }
 0x364   : > { %7071 = vmatprep.subr.mxu1 %v7704_v21  ;;  %3418 = vmatprep.subr.bf16.mxu0 %v7167_v52  ;;  %v7252_v52 = vld [vmem:[%s9691_s11 + $0x220] ss:$16 sps:$4 sm:$0xff]  }
 0x365   : > { %7072 = vmatpush3.msra.mxu1 %v2520_v53  ;;  %v7257_v53 = vld [vmem:[%s9691_s11 + $0x184] ss:$16 sps:$4 sm:$0xff]  }
 0x366   : > { %7073 = vmatprep.subr.mxu1 %v7704_v21  ;;  %v7174_v21 = vld [vmem:[%s9689_s9 + $0xc8] ss:$16 sps:$4 sm:$0xff]  }
 0x367   : > { %7074 = vmatpush3.msra.mxu1 %v2519_v55  ;;  %3419 = vmatpush1.bf16.msra.mxu0 %v7165_v54  ;;  %v7255_v54 = vld [vmem:[%s9691_s11 + $0x180] ss:$16 sps:$4 sm:$0xff]   ;;  %v7260_v55 = vld [vmem:[%s9691_s11 + $0x204] ss:$16 sps:$4 sm:$0xff]  }
 0x368   : > { %7076 = vmatmul.mubr.msk.f32.vlgmr.msra.gmra.mxu1 %vm735_vm0, %v2454_v59  ;;  %3451 = vmatprep.subr.bf16.mxu1 %v7170_v56  ;;  %v7258_v56 = vld [vmem:[%s9691_s11 + $0x200] ss:$16 sps:$4 sm:$0xff]  }
 0x369   : > { %3452 = vmatpush1.bf16.msra.mxu1 %v7168_v57  ;;  %3420 = vmatprep.subr.bf16.mxu0 %v7173_v58  ;;  %v7263_v57 = vld [vmem:[%s9691_s11 + $0x164] ss:$16 sps:$4 sm:$0xff]   ;;  %v7261_v58 = vld [vmem:[%s9691_s11 + $0x160] ss:$16 sps:$4 sm:$0xff]  }
 0x36a   : > { %3453 = vmatprep.subr.bf16.mxu1 %v7176_v60  ;;  %3483 = vmatprep.mubr.bf16.mxu1 %v7703_v1  ;;  %v7264_v59 = vld [vmem:[%s9691_s11 + $0x3e0] ss:$16 sps:$4 sm:$0xff]   ;;  %v7266_v60 = vld [vmem:[%s9691_s11 + $0x3e4] ss:$16 sps:$4 sm:$0xff]  }
 0x36b   : > { %3421 = vmatpush1.bf16.msra.mxu0 %v7171_v61  ;;  %v7267_v61 = vld [vmem:[%s9691_s11 + $0x140] ss:$16 sps:$4 sm:$0xff]  }
 0x36c   : > { %3422 = vmatprep.subr.bf16.mxu0 %v7179_v62  ;;  %v7269_v62 = vld [vmem:[%s9691_s11 + $0x144] ss:$16 sps:$4 sm:$0xff]  }
 0x36d   : > { %3454 = vmatpush1.bf16.msra.mxu1 %v7174_v21  ;;  %v7272_v21 = vld [vmem:[%s9691_s11 + $0x3c4] ss:$16 sps:$4 sm:$0xff]  }
 0x36e   : > { %3455 = vmatprep.subr.bf16.mxu1 %v7182_v40  ;;  %v7270_v40 = vld [vmem:[%s9691_s11 + $0x3c0] ss:$16 sps:$4 sm:$0xff]  }
 0x36f   : > { %3423 = vmatpush1.bf16.msra.mxu0 %v7177_v63  ;;  %v7275_v63 = vld [vmem:[%s9691_s11 + $0x124] ss:$16 sps:$4 sm:$0xff]  }
 0x370   : > { %3424 = vmatprep.subr.bf16.mxu0 %v7185_v0  ;;  %v7273_v0 = vld [vmem:[%s9691_s11 + $0x120] ss:$16 sps:$4 sm:$0xff]  }
 0x371   : > { %3456 = vmatpush1.bf16.msra.mxu1 %v7180_v2  ;;  %v7278_v2 = vld [vmem:[%s9691_s11 + $0x3a4] ss:$16 sps:$4 sm:$0xff]  }
 0x372   : > { %3457 = vmatprep.subr.bf16.mxu1 %v7188_v3  ;;  %v7276_v3 = vld [vmem:[%s9691_s11 + $0x3a0] ss:$16 sps:$4 sm:$0xff]  }
 0x373   : > { %3425 = vmatpush1.bf16.msra.mxu0 %v7183_v4  ;;  %v7281_v4 = vld [vmem:[%s9691_s11 + $0x104] ss:$16 sps:$4 sm:$0xff]  }
 0x374   : > { %4290 = vmatprep.subr.bf16.mxu0 %v7203_v11  ;;  %v7296_v11 = vld [vmem:[%s9691_s11 + $0x344] ss:$16 sps:$4 sm:$0xff]  }
 0x375   : > { %3458 = vmatpush1.bf16.msra.mxu1 %v7186_v5  ;;  %v7279_v5 = vld [vmem:[%s9691_s11 + $0x100] ss:$16 sps:$4 sm:$0xff]  }
 0x376   : > { %3443 = vmatmul.mubr.bf16.vlgmr.msra.gmra.mxu0 %v3195_v7  ;;  %3459 = vmatprep.subr.bf16.mxu1 %v7191_v6  ;;  %v7284_v6 = vld [vmem:[%s9691_s11 + $0x384] ss:$16 sps:$4 sm:$0xff]  }
 0x377   : > { %4291 = vmatpush1.bf16.msra.mxu0 %v7201_v10  ;;  %v7288_v10 = vld [vmem:[%s9691_s11 + $0x360] ss:$16 sps:$4 sm:$0xff]  }
 0x378   : > { %4292 = vmatprep.subr.bf16.mxu0 %v7206_v12  ;;  %v7294_v12 = vld [vmem:[%s9691_s11 + $0x340] ss:$16 sps:$4 sm:$0xff]  }
 0x379   : > { %3460 = vmatpush1.bf16.msra.mxu1 %v7189_v8  ;;  %v7287_v8 = vld [vmem:[%s9691_s11 + $0xec] ss:$16 sps:$4 sm:$0xff]  }
 0x37a   : > { %3461 = vmatprep.subr.bf16.mxu1 %v7194_v9  ;;  %v7290_v9 = vld [vmem:[%s9691_s11 + $0x364] ss:$16 sps:$4 sm:$0xff]  }
 0x37b   : > { %4293 = vmatpush1.bf16.msra.mxu0 %v7204_v14  ;;  %v7300_v14 = vld [vmem:[%s9691_s11 + $0x320] ss:$16 sps:$4 sm:$0xff]  }
 0x37c   : > { %4294 = vmatprep.subr.bf16.mxu0 %v7209_v20 }
 0x37d   : > { %3462 = vmatpush1.bf16.msra.mxu1 %v7192_v13  ;;  %v7302_v13 = vld [vmem:[%s9691_s11 + $0x324] ss:$16 sps:$4 sm:$0xff]  }
 0x37e   : > { %3463 = vmatprep.subr.bf16.mxu1 %v7197_v15  ;;  %v7308_v15 = vld [vmem:[%s9691_s11 + $0x304] ss:$16 sps:$4 sm:$0xff]  }
 0x37f   : > { %4295 = vmatpush1.bf16.msra.mxu0 %v7207_v19 }
 0x380   : > { %4296 = vmatprep.subr.bf16.mxu0 %v7212_v23 }
 0x381   : > { %3464 = vmatpush1.bf16.msra.mxu1 %v7195_v16  ;;  %v7306_v16 = vld [vmem:[%s9691_s11 + $0x300] ss:$16 sps:$4 sm:$0xff]  }
 0x382   : > { %3465 = vmatprep.subr.bf16.mxu1 %v7200_v17  ;;  %v7314_v17 = vld [vmem:[%s9691_s11 + $0x2ec] ss:$16 sps:$4 sm:$0xff]  }
 0x383   : > { %4297 = vmatpush1.bf16.msra.mxu0 %v7210_v22 }
 0x384   : > { %4298 = vmatprep.subr.bf16.mxu0 %v7215_v24 }
 0x385   : > { %3466 = vmatpush1.bf16.msra.mxu1 %v7198_v18 }
 0x386   : > { %4331 = vmatprep.subr.bf16.mxu1 %v7218_v26 }
 0x387   : > { %4299 = vmatpush1.bf16.msra.mxu0 %v7213_v27 }
 0x388   : > { %3484 = vmatmul.mubr.bf16.vlgmr.msra.gmra.mxu1 %v3195_v7  ;;  %4300 = vmatprep.subr.bf16.mxu0 %v7221_v29  ;;  %v7282_v7 = vld [vmem:[%s9691_s11 + $0x380] ss:$16 sps:$4 sm:$0xff]  }
 0x389   : > { %4332 = vmatpush1.bf16.msra.mxu1 %v7216_v25 }
 0x38a   : > { %4333 = vmatprep.subr.bf16.mxu1 %v7224_v28 }
 0x38b   : > { %4301 = vmatpush1.bf16.msra.mxu0 %v7219_v31 }
 0x38c   : > { %4302 = vmatprep.subr.bf16.mxu0 %v7227_v33 }
 0x38d   : > { %4334 = vmatpush1.bf16.msra.mxu1 %v7222_v30 }
 0x38e   : > { %4335 = vmatprep.subr.bf16.mxu1 %v7230_v34 }
 0x38f   : > { %4303 = vmatpush1.bf16.msra.mxu0 %v7225_v32 }
 0x390   : > { %4304 = vmatprep.subr.bf16.mxu0 %v7233_v36 }
 0x391   : > { %4336 = vmatpush1.bf16.msra.mxu1 %v7228_v35 }
 0x392   : > { %4337 = vmatprep.subr.bf16.mxu1 %v7236_v39 }
 0x393   : > { %4305 = vmatpush1.bf16.msra.mxu0 %v7231_v37 }
 0x394   : > { %4306 = vmatprep.subr.bf16.mxu0 %v7239_v41 }
 0x395   : > { %4338 = vmatpush1.bf16.msra.mxu1 %v7234_v38 }
 0x396   : > { %4339 = vmatprep.subr.bf16.mxu1 %v7242_v43  ;;  %v3390_v43 = vlaneseq }
 0x397   : > { %4307 = vmatpush2.bf16.msra.mxu0 %v7237_v42 }
 0x398   : > { %4308 = vmatprep.subr.bf16.mxu0 %v7245_v44 }
 0x399   : > { %4340 = vmatpush1.bf16.msra.mxu1 %v7240_v45 }
 0x39a   : > { %4341 = vmatprep.subr.bf16.mxu1 %v7248_v46 }
 0x39b   : > { %4309 = vmatpush2.bf16.msra.mxu0 %v7243_v47  ;;  %v3391_v47 = vshrl.u32 %v3390_v43, 7  ;;  %v7347_v43 = vld [vmem:[%s9691_s11 + $0x1ac] ss:$16 sps:$4 sm:$0xff]  }
 0x39c   : > { %4310 = vmatprep.subr.bf16.mxu0 %v7251_v48 }
 0x39d   : > { %4342 = vmatpush1.bf16.msra.mxu1 %v7246_v49  ;;  %v8860_v48 = vsub.s32 0, %v3391_v47  ;;  %v3228_v49 = vld [vmem:[%s9690_s10] sm:$0xf] }
 0x39e   : > { %4343 = vmatprep.subr.bf16.mxu1 %v7254_v51 }
 0x39f   : > { %4311 = vmatpush2.bf16.msra.mxu0 %v7249_v50  ;;  %v8865_v50 = vsub.s32 1, %v3391_v47  ;;  %v3393_v51 = vrot.slane %v3228_v49, %v8860_v48 }
 0x3a0   : > { %4312 = vmatprep.subr.bf16.mxu0 %v7257_v53 }
 0x3a1   : > { %4344 = vmatpush1.bf16.msra.mxu1 %v7252_v52  ;;  %v3397_v52 = vrot.slane %v3228_v49, %v8865_v50 }
 0x3a2   : > { %4345 = vmatprep.subr.bf16.mxu1 %v7260_v55 }
 0x3a3   : > { %4313 = vmatpush2.bf16.msra.mxu0 %v7255_v54 }
 0x3a4   : > { %4314 = vmatprep.subr.bf16.mxu0 %v7263_v57 }
 0x3a5   : > { %4346 = vmatpush1.bf16.msra.mxu1 %v7258_v56 }
 0x3a6   : > { %4347 = vmatprep.subr.bf16.mxu1 %v7266_v60 }
 0x3a7   : > { %4315 = vmatpush2.bf16.msra.mxu0 %v7261_v58 }
 0x3a8   : > { %4316 = vmatprep.subr.bf16.mxu0 %v7269_v62 }
 0x3a9   : > { %4348 = vmatpush2.bf16.msra.mxu1 %v7264_v59 }
 0x3aa   : > { %4349 = vmatprep.subr.bf16.mxu1 %v7272_v21  ;;  %v7285_v21 = vld [vmem:[%s9691_s11 + $0xe8] ss:$16 sps:$4 sm:$0xff]  }
 0x3ab   : > { %4317 = vmatpush2.bf16.msra.mxu0 %v7267_v61 }
 0x3ac   : > { %4318 = vmatprep.subr.bf16.mxu0 %v7275_v63  ;;  %v7291_v63 = vld [vmem:[%s9691_s11 + $0xc8] ss:$16 sps:$4 sm:$0xff]  }
 0x3ad   : > { %4350 = vmatpush2.bf16.msra.mxu1 %v7270_v40  ;;  %v7293_v40 = vld [vmem:[%s9691_s11 + $0xcc] ss:$16 sps:$4 sm:$0xff]  }
 0x3ae   : > { %4351 = vmatprep.subr.bf16.mxu1 %v7278_v2  ;;  %v7299_v2 = vld [vmem:[%s9691_s11 + $0xac] ss:$16 sps:$4 sm:$0xff]  }
 0x3af   : > { %4319 = vmatpush2.bf16.msra.mxu0 %v7273_v0  ;;  %v8881_v0 = vsub.s32 2, %v3391_v47 }
 0x3b0   : > { %4320 = vmatprep.subr.bf16.mxu0 %v7281_v4  ;;  %v7297_v4 = vld [vmem:[%s9691_s11 + $0xa8] ss:$16 sps:$4 sm:$0xff]  }
 0x3b1   : > { %4352 = vmatpush2.bf16.msra.mxu1 %v7276_v3  ;;  %v8886_v3 = vsub.s32 3, %v3391_v47  ;;  %v7345_v47 = vld [vmem:[%s9691_s11 + $0x1a8] ss:$16 sps:$4 sm:$0xff]  }
 0x3b2   : > { %4353 = vmatprep.subr.bf16.mxu1 %v7284_v6  ;;  %v7305_v6 = vld [vmem:[%s9691_s11 + $0x8c] ss:$16 sps:$4 sm:$0xff]  }
 0x3b3   : > { %4321 = vmatpush2.bf16.msra.mxu0 %v7279_v5  ;;  %v3401_v5 = vrot.slane %v3228_v49, %v8881_v0 }
 0x3b4   : > { %4372 = vmatprep.subr.bf16.mxu0 %v7287_v8 }
 0x3b5   : > { %4354 = vmatpush2.bf16.msra.mxu1 %v7282_v7  ;;  %v3405_v7 = vrot.slane %v3228_v49, %v8886_v3  ;;  %v7353_v49 = vld [vmem:[%s9691_s11 + $0x18c] ss:$16 sps:$4 sm:$0xff]  }
 0x3b6   : > { %4355 = vmatprep.subr.bf16.mxu1 %v7290_v9 }
 0x3b9   : > { %4356 = vmatpush2.bf16.msra.mxu1 %v7288_v10  ;;  %v7303_v10 = vld [vmem:[%s9691_s11 + $0x88] ss:$16 sps:$4 sm:$0xff]  }
 0x3ba   : > { %4357 = vmatprep.subr.bf16.mxu1 %v7296_v11 }
 0x3bd   : > { %4358 = vmatpush2.bf16.msra.mxu1 %v7294_v12  ;;  %v7311_v12 = vld [vmem:[%s9691_s11 + $0x6c] ss:$16 sps:$4 sm:$0xff]  }
 0x3be   : > { %4359 = vmatprep.subr.bf16.mxu1 %v7302_v13 }
 0x3c1   : > { %4360 = vmatpush2.bf16.msra.mxu1 %v7300_v14 }
 0x3c2   : > { %4361 = vmatprep.subr.bf16.mxu1 %v7308_v15 }
 0x3c5   : > { %4362 = vmatpush2.bf16.msra.mxu1 %v7306_v16 }
 0x3c6   : > { %4413 = vmatprep.subr.bf16.mxu1 %v7314_v17  ;;  %v7309_v17 = vld [vmem:[%s9691_s11 + $0x68] ss:$16 sps:$4 sm:$0xff]  }
 0x3e1   : > { %v2669_v18 = vpop.f32.mrf.mxu0 }
 0x3e3   : > { %v2597_v19 = vpop.f32.mrf.mxu1  ;;  %v6944_v20 = vpop.f32.mrf.mxu0 }
 0x3e4   : > { %v2670_v22 = vadd.f32 %v2669_v18, %v2597_v19  ;;  %v7317_v19 = vld [vmem:[%s9691_s11 + $0x4c] ss:$16 sps:$4 sm:$0xff]  }
 0x3e5   : > { %v6925_v23 = vpop.f32.mrf.mxu1 }
 0x3f1   : > { %v2816_v24 = vpop.f32.mrf.mxu0 }
 0x3f3   : > { %v6982_v25 = vpop.f32.mrf.mxu0 }
 0x3f4   : > { %v2742_v26 = vpop.f32.mrf.mxu1  ;;  %v7315_v25 = vld [vmem:[%s9691_s11 + $0x48] ss:$16 sps:$4 sm:$0xff]  }
 0x3f5   : > { %v2746_v27 = vadd.f32 %v2742_v26, %v2670_v22  ;;  %v7312_v22 = vld [vmem:[%s9691_s11 + $0x2e8] ss:$16 sps:$4 sm:$0xff]   ;;  %v7323_v26 = vld [vmem:[%s9691_s11 + $0x2c] ss:$16 sps:$4 sm:$0xff]  }
 0x3f6   : > { %v6963_v28 = vpop.f32.mrf.mxu1 }
 0x3f7   : > { %v2820_v29 = vadd.f32 %v2816_v24, %v2746_v27  ;;  %v7320_v24 = vld [vmem:[%s9691_s11 + $0x2cc] ss:$16 sps:$4 sm:$0xff]   ;;  %v7318_v27 = vld [vmem:[%s9691_s11 + $0x2c8] ss:$16 sps:$4 sm:$0xff]  }
 0x3f8   : > { %v7326_v28 = vld [vmem:[%s9691_s11 + $0x2ac] ss:$16 sps:$4 sm:$0xff]  }
 0x403   : > { %v2964_v30 = vpop.f32.mrf.mxu0 }
 0x405   : > { %v7020_v31 = vpop.f32.mrf.mxu0 }
 0x406   : > { %v2890_v32 = vpop.f32.mrf.mxu1  ;;  %v7324_v31 = vld [vmem:[%s9691_s11 + $0x2a8] ss:$16 sps:$4 sm:$0xff]  }
 0x407   : > { %v2894_v33 = vadd.f32 %v2890_v32, %v2820_v29  ;;  %v7321_v29 = vld [vmem:[%s9691_s11 + $0x28] ss:$16 sps:$4 sm:$0xff]   ;;  %v7332_v32 = vld [vmem:[%s9691_s11 + $0x28c] ss:$16 sps:$4 sm:$0xff]  }
 0x408   : > { %v7001_v34 = vpop.f32.mrf.mxu1 }
 0x409   : > { %v2968_v35 = vadd.f32 %v2964_v30, %v2894_v33  ;;  %v7329_v30 = vld [vmem:[%s9691_s11 + $0xc] ss:$16 sps:$4 sm:$0xff]   ;;  %v7327_v33 = vld [vmem:[%s9691_s11 + $0x8] ss:$16 sps:$4 sm:$0xff]  }
 0x40a   : > { %v7335_v34 = vld [vmem:[%s9691_s11 + $0x1ec] ss:$16 sps:$4 sm:$0xff]  }
 0x415   : > { %v3112_v36 = vpop.f32.mrf.mxu0 }
 0x417   : > { %v7058_v37 = vpop.f32.mrf.mxu0 }
 0x418   : > { %v3038_v38 = vpop.f32.mrf.mxu1  ;;  %v7333_v37 = vld [vmem:[%s9691_s11 + $0x1e8] ss:$16 sps:$4 sm:$0xff]  }
 0x419   : > { %v3042_v39 = vadd.f32 %v3038_v38, %v2968_v35  ;;  %v7330_v35 = vld [vmem:[%s9691_s11 + $0x288] ss:$16 sps:$4 sm:$0xff]   ;;  %v7341_v38 = vld [vmem:[%s9691_s11 + $0x1cc] ss:$16 sps:$4 sm:$0xff]  }
 0x41a   : > { %v7039_v41 = vpop.f32.mrf.mxu1 }
 0x41b   : > { %v3116_v42 = vadd.f32 %v3112_v36, %v3042_v39  ;;  %v7338_v36 = vld [vmem:[%s9691_s11 + $0x26c] ss:$16 sps:$4 sm:$0xff]   ;;  %v7336_v39 = vld [vmem:[%s9691_s11 + $0x268] ss:$16 sps:$4 sm:$0xff]  }
 0x41c   : > { %v7344_v41 = vld [vmem:[%s9691_s11 + $0x24c] ss:$16 sps:$4 sm:$0xff]  }
 0x428   : > { %v3186_v44 = vpop.f32.mrf.mxu1 }
 0x429   : > { %v8858_v45 = vadd.f32 %v3186_v44, %v3116_v42  ;;  %v7339_v42 = vld [vmem:[%s9691_s11 + $0x1c8] ss:$16 sps:$4 sm:$0xff]  }
 0x42a   : > { %v7077_v46 = vpop.f32.mrf.mxu1  ;;  %v7342_v44 = vld [vmem:[%s9691_s11 + $0x248] ss:$16 sps:$4 sm:$0xff]  }
 0x42b   : > { %v7350_v46 = vld [vmem:[%s9691_s11 + $0x22c] ss:$16 sps:$4 sm:$0xff]  }
 0x436   : > { %v3444_v53 = vpop.f32.mrf.mxu0 }
 0x437   : > { %v3445_v54 = vadd.f32 %v3444_v53, %v3393_v51  ;;  %v7348_v51 = vld [vmem:[%s9691_s11 + $0x228] ss:$16 sps:$4 sm:$0xff]  }
 0x438   : > { %v3446_v55 = vpop.f32.mrf.mxu0  ;;  %v7351_v53 = vld [vmem:[%s9691_s11 + $0x188] ss:$16 sps:$4 sm:$0xff]  }
 0x439   : > { %v3492_v56 = vmax.f32 %v3445_v54, 0.0  ;;  %v3447_v57 = vadd.f32 %v3446_v55, %v3397_v52  ;;  %v7356_v52 = vld [vmem:[%s9691_s11 + $0x20c] ss:$16 sps:$4 sm:$0xff]   ;;  %v7354_v55 = vld [vmem:[%s9691_s11 + $0x208] ss:$16 sps:$4 sm:$0xff]  }
 0x43a   : > { %v3448_v58 = vpop.f32.mrf.mxu0  ;;  %v7359_v54 = vld [vmem:[%s9691_s11 + $0x16c] ss:$16 sps:$4 sm:$0xff]  }
 0x43b   : > { %v3493_v59 = vmax.f32 %v3447_v57, 0.0  ;;  %v8869_v60 = vpack.c.bf16 %v3492_v56, %v3492_v56  ;;  %v7362_v56 = vld [vmem:[%s9691_s11 + $0x3ec] ss:$16 sps:$4 sm:$0xff]   ;;  %v7357_v57 = vld [vmem:[%s9691_s11 + $0x168] ss:$16 sps:$4 sm:$0xff]  }
 0x43c   : > { %v3449_v61 = vpop.f32.mrf.mxu0  ;;  %v7365_v58 = vld [vmem:[%s9691_s11 + $0x14c] ss:$16 sps:$4 sm:$0xff]  }
 0x43d   : > { %v3497_v62 = vpack.c.bf16 %v3493_v59, %v3493_v59  ;;  %v7360_v59 = vld [vmem:[%s9691_s11 + $0x3e8] ss:$16 sps:$4 sm:$0xff]   ;;  %v7368_v61 = vld [vmem:[%s9691_s11 + $0x3cc] ss:$16 sps:$4 sm:$0xff]  }
 0x43f   : > { %4322 = vmatprep.mubr.bf16.mxu0 %v3497_v62 }
 0x440   : > { %4323 = vmatmul.mubr.bf16.vlgmr.msra.gmra.mxu0 %v8869_v60 }
 0x441   : > { %4373 = vmatpush1.bf16.msra.mxu0 %v7285_v21  ;;  %4404 = vmatprep.mubr.bf16.mxu0 %v3497_v62  ;;  %v7363_v62 = vld [vmem:[%s9691_s11 + $0x148] ss:$16 sps:$4 sm:$0xff]   ;;  %v7371_v21 = vld [vmem:[%s9691_s11 + $0x12c] ss:$16 sps:$4 sm:$0xff]  }
 0x442   : > { %4374 = vmatprep.subr.bf16.mxu0 %v7293_v40  ;;  %v7366_v40 = vld [vmem:[%s9691_s11 + $0x3c8] ss:$16 sps:$4 sm:$0xff]  }
 0x445   : > { %4375 = vmatpush1.bf16.msra.mxu0 %v7291_v63  ;;  %v7374_v63 = vld [vmem:[%s9691_s11 + $0x3ac] ss:$16 sps:$4 sm:$0xff]  }
 0x446   : > { %4376 = vmatprep.subr.bf16.mxu0 %v7299_v2  ;;  %v7369_v2 = vld [vmem:[%s9691_s11 + $0x128] ss:$16 sps:$4 sm:$0xff]  }
 0x448   : > { %v3485_v8 = vpop.f32.mrf.mxu1 }
 0x449   : > { %v3486_v9 = vadd.f32 %v3485_v8, %v3401_v5  ;;  %4377 = vmatpush1.bf16.msra.mxu0 %v7297_v4  ;;  %v7377_v4 = vld [vmem:[%s9691_s11 + $0x10c] ss:$16 sps:$4 sm:$0xff]   ;;  %v7372_v5 = vld [vmem:[%s9691_s11 + $0x3a8] ss:$16 sps:$4 sm:$0xff]   ;;  %v7395_v8 = vld [vmem:[%s9694_s14 + $0xe4] ss:$16 sps:$4 sm:$0xff]  }
 0x44a   : > { %v3487_v11 = vpop.f32.mrf.mxu1  ;;  %4378 = vmatprep.subr.bf16.mxu0 %v7305_v6  ;;  %v7380_v6 = vld [vmem:[%s9691_s11 + $0x38c] ss:$16 sps:$4 sm:$0xff]  }
 0x44b   : > { %v3488_v13 = vadd.f32 %v3487_v11, %v3405_v7  ;;  %v3494_v14 = vmax.f32 %v3486_v9, 0.0  ;;  %v7375_v7 = vld [vmem:[%s9691_s11 + $0x108] ss:$16 sps:$4 sm:$0xff]   ;;  %v7393_v11 = vld [vmem:[%s9694_s14 + $0xe0] ss:$16 sps:$4 sm:$0xff]  }
 0x44c   : > { %v3489_v15 = vpop.f32.mrf.mxu1  ;;  %v7378_v9 = vld [vmem:[%s9691_s11 + $0x388] ss:$16 sps:$4 sm:$0xff]  }
 0x44d   : > { %v3495_v16 = vmax.f32 %v3488_v13, 0.0  ;;  %4379 = vmatpush1.bf16.msra.mxu0 %v7303_v10  ;;  %v8911_v23 = vpack.c.bf16 %v3494_v14, %v3494_v14  ;;  %v7383_v10 = vld [vmem:[%s9691_s11 + $0x36c] ss:$16 sps:$4 sm:$0xff]   ;;  %v7381_v13 = vld [vmem:[%s9691_s11 + $0x368] ss:$16 sps:$4 sm:$0xff]  }
 0x44e   : > { %v3490_v18 = vpop.f32.mrf.mxu1  ;;  %4380 = vmatprep.subr.bf16.mxu0 %v7311_v12  ;;  %v7398_v12 = vld [vmem:[%s9694_s14 + $0xc4] ss:$16 sps:$4 sm:$0xff]   ;;  %v7386_v14 = vld [vmem:[%s9691_s11 + $0x34c] ss:$16 sps:$4 sm:$0xff]   ;;  %v7396_v15 = vld [vmem:[%s9694_s14 + $0xc0] ss:$16 sps:$4 sm:$0xff]  }
 0x44f   : > { %v3499_v20 = vpack.c.bf16 %v3495_v16, %v3495_v16  ;;  %v7401_v16 = vld [vmem:[%s9694_s14 + $0xa4] ss:$16 sps:$4 sm:$0xff]   ;;  %v7399_v18 = vld [vmem:[%s9694_s14 + $0xa0] ss:$16 sps:$4 sm:$0xff]  }
 0x451   : > { %4381 = vmatpush1.bf16.msra.mxu0 %v7309_v17  ;;  %4363 = vmatprep.mubr.bf16.mxu1 %v3499_v20  ;;  %v7389_v17 = vld [vmem:[%s9691_s11 + $0x32c] ss:$16 sps:$4 sm:$0xff]  }
 0x452   : > { %4364 = vmatmul.mubr.bf16.vlgmr.msra.gmra.mxu1 %v8911_v23  ;;  %4382 = vmatprep.subr.bf16.mxu0 %v7317_v19  ;;  %v7404_v19 = vld [vmem:[%s9694_s14 + $0x84] ss:$16 sps:$4 sm:$0xff]  }
 0x453   : > { %4414 = vmatpush1.bf16.msra.mxu1 %v7312_v22  ;;  %4445 = vmatprep.mubr.bf16.mxu1 %v3499_v20  ;;  %v7387_v20 = vld [vmem:[%s9691_s11 + $0x328] ss:$16 sps:$4 sm:$0xff]   ;;  %v7392_v22 = vld [vmem:[%s9691_s11 + $0x30c] ss:$16 sps:$4 sm:$0xff]  }
 0x454   : > { %4415 = vmatprep.subr.bf16.mxu1 %v7320_v24  ;;  %v7402_v24 = vld [vmem:[%s9694_s14 + $0x80] ss:$16 sps:$4 sm:$0xff]  }
 0x455   : > { %4383 = vmatpush1.bf16.msra.mxu0 %v7315_v25  ;;  %v7407_v25 = vld [vmem:[%s9694_s14 + $0x64] ss:$16 sps:$4 sm:$0xff]  }
 0x456   : > { %4384 = vmatprep.subr.bf16.mxu0 %v7323_v26  ;;  %v7390_v26 = vld [vmem:[%s9691_s11 + $0x308] ss:$16 sps:$4 sm:$0xff]  }
 0x457   : > { %4416 = vmatpush1.bf16.msra.mxu1 %v7318_v27  ;;  %v7405_v27 = vld [vmem:[%s9694_s14 + $0x60] ss:$16 sps:$4 sm:$0xff]  }
 0x458   : > { %4417 = vmatprep.subr.bf16.mxu1 %v7326_v28  ;;  %v7410_v28 = vld [vmem:[%s9694_s14 + $0x44] ss:$16 sps:$4 sm:$0xff]  }
 0x459   : > { %4385 = vmatpush1.bf16.msra.mxu0 %v7321_v29  ;;  %v7408_v29 = vld [vmem:[%s9694_s14 + $0x40] ss:$16 sps:$4 sm:$0xff]  }
 0x45a   : > { %4386 = vmatprep.subr.bf16.mxu0 %v7329_v30  ;;  %v7413_v30 = vld [vmem:[%s9694_s14 + $0x24] ss:$16 sps:$4 sm:$0xff]  }
 0x45b   : > { %4418 = vmatpush1.bf16.msra.mxu1 %v7324_v31  ;;  %v7411_v31 = vld [vmem:[%s9694_s14 + $0x20] ss:$16 sps:$4 sm:$0xff]  }
 0x45c   : > { %4419 = vmatprep.subr.bf16.mxu1 %v7332_v32  ;;  %v7416_v32 = vld [vmem:[%s9694_s14 + $0x4] ss:$16 sps:$4 sm:$0xff]  }
 0x45d   : > { %4387 = vmatpush1.bf16.msra.mxu0 %v7327_v33  ;;  %v7443_v33 = vld [vmem:[%s9694_s14 + $0x2e4] ss:$16 sps:$4 sm:$0xff]  }
 0x45e   : > { %4388 = vmatprep.subr.bf16.mxu0 %v7335_v34  ;;  %v7414_v34 = vld [vmem:[%s9694_s14] ss:$16 sps:$4 sm:$0xff]  }
 0x45f   : > { %4420 = vmatpush1.bf16.msra.mxu1 %v7330_v35  ;;  %v7419_v35 = vld [vmem:[%s9694_s14 + $0x1e4] ss:$16 sps:$4 sm:$0xff]  }
 0x460   : > { %4421 = vmatprep.subr.bf16.mxu1 %v7338_v36  ;;  %v7447_v36 = vld [vmem:[%s9694_s14 + $0x2c0] ss:$16 sps:$4 sm:$0xff]  }
 0x461   : > { %4389 = vmatpush2.bf16.msra.mxu0 %v7333_v37  ;;  %v7449_v37 = vld [vmem:[%s9694_s14 + $0x2c4] ss:$16 sps:$4 sm:$0xff]  }
 0x462   : > { %4390 = vmatprep.subr.bf16.mxu0 %v7341_v38  ;;  %v7417_v38 = vld [vmem:[%s9694_s14 + $0x1e0] ss:$16 sps:$4 sm:$0xff]  }
 0x463   : > { %4422 = vmatpush1.bf16.msra.mxu1 %v7336_v39  ;;  %v7422_v39 = vld [vmem:[%s9694_s14 + $0x1c4] ss:$16 sps:$4 sm:$0xff]  }
 0x464   : > { %4423 = vmatprep.subr.bf16.mxu1 %v7344_v41  ;;  %v7453_v41 = vld [vmem:[%s9694_s14 + $0x2a0] ss:$16 sps:$4 sm:$0xff]  }
 0x465   : > { %4391 = vmatpush2.bf16.msra.mxu0 %v7339_v42  ;;  %v7455_v42 = vld [vmem:[%s9694_s14 + $0x2a4] ss:$16 sps:$4 sm:$0xff]  }
 0x466   : > { %4392 = vmatprep.subr.bf16.mxu0 %v7347_v43  ;;  %v7420_v43 = vld [vmem:[%s9694_s14 + $0x1c0] ss:$16 sps:$4 sm:$0xff]  }
 0x467   : > { %4424 = vmatpush1.bf16.msra.mxu1 %v7342_v44  ;;  %v7425_v44 = vld [vmem:[%s9694_s14 + $0x1a4] ss:$16 sps:$4 sm:$0xff]  }
 0x468   : > { %4425 = vmatprep.subr.bf16.mxu1 %v7350_v46  ;;  %v7459_v46 = vld [vmem:[%s9694_s14 + $0x280] ss:$16 sps:$4 sm:$0xff]  }
 0x469   : > { %4393 = vmatpush2.bf16.msra.mxu0 %v7345_v47  ;;  %v7461_v47 = vld [vmem:[%s9694_s14 + $0x284] ss:$16 sps:$4 sm:$0xff]  }
 0x46a   : > { %4394 = vmatprep.subr.bf16.mxu0 %v7353_v49  ;;  %v7423_v49 = vld [vmem:[%s9694_s14 + $0x1a0] ss:$16 sps:$4 sm:$0xff]  }
 0x46b   : > { %4426 = vmatpush1.bf16.msra.mxu1 %v7348_v51  ;;  %v7428_v51 = vld [vmem:[%s9694_s14 + $0x184] ss:$16 sps:$4 sm:$0xff]  }
 0x46c   : > { %4427 = vmatprep.subr.bf16.mxu1 %v7356_v52  ;;  %v7465_v52 = vld [vmem:[%s9694_s14 + $0x260] ss:$16 sps:$4 sm:$0xff]  }
 0x46d   : > { %4395 = vmatpush2.bf16.msra.mxu0 %v7351_v53  ;;  %v7467_v53 = vld [vmem:[%s9694_s14 + $0x264] ss:$16 sps:$4 sm:$0xff]  }
 0x46e   : > { %4396 = vmatprep.subr.bf16.mxu0 %v7359_v54  ;;  %v7426_v54 = vld [vmem:[%s9694_s14 + $0x180] ss:$16 sps:$4 sm:$0xff]  }
 0x46f   : > { %4428 = vmatpush1.bf16.msra.mxu1 %v7354_v55  ;;  %v7431_v55 = vld [vmem:[%s9694_s14 + $0x164] ss:$16 sps:$4 sm:$0xff]  }
 0x470   : > { %4429 = vmatprep.subr.bf16.mxu1 %v7362_v56  ;;  %v7471_v56 = vld [vmem:[%s9694_s14 + $0x240] ss:$16 sps:$4 sm:$0xff]  }
 0x471   : > { %4397 = vmatpush2.bf16.msra.mxu0 %v7357_v57  ;;  %v7473_v57 = vld [vmem:[%s9694_s14 + $0x244] ss:$16 sps:$4 sm:$0xff]  }
 0x472   : > { %4398 = vmatprep.subr.bf16.mxu0 %v7365_v58  ;;  %v7429_v58 = vld [vmem:[%s9694_s14 + $0x160] ss:$16 sps:$4 sm:$0xff]  }
 0x473   : > { %4430 = vmatpush2.bf16.msra.mxu1 %v7360_v59  ;;  %v7434_v59 = vld [vmem:[%s9694_s14 + $0x144] ss:$16 sps:$4 sm:$0xff]  }
 0x474   : > { %4431 = vmatprep.subr.bf16.mxu1 %v7368_v61  ;;  %v7477_v61 = vld [vmem:[%s9694_s14 + $0x220] ss:$16 sps:$4 sm:$0xff]  }
 0x475   : > { %4399 = vmatpush2.bf16.msra.mxu0 %v7363_v62  ;;  %v7479_v62 = vld [vmem:[%s9694_s14 + $0x224] ss:$16 sps:$4 sm:$0xff]  }
 0x476   : > { %4400 = vmatprep.subr.bf16.mxu0 %v7371_v21  ;;  %v7432_v21 = vld [vmem:[%s9694_s14 + $0x140] ss:$16 sps:$4 sm:$0xff]  }
 0x477   : > { %4432 = vmatpush2.bf16.msra.mxu1 %v7366_v40  ;;  %v7437_v40 = vld [vmem:[%s9694_s14 + $0x124] ss:$16 sps:$4 sm:$0xff]  }
 0x478   : > { %4433 = vmatprep.subr.bf16.mxu1 %v7374_v63  ;;  %v7483_v63 = vld [vmem:[%s9694_s14 + $0x200] ss:$16 sps:$4 sm:$0xff]  }
 0x479   : > { %4401 = vmatpush2.bf16.msra.mxu0 %v7369_v2  ;;  %v7485_v2 = vld [vmem:[%s9694_s14 + $0x204] ss:$16 sps:$4 sm:$0xff]  }
 0x47a   : > { %4402 = vmatprep.subr.bf16.mxu0 %v7377_v4  ;;  %v7435_v4 = vld [vmem:[%s9694_s14 + $0x120] ss:$16 sps:$4 sm:$0xff]  }
 0x47b   : > { %4434 = vmatpush2.bf16.msra.mxu1 %v7372_v5  ;;  %v7440_v5 = vld [vmem:[%s9694_s14 + $0x104] ss:$16 sps:$4 sm:$0xff]  }
 0x47c   : > { %4435 = vmatprep.subr.bf16.mxu1 %v7380_v6  ;;  %v7489_v6 = vld [vmem:[%s9694_s14 + $0x3e0] ss:$16 sps:$4 sm:$0xff]  }
 0x47d   : > { %4403 = vmatpush2.bf16.msra.mxu0 %v7375_v7  ;;  %v7491_v7 = vld [vmem:[%s9694_s14 + $0x3e4] ss:$16 sps:$4 sm:$0xff]  }
 0x47e   : > { %5242 = vmatprep.subr.bf16.mxu0 %v7395_v8  ;;  %v7438_v8 = vld [vmem:[%s9694_s14 + $0x100] ss:$16 sps:$4 sm:$0xff]  }
 0x47f   : > { %4436 = vmatpush2.bf16.msra.mxu1 %v7378_v9  ;;  %v7446_v9 = vld [vmem:[%s9694_s14 + $0xec] ss:$16 sps:$4 sm:$0xff]  }
 0x480   : > { %4405 = vmatmul.mubr.bf16.vlgmr.msra.gmra.mxu0 %v8869_v60  ;;  %4437 = vmatprep.subr.bf16.mxu1 %v7383_v10  ;;  %v7384_v60 = vld [vmem:[%s9691_s11 + $0x348] ss:$16 sps:$4 sm:$0xff]   ;;  %v7495_v10 = vld [vmem:[%s9694_s14 + $0x3c0] ss:$16 sps:$4 sm:$0xff]  }
 0x481   : > { %5243 = vmatpush1.bf16.msra.mxu0 %v7393_v11  ;;  %v7497_v11 = vld [vmem:[%s9694_s14 + $0x3c4] ss:$16 sps:$4 sm:$0xff]  }
 0x482   : > { %5244 = vmatprep.subr.bf16.mxu0 %v7398_v12  ;;  %v7503_v12 = vld [vmem:[%s9694_s14 + $0x3a4] ss:$16 sps:$4 sm:$0xff]  }
 0x483   : > { %4438 = vmatpush2.bf16.msra.mxu1 %v7381_v13  ;;  %v7501_v13 = vld [vmem:[%s9694_s14 + $0x3a0] ss:$16 sps:$4 sm:$0xff]  }
 0x484   : > { %4439 = vmatprep.subr.bf16.mxu1 %v7386_v14  ;;  %v7509_v14 = vld [vmem:[%s9694_s14 + $0x384] ss:$16 sps:$4 sm:$0xff]  }
 0x485   : > { %5245 = vmatpush1.bf16.msra.mxu0 %v7396_v15  ;;  %v7507_v15 = vld [vmem:[%s9694_s14 + $0x380] ss:$16 sps:$4 sm:$0xff]  }
 0x486   : > { %5246 = vmatprep.subr.bf16.mxu0 %v7401_v16  ;;  %v7513_v16 = vld [vmem:[%s9694_s14 + $0x360] ss:$16 sps:$4 sm:$0xff]  }
 0x487   : > { %4440 = vmatpush2.bf16.msra.mxu1 %v7384_v60  ;;  %v7515_v60 = vld [vmem:[%s9694_s14 + $0x364] ss:$16 sps:$4 sm:$0xff]  }
 0x488   : > { %4441 = vmatprep.subr.bf16.mxu1 %v7389_v17  ;;  %v7519_v17 = vld [vmem:[%s9694_s14 + $0x340] ss:$16 sps:$4 sm:$0xff]  }
 0x489   : > { %5247 = vmatpush1.bf16.msra.mxu0 %v7399_v18  ;;  %v7521_v18 = vld [vmem:[%s9694_s14 + $0x344] ss:$16 sps:$4 sm:$0xff]  }
 0x48a   : > { %5248 = vmatprep.subr.bf16.mxu0 %v7404_v19  ;;  %v7525_v19 = vld [vmem:[%s9694_s14 + $0x320] ss:$16 sps:$4 sm:$0xff]  }
 0x48b   : > { %4442 = vmatpush2.bf16.msra.mxu1 %v7387_v20  ;;  %v7527_v20 = vld [vmem:[%s9694_s14 + $0x324] ss:$16 sps:$4 sm:$0xff]  }
 0x48c   : > { %4443 = vmatprep.subr.bf16.mxu1 %v7392_v22  ;;  %v7533_v22 = vld [vmem:[%s9694_s14 + $0x304] ss:$16 sps:$4 sm:$0xff]  }
 0x48d   : > { %5249 = vmatpush1.bf16.msra.mxu0 %v7402_v24  ;;  %v7531_v24 = vld [vmem:[%s9694_s14 + $0x300] ss:$16 sps:$4 sm:$0xff]  }
 0x48e   : > { %5250 = vmatprep.subr.bf16.mxu0 %v7407_v25  ;;  %v7539_v25 = vld [vmem:[%s9694_s14 + $0x2ec] ss:$16 sps:$4 sm:$0xff]  }
 0x48f   : > { %4444 = vmatpush2.bf16.msra.mxu1 %v7390_v26 }
 0x490   : > { %5283 = vmatprep.subr.bf16.mxu1 %v7443_v33 }
 0x491   : > { %5251 = vmatpush1.bf16.msra.mxu0 %v7405_v27 }
 0x492   : > { %4446 = vmatmul.mubr.bf16.vlgmr.msra.gmra.mxu1 %v8911_v23  ;;  %5252 = vmatprep.subr.bf16.mxu0 %v7410_v28  ;;  %v7441_v23 = vld [vmem:[%s9694_s14 + $0x2e0] ss:$16 sps:$4 sm:$0xff]  }
 0x493   : > { %5284 = vmatpush1.bf16.msra.mxu1 %v7441_v23 }
 0x494   : > { %5285 = vmatprep.subr.bf16.mxu1 %v7449_v37 }
 0x495   : > { %5253 = vmatpush1.bf16.msra.mxu0 %v7408_v29 }
 0x496   : > { %5254 = vmatprep.subr.bf16.mxu0 %v7413_v30  ;;  %v9270_v30 = vld [vmem:[%s9692_s12] sm:$0xf] }
 0x497   : > { %5286 = vmatpush1.bf16.msra.mxu1 %v7447_v36 }
 0x498   : > { %5287 = vmatprep.subr.bf16.mxu1 %v7455_v42 }
 0x499   : > { %5255 = vmatpush1.bf16.msra.mxu0 %v7411_v31  ;;  %v4273_v31 = vrot.slane %v9270_v30, %v8860_v48 }
 0x49a   : > { %5256 = vmatprep.subr.bf16.mxu0 %v7416_v32  ;;  %v4277_v32 = vrot.slane %v9270_v30, %v8865_v50 }
 0x49b   : > { %5288 = vmatpush1.bf16.msra.mxu1 %v7453_v41  ;;  %v7444_v41 = vld [vmem:[%s9694_s14 + $0xe8] ss:$16 sps:$4 sm:$0xff]  }
 0x49c   : > { %5289 = vmatprep.subr.bf16.mxu1 %v7461_v47  ;;  %v7458_v47 = vld [vmem:[%s9694_s14 + $0xac] ss:$16 sps:$4 sm:$0xff]  }
 0x49d   : > { %5257 = vmatpush1.bf16.msra.mxu0 %v7414_v34 }
 0x49e   : > { %5258 = vmatprep.subr.bf16.mxu0 %v7419_v35 }
 0x49f   : > { %5290 = vmatpush1.bf16.msra.mxu1 %v7459_v46  ;;  %v7450_v46 = vld [vmem:[%s9694_s14 + $0xc8] ss:$16 sps:$4 sm:$0xff]  }
 0x4a0   : > { %5291 = vmatprep.subr.bf16.mxu1 %v7467_v53  ;;  %v7470_v53 = vld [vmem:[%s9694_s14 + $0x6c] ss:$16 sps:$4 sm:$0xff]  }
 0x4a1   : > { %5259 = vmatpush2.bf16.msra.mxu0 %v7417_v38 }
 0x4a2   : > { %5260 = vmatprep.subr.bf16.mxu0 %v7422_v39 }
 0x4a3   : > { %5292 = vmatpush1.bf16.msra.mxu1 %v7465_v52  ;;  %v7462_v52 = vld [vmem:[%s9694_s14 + $0x88] ss:$16 sps:$4 sm:$0xff]  }
 0x4a4   : > { %5293 = vmatprep.subr.bf16.mxu1 %v7473_v57  ;;  %v7482_v57 = vld [vmem:[%s9694_s14 + $0x2c] ss:$16 sps:$4 sm:$0xff]  }
 0x4a5   : > { %5261 = vmatpush2.bf16.msra.mxu0 %v7420_v43 }
 0x4a6   : > { %5262 = vmatprep.subr.bf16.mxu0 %v7425_v44  ;;  %v7452_v44 = vld [vmem:[%s9694_s14 + $0xcc] ss:$16 sps:$4 sm:$0xff]  }
 0x4a7   : > { %5294 = vmatpush1.bf16.msra.mxu1 %v7471_v56  ;;  %v7474_v56 = vld [vmem:[%s9694_s14 + $0x48] ss:$16 sps:$4 sm:$0xff]  }
 0x4a8   : > { %5295 = vmatprep.subr.bf16.mxu1 %v7479_v62  ;;  %v7494_v62 = vld [vmem:[%s9694_s14 + $0x1ec] ss:$16 sps:$4 sm:$0xff]  }
 0x4a9   : > { %5263 = vmatpush2.bf16.msra.mxu0 %v7423_v49  ;;  %v7456_v49 = vld [vmem:[%s9694_s14 + $0xa8] ss:$16 sps:$4 sm:$0xff]  }
 0x4aa   : > { %5264 = vmatprep.subr.bf16.mxu0 %v7428_v51  ;;  %v7464_v51 = vld [vmem:[%s9694_s14 + $0x8c] ss:$16 sps:$4 sm:$0xff]  }
 0x4ab   : > { %5296 = vmatpush1.bf16.msra.mxu1 %v7477_v61  ;;  %v7486_v61 = vld [vmem:[%s9694_s14 + $0x8] ss:$16 sps:$4 sm:$0xff]  }
 0x4ac   : > { %5297 = vmatprep.subr.bf16.mxu1 %v7485_v2  ;;  %v7506_v2 = vld [vmem:[%s9694_s14 + $0x1ac] ss:$16 sps:$4 sm:$0xff]  }
 0x4ad   : > { %5265 = vmatpush2.bf16.msra.mxu0 %v7426_v54  ;;  %v7468_v54 = vld [vmem:[%s9694_s14 + $0x68] ss:$16 sps:$4 sm:$0xff]  }
 0x4ae   : > { %5266 = vmatprep.subr.bf16.mxu0 %v7431_v55  ;;  %v7476_v55 = vld [vmem:[%s9694_s14 + $0x4c] ss:$16 sps:$4 sm:$0xff]  }
 0x4af   : > { %5298 = vmatpush1.bf16.msra.mxu1 %v7483_v63  ;;  %v7498_v63 = vld [vmem:[%s9694_s14 + $0x1c8] ss:$16 sps:$4 sm:$0xff]  }
 0x4b0   : > { %5299 = vmatprep.subr.bf16.mxu1 %v7491_v7 }
 0x4b1   : > { %5267 = vmatpush2.bf16.msra.mxu0 %v7429_v58  ;;  %v7480_v58 = vld [vmem:[%s9694_s14 + $0x28] ss:$16 sps:$4 sm:$0xff]  }
 0x4b2   : > { %5268 = vmatprep.subr.bf16.mxu0 %v7434_v59  ;;  %v7488_v59 = vld [vmem:[%s9694_s14 + $0xc] ss:$16 sps:$4 sm:$0xff]  }
 0x4b3   : > { %5300 = vmatpush2.bf16.msra.mxu1 %v7489_v6  ;;  %v7512_v6 = vld [vmem:[%s9694_s14 + $0x18c] ss:$16 sps:$4 sm:$0xff]  }
 0x4b4   : > { %5301 = vmatprep.subr.bf16.mxu1 %v7497_v11 }
 0x4b5   : > { %5269 = vmatpush2.bf16.msra.mxu0 %v7432_v21  ;;  %v7492_v21 = vld [vmem:[%s9694_s14 + $0x1e8] ss:$16 sps:$4 sm:$0xff]  }
 0x4b6   : > { %5270 = vmatprep.subr.bf16.mxu0 %v7437_v40  ;;  %v7500_v40 = vld [vmem:[%s9694_s14 + $0x1cc] ss:$16 sps:$4 sm:$0xff]  }
 0x4b7   : > { %5302 = vmatpush2.bf16.msra.mxu1 %v7495_v10  ;;  %v7518_v10 = vld [vmem:[%s9694_s14 + $0x16c] ss:$16 sps:$4 sm:$0xff]  }
 0x4b8   : > { %5303 = vmatprep.subr.bf16.mxu1 %v7503_v12  ;;  %v7516_v12 = vld [vmem:[%s9694_s14 + $0x168] ss:$16 sps:$4 sm:$0xff]  }
 0x4b9   : > { %5271 = vmatpush2.bf16.msra.mxu0 %v7435_v4  ;;  %v7504_v4 = vld [vmem:[%s9694_s14 + $0x1a8] ss:$16 sps:$4 sm:$0xff]  }
 0x4ba   : > { %5272 = vmatprep.subr.bf16.mxu0 %v7440_v5 }
 0x4bb   : > { %5304 = vmatpush2.bf16.msra.mxu1 %v7501_v13  ;;  %v7524_v13 = vld [vmem:[%s9694_s14 + $0x14c] ss:$16 sps:$4 sm:$0xff]  }
 0x4bc   : > { %5305 = vmatprep.subr.bf16.mxu1 %v7509_v14  ;;  %v7522_v14 = vld [vmem:[%s9694_s14 + $0x148] ss:$16 sps:$4 sm:$0xff]  }
 0x4bd   : > { %5273 = vmatpush2.bf16.msra.mxu0 %v7438_v8  ;;  %v7510_v8 = vld [vmem:[%s9694_s14 + $0x188] ss:$16 sps:$4 sm:$0xff]  }
 0x4be   : > { %5324 = vmatprep.subr.bf16.mxu0 %v7446_v9 }
 0x4bf   : > { %5306 = vmatpush2.bf16.msra.mxu1 %v7507_v15  ;;  %v7530_v15 = vld [vmem:[%s9694_s14 + $0x12c] ss:$16 sps:$4 sm:$0xff]  }
 0x4c0   : > { %5307 = vmatprep.subr.bf16.mxu1 %v7515_v60  ;;  %v4285_v60 = vrot.slane %v9270_v30, %v8886_v3 }
 0x4c3   : > { %5308 = vmatpush2.bf16.msra.mxu1 %v7513_v16  ;;  %v4281_v16 = vrot.slane %v9270_v30, %v8881_v0 }
 0x4c4   : > { %5309 = vmatprep.subr.bf16.mxu1 %v7521_v18  ;;  %v7536_v18 = vld [vmem:[%s9694_s14 + $0x10c] ss:$16 sps:$4 sm:$0xff]  }
 0x4c7   : > { %5310 = vmatpush2.bf16.msra.mxu1 %v7519_v17  ;;  %v7528_v17 = vld [vmem:[%s9694_s14 + $0x128] ss:$16 sps:$4 sm:$0xff]  }
 0x4c8   : > { %5311 = vmatprep.subr.bf16.mxu1 %v7527_v20 }
 0x4cb   : > { %5312 = vmatpush2.bf16.msra.mxu1 %v7525_v19 }
 0x4cc   : > { %5313 = vmatprep.subr.bf16.mxu1 %v7533_v22 }
 0x4cf   : > { %5314 = vmatpush2.bf16.msra.mxu1 %v7531_v24  ;;  %v7534_v24 = vld [vmem:[%s9694_s14 + $0x108] ss:$16 sps:$4 sm:$0xff]  }
 0x4d0   : > { %5365 = vmatprep.subr.bf16.mxu1 %v7539_v25 }
 0x500   : > { %v4324_v26 = vpop.f32.mrf.mxu0 }
 0x501   : > { %v4325_v33 = vadd.f32 %v4324_v26, %v4273_v31  ;;  %v7537_v31 = vld [vmem:[%s9694_s14 + $0x2e8] ss:$16 sps:$4 sm:$0xff]  }
 0x502   : > { %v4326_v27 = vpop.f32.mrf.mxu0 }
 0x503   : > { %v4327_v34 = vadd.f32 %v4326_v27, %v4277_v32  ;;  %v7542_v27 = vld [vmem:[%s9693_s13 + $0x64] ss:$16 sps:$4 sm:$0xff]  }
 0x504   : > { %v4328_v28 = vpop.f32.mrf.mxu0 }
 0x506   : > { %v4329_v29 = vpop.f32.mrf.mxu0 }
 0x512   : > { %v4365_v23 = vpop.f32.mrf.mxu1 }
 0x513   : > { %v4366_v35 = vadd.f32 %v4365_v23, %v4325_v33  ;;  %v7540_v23 = vld [vmem:[%s9693_s13 + $0x60] ss:$16 sps:$4 sm:$0xff]  }
 0x514   : > { %v4367_v36 = vpop.f32.mrf.mxu1 }
 0x515   : > { %v4368_v37 = vadd.f32 %v4367_v36, %v4327_v34  ;;  %v9279_v42 = vpack.c.bf16 %v4366_v35, %v4366_v35  ;;  %v7545_v34 = vld [vmem:[%s9694_s14 + $0x2cc] ss:$16 sps:$4 sm:$0xff]   ;;  %v7548_v35 = vld [vmem:[%s9693_s13 + $0x44] ss:$16 sps:$4 sm:$0xff]   ;;  %v7543_v36 = vld [vmem:[%s9694_s14 + $0x2c8] ss:$16 sps:$4 sm:$0xff]  }
 0x516   : > { %v4369_v38 = vpop.f32.mrf.mxu1 }
 0x517   : > { %v4455_v39 = vpack.c.bf16 %v4368_v37, %v4368_v37  ;;  %v7546_v37 = vld [vmem:[%s9693_s13 + $0x40] ss:$16 sps:$4 sm:$0xff]   ;;  %v7551_v38 = vld [vmem:[%s9694_s14 + $0x2ac] ss:$16 sps:$4 sm:$0xff]  }
 0x518   : > { %v4370_v43 = vpop.f32.mrf.mxu1 }
 0x519   : > { %5274 = vmatprep.mubr.bf16.mxu0 %v4455_v39  ;;  %v7552_v43 = vld [vmem:[%s9693_s13 + $0x20] ss:$16 sps:$4 sm:$0xff]  }
 0x51a   : > { %5275 = vmatmul.mubr.bf16.vlgmr.msra.gmra.mxu0 %v9279_v42 }
 0x51b   : > { %5325 = vmatpush1.bf16.msra.mxu0 %v7444_v41  ;;  %5356 = vmatprep.mubr.bf16.mxu0 %v4455_v39  ;;  %v7554_v39 = vld [vmem:[%s9693_s13 + $0x24] ss:$16 sps:$4 sm:$0xff]   ;;  %v3191_v41 = vld [vmem:[%s9688_s8] sm:$0x1] }
 0x51c   : > { %5326 = vmatprep.subr.bf16.mxu0 %v7452_v44  ;;  %v7557_v44 = vld [vmem:[%s9694_s14 + $0x28c] ss:$16 sps:$4 sm:$0xff]  }
 0x51f   : > { %5327 = vmatpush1.bf16.msra.mxu0 %v7450_v46  ;;  %v3192_v46 = vadd.f32 %v3191_v41, %v8858_v45  ;;  %v7563_v45 = vld [vmem:[%s9694_s14 + $0x26c] ss:$16 sps:$4 sm:$0xff]   ;;  %v7627_v41 = vld [vmem:[%s9696_s16 + $0xf0] sm:$0xff]  }
 0x520   : > { %5328 = vmatprep.subr.bf16.mxu0 %v7458_v47  ;;  %v7560_v47 = vld [vmem:[%s9693_s13 + $0x4] ss:$16 sps:$4 sm:$0xff]  }
 0x523   : > { %5329 = vmatpush1.bf16.msra.mxu0 %v7456_v49  ;;  %v7555_v49 = vld [vmem:[%s9694_s14 + $0x288] ss:$16 sps:$4 sm:$0xff]  }
 0x524   : > { %5330 = vmatprep.subr.bf16.mxu0 %v7464_v51  ;;  %v7558_v51 = vld [vmem:[%s9693_s13] ss:$16 sps:$4 sm:$0xff]  }
 0x527   : > { %5331 = vmatpush1.bf16.msra.mxu0 %v7462_v52  ;;  %v3193_v52 = vmax.f32 %v3192_v46, 0.0  ;;  %v7629_v46 = vld [vmem:[%s9696_s16 + $0xe8] sm:$0xff]  }
 0x528   : > { %5332 = vmatprep.subr.bf16.mxu0 %v7470_v53  ;;  %v7609_v53 = vld [vmem:[%s9696_s16 + $0x78] sm:$0xff]  }
 0x52b   : > { %5333 = vmatpush1.bf16.msra.mxu0 %v7468_v54  ;;  %v7561_v54 = vld [vmem:[%s9694_s14 + $0x268] ss:$16 sps:$4 sm:$0xff]  }
 0x52c   : > { %5334 = vmatprep.subr.bf16.mxu0 %v7476_v55  ;;  %v7566_v55 = vld [vmem:[%s9694_s14 + $0x24c] ss:$16 sps:$4 sm:$0xff]  }
 0x52f   : > { %5335 = vmatpush1.bf16.msra.mxu0 %v7474_v56  ;;  %v7610_v56 = vld [vmem:[%s9696_s16 + $0x38] sm:$0xff]  }
 0x530   : > { %5336 = vmatprep.subr.bf16.mxu0 %v7482_v57  ;;  %v9445_v57 = vpack.c.bf16 %v3193_v52, %v3193_v52  ;;  %v7632_v52 = vld [vmem:[%s9696_s16 + $0xa0] sm:$0xff]  }
 0x533   : > { %5337 = vmatpush1.bf16.msra.mxu0 %v7480_v58  ;;  %v7564_v58 = vld [vmem:[%s9694_s14 + $0x248] ss:$16 sps:$4 sm:$0xff]  }
 0x534   : > { %5338 = vmatprep.subr.bf16.mxu0 %v7488_v59  ;;  %v7569_v59 = vld [vmem:[%s9694_s14 + $0x22c] ss:$16 sps:$4 sm:$0xff]  }
 0x537   : > { %5339 = vmatpush1.bf16.msra.mxu0 %v7486_v61  ;;  %v7567_v61 = vld [vmem:[%s9694_s14 + $0x228] ss:$16 sps:$4 sm:$0xff]  }
 0x538   : > { %5340 = vmatprep.subr.bf16.mxu0 %v7494_v62  ;;  %v7572_v62 = vld [vmem:[%s9694_s14 + $0x20c] ss:$16 sps:$4 sm:$0xff]  }
 0x53b   : > { %5341 = vmatpush2.bf16.msra.mxu0 %v7492_v21  ;;  %v7570_v21 = vld [vmem:[%s9694_s14 + $0x208] ss:$16 sps:$4 sm:$0xff]  }
 0x53c   : > { %5342 = vmatprep.subr.bf16.mxu0 %v7500_v40  ;;  %v7575_v40 = vld [vmem:[%s9694_s14 + $0x3ec] ss:$16 sps:$4 sm:$0xff]  }
 0x53f   : > { %5343 = vmatpush2.bf16.msra.mxu0 %v7498_v63  ;;  %v7573_v63 = vld [vmem:[%s9694_s14 + $0x3e8] ss:$16 sps:$4 sm:$0xff]  }
 0x540   : > { %v4406_v5 = vpop.f32.mrf.mxu0  ;;  %5344 = vmatprep.subr.bf16.mxu0 %v7506_v2  ;;  %v7578_v2 = vld [vmem:[%s9694_s14 + $0x3cc] ss:$16 sps:$4 sm:$0xff]  }
 0x541   : > { %v4407_v19 = vadd.f32 %v4406_v5, %v4281_v16  ;;  %v7581_v5 = vld [vmem:[%s9694_s14 + $0x3ac] ss:$16 sps:$4 sm:$0xff]   ;;  %v7594_v16 = vld [vmem:[%s9694_s14 + $0x308] ss:$16 sps:$4 sm:$0xff]  }
 0x542   : > { %v4408_v7 = vpop.f32.mrf.mxu0 }
 0x543   : > { %5345 = vmatpush2.bf16.msra.mxu0 %v7504_v4  ;;  %v4409_v22 = vadd.f32 %v4408_v7, %v4285_v60  ;;  %v7576_v4 = vld [vmem:[%s9694_s14 + $0x3c8] ss:$16 sps:$4 sm:$0xff]   ;;  %v7584_v7 = vld [vmem:[%s9694_s14 + $0x38c] ss:$16 sps:$4 sm:$0xff]  }
 0x544   : > { %v4410_v9 = vpop.f32.mrf.mxu0  ;;  %5346 = vmatprep.subr.bf16.mxu0 %v7512_v6  ;;  %v7579_v6 = vld [vmem:[%s9694_s14 + $0x3a8] ss:$16 sps:$4 sm:$0xff]   ;;  %v7599_v60 = vld [vmem:[%s9693_s13 + $0x6c] ss:$16 sps:$4 sm:$0xff]  }
 0x545   : > { %v7587_v9 = vld [vmem:[%s9694_s14 + $0x36c] ss:$16 sps:$4 sm:$0xff]  }
 0x546   : > { %v4411_v11 = vpop.f32.mrf.mxu0 }
 0x547   : > { %5347 = vmatpush2.bf16.msra.mxu0 %v7510_v8  ;;  %v7582_v8 = vld [vmem:[%s9694_s14 + $0x388] ss:$16 sps:$4 sm:$0xff]   ;;  %v7590_v11 = vld [vmem:[%s9694_s14 + $0x34c] ss:$16 sps:$4 sm:$0xff]  }
 0x548   : > { %5348 = vmatprep.subr.bf16.mxu0 %v7518_v10  ;;  %v7585_v10 = vld [vmem:[%s9694_s14 + $0x368] ss:$16 sps:$4 sm:$0xff]  }
 0x54b   : > { %5349 = vmatpush2.bf16.msra.mxu0 %v7516_v12  ;;  %v7588_v12 = vld [vmem:[%s9694_s14 + $0x348] ss:$16 sps:$4 sm:$0xff]  }
 0x54c   : > { %5350 = vmatprep.subr.bf16.mxu0 %v7524_v13  ;;  %v7593_v13 = vld [vmem:[%s9694_s14 + $0x32c] ss:$16 sps:$4 sm:$0xff]  }
 0x54f   : > { %5351 = vmatpush2.bf16.msra.mxu0 %v7522_v14  ;;  %v7591_v14 = vld [vmem:[%s9694_s14 + $0x328] ss:$16 sps:$4 sm:$0xff]  }
 0x550   : > { %5352 = vmatprep.subr.bf16.mxu0 %v7530_v15  ;;  %v7596_v15 = vld [vmem:[%s9694_s14 + $0x30c] ss:$16 sps:$4 sm:$0xff]  }
 0x552   : > { %v4447_v20 = vpop.f32.mrf.mxu1 }
 0x553   : > { %5353 = vmatpush2.bf16.msra.mxu0 %v7528_v17  ;;  %v4448_v25 = vadd.f32 %v4447_v20, %v4407_v19  ;;  %v7597_v17 = vld [vmem:[%s9693_s13 + $0x68] ss:$16 sps:$4 sm:$0xff]   ;;  %v7611_v19 = vld [vmem:[%s9696_s16 + $0x70] sm:$0xff]  }
 0x554   : > { %v4449_v26 = vpop.f32.mrf.mxu1  ;;  %5354 = vmatprep.subr.bf16.mxu0 %v7536_v18  ;;  %v7602_v18 = vld [vmem:[%s9693_s13 + $0x4c] ss:$16 sps:$4 sm:$0xff]   ;;  %v7612_v20 = vld [vmem:[%s9696_s16 + $0x30] sm:$0xff]  }
 0x555   : > { %v4450_v28 = vadd.f32 %v4449_v26, %v4409_v22  ;;  %v9382_v32 = vpack.c.bf16 %v4448_v25, %v4448_v25  ;;  %v7600_v22 = vld [vmem:[%s9693_s13 + $0x48] ss:$16 sps:$4 sm:$0xff]  }
 0x556   : > { %v4451_v29 = vpop.f32.mrf.mxu1  ;;  %v7613_v25 = vld [vmem:[%s9696_s16 + $0x68] sm:$0xff]  }
 0x557   : > { %v4457_v30 = vpack.c.bf16 %v4450_v28, %v4450_v28  ;;  %5355 = vmatpush2.bf16.msra.mxu0 %v7534_v24  ;;  %v7605_v24 = vld [vmem:[%s9693_s13 + $0x2c] ss:$16 sps:$4 sm:$0xff]   ;;  %v7615_v28 = vld [vmem:[%s9696_s16 + $0x60] sm:$0xff]  }
 0x558   : > { %v4452_v33 = vpop.f32.mrf.mxu1  ;;  %5497 = vmatprep.subr.bf16.mxu0 %v7542_v27  ;;  %v7614_v26 = vld [vmem:[%s9696_s16 + $0x28] sm:$0xff]   ;;  %v7616_v29 = vld [vmem:[%s9696_s16 + $0x20] sm:$0xff]  }
 0x559   : > { %5315 = vmatprep.mubr.bf16.mxu1 %v4457_v30  ;;  %v7608_v27 = vld [vmem:[%s9693_s13 + $0xc] ss:$16 sps:$4 sm:$0xff]   ;;  %v7619_v33 = vld [vmem:[%s9696_s16 + $0x50] sm:$0xff]  }
 0x55a   : > { %5316 = vmatmul.mubr.bf16.vlgmr.msra.gmra.mxu1 %v9382_v32  ;;  %5357 = vmatmul.mubr.bf16.vlgmr.msra.gmra.mxu0 %v9279_v42  ;;  %v7549_v42 = vld [vmem:[%s9694_s14 + $0x2a8] ss:$16 sps:$4 sm:$0xff]  }
 0x55b   : > { %5366 = vmatpush1.bf16.msra.mxu1 %v7537_v31  ;;  %5397 = vmatprep.mubr.bf16.mxu1 %v4457_v30  ;;  %v7617_v30 = vld [vmem:[%s9696_s16 + $0x58] sm:$0xff]  }
 0x55c   : > { %5498 = vmatpush1.bf16.msra.mxu0 %v7540_v23  ;;  %5367 = vmatprep.subr.bf16.mxu1 %v7545_v34  ;;  %v7606_v31 = vld [vmem:[%s9693_s13 + $0x8] ss:$16 sps:$4 sm:$0xff]   ;;  %v7620_v23 = vld [vmem:[%s9696_s16 + $0x10] sm:$0xff]  }
 0x55d   : > { %5499 = vmatprep.subr.bf16.mxu0 %v7548_v35  ;;  %5521 = vmatprep.mubr.bf16.mxu0 %v7703_v1  ;;  %v7621_v34 = vld [vmem:[%s9696_s16 + $0x48] sm:$0xff]  }
 0x55e   : > { %v7622_v35 = vld [vmem:[%s9696_s16 + $0x8] sm:$0xff]  }
 0x55f   : > { %5368 = vmatpush1.bf16.msra.mxu1 %v7543_v36  ;;  %v7623_v36 = vld [vmem:[%s9696_s16 + $0x40] sm:$0xff]  }
 0x560   : > { %5500 = vmatpush1.bf16.msra.mxu0 %v7546_v37  ;;  %5369 = vmatprep.subr.bf16.mxu1 %v7551_v38  ;;  %v7624_v37 = vld [vmem:[%s9696_s16] sm:$0xff]   ;;  %v7625_v38 = vld [vmem:[%s9696_s16 + $0xf8] sm:$0xff]  }
 0x561   : > { %5501 = vmatprep.subr.bf16.mxu0 %v7554_v39  ;;  %v7626_v39 = vld [vmem:[%s9696_s16 + $0xb8] sm:$0xff]  }
 0x563   : > { %5370 = vmatpush1.bf16.msra.mxu1 %v7549_v42  ;;  %v7628_v42 = vld [vmem:[%s9696_s16 + $0xb0] sm:$0xff]  }
 0x564   : > { %5502 = vmatpush1.bf16.msra.mxu0 %v7552_v43  ;;  %5371 = vmatprep.subr.bf16.mxu1 %v7557_v44 }
 0x565   : > { %5503 = vmatprep.subr.bf16.mxu0 %v7560_v47  ;;  %v7630_v47 = vld [vmem:[%s9696_s16 + $0xa8] sm:$0xff]  }
 0x567   : > { %5372 = vmatpush1.bf16.msra.mxu1 %v7555_v49 }
 0x568   : > { %5504 = vmatpush1.bf16.msra.mxu0 %v7558_v51  ;;  %5373 = vmatprep.subr.bf16.mxu1 %v7563_v45  ;;  %v7631_v45 = vld [vmem:[%s9696_s16 + $0xe0] sm:$0xff]  }
 0x569   : > { %6643 = vmatprep.subr.bf16.mxu0 %v7609_v53  ;;  %v7633_v53 = vld [vmem:[%s9696_s16 + $0xd8] sm:$0xff]  }
 0x56b   : > { %5374 = vmatpush1.bf16.msra.mxu1 %v7561_v54  ;;  %6415 = vmatmul.mubr.msk.bf16.vlgmr.msra.gmra.mxu0 %vm735_vm0, %v9445_v57  ;;  %v7634_v54 = vld [vmem:[%s9696_s16 + $0x98] sm:$0xff]  }
 0x56c   : > { %5375 = vmatprep.subr.bf16.mxu1 %v7566_v55  ;;  %6644 = vmatpush3.bf16.msra.mxu0 %v7610_v56  ;;  %v7635_v55 = vld [vmem:[%s9696_s16 + $0xd0] sm:$0xff]  }
 0x56d   : > { %6645 = vmatprep.subr.bf16.mxu0 %v7611_v19  ;;  %v7636_v56 = vld [vmem:[%s9696_s16 + $0x90] sm:$0xff]  }
 0x56f   : > { %5376 = vmatpush1.bf16.msra.mxu1 %v7564_v58  ;;  %v7638_v58 = vld [vmem:[%s9696_s16 + $0x88] sm:$0xff]  }
 0x570   : > { %5377 = vmatprep.subr.bf16.mxu1 %v7569_v59  ;;  %6646 = vmatpush3.bf16.msra.mxu0 %v7612_v20  ;;  %v7639_v59 = vld [vmem:[%s9696_s16 + $0xc0] sm:$0xff]  }
 0x571   : > { %6647 = vmatprep.subr.bf16.mxu0 %v7613_v25 }
 0x573   : > { %5378 = vmatpush1.bf16.msra.mxu1 %v7567_v61  ;;  %v7640_v61 = vld [vmem:[%s9696_s16 + $0x80] sm:$0xff]  }
 0x574   : > { %5379 = vmatprep.subr.bf16.mxu1 %v7572_v62  ;;  %6648 = vmatpush3.bf16.msra.mxu0 %v7614_v26 }
 0x575   : > { %6649 = vmatprep.subr.bf16.mxu0 %v7615_v28 }
 0x577   : > { %5380 = vmatpush1.bf16.msra.mxu1 %v7570_v21 }
 0x578   : > { %5381 = vmatprep.subr.bf16.mxu1 %v7575_v40  ;;  %6650 = vmatpush3.bf16.msra.mxu0 %v7616_v29 }
 0x579   : > { %6651 = vmatprep.subr.bf16.mxu0 %v7617_v30 }
 0x57b   : > { %5382 = vmatpush2.bf16.msra.mxu1 %v7573_v63 }
 0x57c   : > { %5383 = vmatprep.subr.bf16.mxu1 %v7578_v2 }
 0x57f   : > { %5384 = vmatpush2.bf16.msra.mxu1 %v7576_v4 }
 0x580   : > { %5385 = vmatprep.subr.bf16.mxu1 %v7581_v5 }
 0x583   : > { %5386 = vmatpush2.bf16.msra.mxu1 %v7579_v6 }
 0x584   : > { %5387 = vmatprep.subr.bf16.mxu1 %v7584_v7  ;;  %v5571_v7 = vld [vmem:[%s9695_s15] sm:$0xf] }
 0x585   : > { %v5584_v28 = vrot.slane %v5571_v7, %v8881_v0 }
 0x587   : > { %5388 = vmatpush2.bf16.msra.mxu1 %v7582_v8 }
 0x588   : > { %5389 = vmatprep.subr.bf16.mxu1 %v7587_v9  ;;  %v5576_v9 = vrot.slane %v5571_v7, %v8860_v48 }
 0x58b   : > { %5390 = vmatpush2.bf16.msra.mxu1 %v7585_v10 }
 0x58c   : > { %5391 = vmatprep.subr.bf16.mxu1 %v7590_v11 }
 0x58f   : > { %5392 = vmatpush2.bf16.msra.mxu1 %v7588_v12 }
 0x590   : > { %5393 = vmatprep.subr.bf16.mxu1 %v7593_v13  ;;  %v5580_v13 = vrot.slane %v5571_v7, %v8865_v50 }
 0x593   : > { %5394 = vmatpush2.bf16.msra.mxu1 %v7591_v14 }
 0x594   : > { %5395 = vmatprep.subr.bf16.mxu1 %v7596_v15 }
 0x597   : > { %5396 = vmatpush2.bf16.msra.mxu1 %v7594_v16 }
 0x598   : > { %5538 = vmatprep.subr.bf16.mxu1 %v7599_v60 }
 0x59a   : > { %5398 = vmatmul.mubr.bf16.vlgmr.msra.gmra.mxu1 %v9382_v32  ;;  %v7618_v32 = vld [vmem:[%s9696_s16 + $0x18] sm:$0xff]  }
 0x59b   : > { %5539 = vmatpush1.bf16.msra.mxu1 %v7597_v17  ;;  %5562 = vmatprep.mubr.bf16.mxu1 %v7703_v1  ;;  %v7603_v1 = vld [vmem:[%s9693_s13 + $0x28] ss:$16 sps:$4 sm:$0xff]  }
 0x59c   : > { %5540 = vmatprep.subr.bf16.mxu1 %v7602_v18  ;;  %6652 = vmatpush3.bf16.msra.mxu0 %v7618_v32 }
 0x59d   : > { %6653 = vmatprep.subr.bf16.mxu0 %v7619_v33 }
 0x59f   : > { %5541 = vmatpush1.bf16.msra.mxu1 %v7600_v22 }
 0x5a0   : > { %5542 = vmatprep.subr.bf16.mxu1 %v7605_v24  ;;  %6654 = vmatpush3.bf16.msra.mxu0 %v7620_v23 }
 0x5a1   : > { %6655 = vmatprep.subr.bf16.mxu0 %v7621_v34 }
 0x5a3   : > { %5543 = vmatpush1.bf16.msra.mxu1 %v7603_v1 }
 0x5a4   : > { %5544 = vmatprep.subr.bf16.mxu1 %v7608_v27  ;;  %6656 = vmatpush3.bf16.msra.mxu0 %v7622_v35 }
 0x5a5   : > { %6657 = vmatprep.subr.bf16.mxu0 %v7623_v36 }
 0x5a7   : > { %5545 = vmatpush1.bf16.msra.mxu1 %v7606_v31  ;;  %v5588_v31 = vrot.slane %v5571_v7, %v8886_v3 }
 0x5a8   : > { %6658 = vmatpush3.bf16.msra.mxu0 %v7624_v37  ;;  %6665 = vmatprep.subr.bf16.mxu1 %v7625_v38 }
 0x5aa   : > { %6416 = vmatmul.mubr.msk.bf16.vlgmr.msra.gmra.mxu1 %vm735_vm0, %v9445_v57  ;;  %v7637_v57 = vld [vmem:[%s9696_s16 + $0xc8] sm:$0xff]  }
 0x5ab   : > { %6666 = vmatpush3.bf16.msra.mxu1 %v7626_v39 }
 0x5ac   : > { %6667 = vmatprep.subr.bf16.mxu1 %v7627_v41 }
 0x5af   : > { %6668 = vmatpush3.bf16.msra.mxu1 %v7628_v42 }
 0x5b0   : > { %6669 = vmatprep.subr.bf16.mxu1 %v7629_v46  ;;  %v5669_v46 = vld [vmem:[%s9697_s17] sm:$0x1] }
 0x5b3   : > { %6670 = vmatpush3.bf16.msra.mxu1 %v7630_v47 }
 0x5b4   : > { %6671 = vmatprep.subr.bf16.mxu1 %v7631_v45 }
 0x5b7   : > { %6672 = vmatpush3.bf16.msra.mxu1 %v7632_v52 }
 0x5b8   : > { %6673 = vmatprep.subr.bf16.mxu1 %v7633_v53 }
 0x5bb   : > { %6674 = vmatpush3.bf16.msra.mxu1 %v7634_v54 }
 0x5bc   : > { %6675 = vmatprep.subr.bf16.mxu1 %v7635_v55 }
 0x5bf   : > { %6676 = vmatpush3.bf16.msra.mxu1 %v7636_v56 }
 0x5c0   : > { %6677 = vmatprep.subr.bf16.mxu1 %v7637_v57 }
 0x5c3   : > { %6678 = vmatpush3.bf16.msra.mxu1 %v7638_v58 }
 0x5c4   : > { %6679 = vmatprep.subr.bf16.mxu1 %v7639_v59 }
 0x5c7   : > { %6680 = vmatpush3.bf16.msra.mxu1 %v7640_v61 }
 0x5da   : > { %v5276_v43 = vpop.f32.mrf.mxu0 }
 0x5dc   : > { %v5278_v44 = vpop.f32.mrf.mxu0 }
 0x5de   : > { %v5280_v49 = vpop.f32.mrf.mxu0 }
 0x5e0   : > { %v5281_v51 = vpop.f32.mrf.mxu0 }
 0x61a   : > { %v5317_v62 = vpop.f32.mrf.mxu1  ;;  %v5358_v21 = vpop.f32.mrf.mxu0 }
 0x61b   : > { %v5318_v8 = vadd.f32 %v5317_v62, %v5276_v43 }
 0x61c   : > { %v5319_v40 = vpop.f32.mrf.mxu1  ;;  %v5360_v63 = vpop.f32.mrf.mxu0 }
 0x61d   : > { %v5320_v11 = vadd.f32 %v5319_v40, %v5278_v44 }
 0x61e   : > { %v5321_v2 = vpop.f32.mrf.mxu1  ;;  %v5362_v4 = vpop.f32.mrf.mxu0 }
 0x620   : > { %v5322_v5 = vpop.f32.mrf.mxu1  ;;  %v5363_v6 = vpop.f32.mrf.mxu0 }
 0x62b   : > { %v5523_v10 = vpop.f32.mrf.mxu0 }
 0x62c   : > { %v5524_v12 = vadd.f32 %v5523_v10, %v5318_v8 }
 0x62d   : > { %v5525_v14 = vpop.f32.mrf.mxu0 }
 0x62e   : > { %v5593_v15 = vadd.f32 %v5576_v9, %v5524_v12  ;;  %v5526_v16 = vadd.f32 %v5525_v14, %v5320_v11 }
 0x62f   : > { %v5527_v60 = vpop.f32.mrf.mxu0 }
 0x630   : > { %v5594_v17 = vadd.f32 %v5580_v13, %v5526_v16  ;;  %v5597_v18 = vmax.f32 %v5593_v15, 0.0 }
 0x631   : > { %v5528_v19 = vpop.f32.mrf.mxu0 }
 0x632   : > { %v5598_v20 = vmax.f32 %v5594_v17, 0.0  ;;  %v5601_v24 = vpack.c.bf16 %v5597_v18, %v5597_v18 }
 0x634   : > { %v5602_v22 = vpack.c.bf16 %v5598_v20, %v5598_v20 }
 0x636   : > { %5894 = vmatprep.mubr.bf16.mxu0 %v5602_v22 }
 0x637   : > { %5895 = vmatmul.mubr.bf16.vlgmr.msra.gmra.mxu0 %v5601_v24 }
 0x65a   : > { %v5399_v25 = vpop.f32.mrf.mxu1 }
 0x65b   : > { %v5400_v27 = vadd.f32 %v5399_v25, %v5358_v21 }
 0x65c   : > { %v5401_v26 = vpop.f32.mrf.mxu1 }
 0x65d   : > { %v5402_v29 = vadd.f32 %v5401_v26, %v5360_v63 }
 0x65e   : > { %v5403_v48 = vpop.f32.mrf.mxu1 }
 0x660   : > { %v5404_v1 = vpop.f32.mrf.mxu1 }
 0x66a   : > { %v5564_v50 = vpop.f32.mrf.mxu1 }
 0x66b   : > { %v5565_v30 = vadd.f32 %v5564_v50, %v5400_v27 }
 0x66c   : > { %v5566_v32 = vpop.f32.mrf.mxu1 }
 0x66d   : > { %v5595_v33 = vadd.f32 %v5584_v28, %v5565_v30  ;;  %v5567_v23 = vadd.f32 %v5566_v32, %v5402_v29 }
 0x66e   : > { %v5568_v34 = vpop.f32.mrf.mxu1 }
 0x66f   : > { %v5596_v35 = vadd.f32 %v5588_v31, %v5567_v23  ;;  %v5599_v36 = vmax.f32 %v5595_v33, 0.0 }
 0x670   : > { %v5569_v37 = vpop.f32.mrf.mxu1 }
 0x671   : > { %v5600_v38 = vmax.f32 %v5596_v35, 0.0  ;;  %v5603_v41 = vpack.c.bf16 %v5599_v36, %v5599_v36 }
 0x673   : > { %v5604_v39 = vpack.c.bf16 %v5600_v38, %v5600_v38 }
 0x675   : > { %5934 = vmatprep.mubr.bf16.mxu1 %v5604_v39 }
 0x676   : > { %5935 = vmatmul.mubr.bf16.vlgmr.msra.gmra.mxu1 %v5603_v41 }
 0x6f7   : > { %v6659_v0 = vpop.f32.mrf.mxu0 }
 0x6f9   : > { %v6660_v42 = vpop.f32.mrf.mxu0 }
 0x6fa   : > { %v6661_v3 = vadd.f32 %v6660_v42, %v6659_v0 }
 0x6fb   : > { %v6662_v43 = vpop.f32.mrf.mxu0 }
 0x6fc   : > { %v5897_v51 = vadd.f32 %v6661_v3, %v5669_v46 }
 0x6fd   : > { %v6663_v44 = vpop.f32.mrf.mxu0 }
 0x736   : > { %v6681_v47 = vpop.f32.mrf.mxu1 }
 0x738   : > { %v6682_v49 = vpop.f32.mrf.mxu1 }
 0x739   : > { %v6683_v45 = vadd.f32 %v6682_v49, %v6681_v47 }
 0x73a   : > { %v6684_v52 = vpop.f32.mrf.mxu1 }
 0x73b   : > { %v5937_v53 = vadd.f32 %v6683_v45, %v5897_v51 }
 0x73c   : > { %v6685_v54 = vpop.f32.mrf.mxu1 }
 0x73d   : > { %5942 = vst [vmem:[%s578_s26] sm:$0x1] %v5937_v53 }
 0x73e   : > { %7654 = shalt.err (!%p7651_p3)
}
 0x73f   : > { %s7655_s1 = scalar_lea.hbm %s9645_s21, 16  ;;  %s7659_s25 = scalar_lea.hbm %s9698_s18, 32 }
 0x740   : > { %p7656_p4 = scmp.ne.s32.totalorder %s9645_s21, %s7655_s1  ;;  %p7660_p9 = scmp.lt.s32.totalorder %s9645_s21, %s9698_s18 }
 0x741   : > { %p7661_p10 = scmp.lt.s32.totalorder %s7659_s25, %s7655_s1 }
 0x742   : > { %p7657_p7 = pnand %p7656_p4, %p7840_p5 }
 0x743   : > { %p7662_p11 = por %p7661_p10, %p7660_p9 }
 0x744   : > { %p7658_p8 = pneg %p7657_p7 }
 0x746   : > { %p7663_p12 = pnand %p7662_p11, %p7658_p8 }
 0x748   : > { %7666 = shalt.err (!%p7663_p12)
}
 0x749   : > { %7078 = dma.vmem_to_hbm [thread:$0]  (%p7840_p5), %s5957_s19, 16, %s9645_s21, %s5944_s20  }
 0x74a PF: > { %p7084_p13 = scmp.ge.s32.totalorder %s7701_s30, 2  ;;  %s5968_s24 = sand.u32 1, %s7689_s27  }
 0x74b   : > { %s5969_s0 = scalar_lea.sflag [#allocation3], %s5968_s24 }
 0x74c   : > { %p7081_p0 = pnand %p7084_p13, %p7844_p6 }
 0x74e   : > { %p7082_p1 = pneg %p7081_p0 }
 0x750   : > { %7684 = dma.done.wait (%p7082_p1), %s5969_s0, 16  }
 0x751   : > { %7686 = vsyncadd (%p7082_p1), %s5969_s0, 4294967280  ;;  %s9725_s30 = sld [smem:[#allocation6_spill]]  ;;  %s9728_s27 = smov %s7693_s28 }
 0x752   : > { %s9726_s5 = sld [smem:[#allocation5_spill]] }
 0x753   : > { %s9727_s29 = sld [smem:[#allocation7_spill]] }
 0x757   : > { %p28_p2 = scmp.ge.s32.totalorder %s9725_s30, 4  }
 0x758   : > { %s9729_s28 = smov %s9726_s5 }
 0x759   :  { %30 = sbr.rel (!%p28_p2) target bundleno = 11 (0xb), region = 130 }
 0x75e   :  { %5973 = vsyncpa [#allocation3], 1 }
 0x75f   :  { %5975 = vsyncpa [#allocation3 + $0x1], 1 }

</bundles_post_ra>
